<compile_context>
chip_gen: v7x
topology: tpu7x:2x2x1
jax: 0.10.0
libtpu: 0.0.40
codegen_flags: <defaults>
</compile_context>

<pallas_src>
import functools

import jax
import jax.numpy as jnp
from jax.experimental import pallas as pl
from jax.experimental.pallas import tpu as pltpu

HIDDEN = 32
NUM_MRF = 3
NUM_LAYERS = 2
PRED_HORIZON = 4

_VMEM = pl.BlockSpec(memory_space=pltpu.MemorySpace.VMEM)


# --------------------------------------------------------------------------
# Fused forward kernel: encoders + MRF + HeteroConv layers + attention +
# prediction head, over the whole autoregressive horizon.
# --------------------------------------------------------------------------
def _fused_forward_kernel(
        xc_raw_ref, xk_raw_ref,
        a_sp_ref, a_bt_ref, a_ct_ref, a_gen_ref,
        enc_w_ref, w_ref, b_ref, whead_ref, bhead_ref,
        pred_ref,
        *, num_mrf, num_layers, pred_horizon, hidden):
    f32 = jnp.float32

    def mm(a, b):
        return jnp.dot(a, b, preferred_element_type=f32)

    # --- adjacency: fold mean normalisers into the matrices (hoisted, exact) -
    a_sp = a_sp_ref[...]      # [nc, nc]  county <- county (spatial)
    a_bt = a_bt_ref[...]      # [nc, nk]  county <- case   (belongs_to)
    a_ct = a_ct_ref[...]      # [nk, nc]  case   <- county (contains, reverse)
    a_gen = a_gen_ref[...]    # [nk, nk]  case   <- case   (genetic)

    def safe_inv(deg):
        # zero-degree rows of A are all-zero, so clamping to 1 is exact there
        return 1.0 / jnp.maximum(deg, 1.0)

    deg_sp = jnp.sum(a_sp, axis=1, keepdims=True)
    deg_bt = jnp.sum(a_bt, axis=1, keepdims=True)
    deg_gen = jnp.sum(a_gen, axis=1, keepdims=True)
    deg_ct = jnp.sum(a_ct, axis=1, keepdims=True)

    inv_mrf_c = safe_inv(deg_sp + deg_bt)   # MRF county: count over BOTH edge types
    a_sp_mrf = a_sp * inv_mrf_c
    a_bt_mrf = a_bt * inv_mrf_c
    a_gen_n = a_gen * safe_inv(deg_gen)     # MRF case norm == SAGE genetic mean
    a_sp_n = a_sp * safe_inv(deg_sp)        # SAGE per-edge-type means
    a_bt_n = a_bt * safe_inv(deg_bt)
    a_ct_n = a_ct * safe_inv(deg_ct)

    nc = a_sp.shape[0]
    nk = a_gen.shape[0]

    # --- unpack weight / bias stacks ONCE (reused across the whole horizon) --
    enc_w = enc_w_ref[...]                    # [2+1, H]: county-enc rows, then case-enc row
    wm_sp = w_ref[0]                          # MRF edge weights
    wm_bt = w_ref[1]
    wm_gen = w_ref[2]
    layer_w = []                              # (wl_sp, wl_bt, wr_c, wl_gen, wl_ct, wr_k)
    for l in range(num_layers):
        base = 3 + 6 * l
        layer_w.append(tuple(w_ref[base + j] for j in range(6)))

    bce = b_ref[0:1, :]
    bke = b_ref[1:2, :]
    bm_c = jnp.broadcast_to(b_ref[2:3, :], (nc, hidden))   # hoisted broadcasts
    bm_k = jnp.broadcast_to(b_ref[3:4, :], (nk, hidden))
    layer_b = []
    for l in range(num_layers):
        layer_b.append(
            (jnp.broadcast_to(b_ref[4 + 2 * l:5 + 2 * l, :], (nc, hidden)),
             jnp.broadcast_to(b_ref[5 + 2 * l:6 + 2 * l, :], (nk, hidden))))

    wa = whead_ref[:, 0:1]       # attention column for post-conv features
    wb = whead_ref[:, 1:2]       # attention column for initial (post-MRF) features
    wlin = whead_ref[:, 2:3]     # prediction head
    ba = bhead_ref[0:1, 0:1]
    blin = bhead_ref[0:1, 1:2]

    # --- node encoders (fan-in 2 / 1 -> unrolled broadcast-mul on the VPU) ---
    xc_raw = xc_raw_ref[...]                  # [nc, 2]
    xk_raw = xk_raw_ref[...]                  # [nk, 1]
    n_cf = xc_raw.shape[1]
    x_county = jnp.broadcast_to(bce, (nc, hidden))
    for f in range(n_cf):
        x_county = x_county + xc_raw[:, f:f + 1] * enc_w[f:f + 1, :]
    x_case = jnp.broadcast_to(bke, (nk, hidden))
    for f in range(xk_raw.shape[1]):
        x_case = x_case + xk_raw[:, f:f + 1] * enc_w[n_cf + f:n_cf + f + 1, :]

    col = jax.lax.broadcasted_iota(jnp.int32, (nc, pred_horizon), 1)
    pred_slab = jnp.zeros((nc, pred_horizon), f32)

    # --- autoregressive horizon loop (fully unrolled; state stays in vregs) --
    xc_cur = x_county
    for t in range(pred_horizon):
        # MRFCorrection: num_mrf iterations of message passing + residual adds
        xc = xc_cur
        xk = x_case               # case input keeps its step-0 encoding (reference semantics)
        for _ in range(num_mrf):
            # (A_norm @ X) @ W reassociation: N_dst <= N_src -> fewer MXU flops
            msg_c = mm(mm(a_sp_mrf, xc), wm_sp) + mm(mm(a_bt_mrf, xk), wm_bt)
            msg_k = mm(mm(a_gen_n, xk), wm_gen)
            xc = xc + jnp.maximum(msg_c + bm_c, 0.0)
            xk = xk + jnp.maximum(msg_k + bm_k, 0.0)
        initial_county = xc       # post-MRF clone in the reference

        # num_layers x HeteroConv(sum) of SAGEConv(mean), then ReLU
        for l in range(num_layers):
            wl_sp, wl_bt, wr_c, wl_gen, wl_ct, wr_k = layer_w[l]
            b_c, b_k = layer_b[l]
            m_sp = mm(a_sp_n, xc)       # county <- county (mean)
            m_bt = mm(a_bt_n, xk)       # county <- case
            m_gen = mm(a_gen_n, xk)     # case   <- case
            m_ct = mm(a_ct_n, xc)       # case   <- county
            # lin_r self terms folded: xc @ (wr_sp+wr_bt), xk @ (wr_gen+wr_ct)
            out_c = mm(m_sp, wl_sp) + mm(m_bt, wl_bt) + mm(xc, wr_c) + b_c
            out_k = mm(m_gen, wl_gen) + mm(m_ct, wl_ct) + mm(xk, wr_k) + b_k
            xc = jnp.maximum(out_c, 0.0)   # ReLU; dropout = identity
            xk = jnp.maximum(out_k, 0.0)

        # attention fuse (MXU dots vs [H,1] columns) + prediction head
        logit = mm(xc, wa) + mm(initial_county, wb) + ba
        att = jax.nn.sigmoid(logit)
        enhanced = att * xc + (1.0 - att) * initial_county
        pred_t = mm(enhanced, wlin) + blin             # [nc, 1]
        pred_slab = jnp.where(col == t, pred_t, pred_slab)

        xc_cur = enhanced          # autoregressive: GNN output feeds next step

    pred_ref[...] = pred_slab      # single lane-slab store of [nc, pred_horizon]


# --------------------------------------------------------------------------
# Parameter init (deterministic, shapes from the PyTorch __init__)
# --------------------------------------------------------------------------
def _xavier(key, shape):
    fan_in, fan_out = shape[0], shape[1]
    limit = (6.0 / (fan_in + fan_out)) ** 0.5
    return jax.random.uniform(key, shape, jnp.float32, -limit, limit)


def init_params(key, hidden=HIDDEN):
    keys = iter(jax.random.split(key, 64))
    params = {
        'county_encoder': {'w': _xavier(next(keys), (2, hidden)),
                           'b': jnp.zeros((1, hidden), jnp.float32)},
        'case_encoder': {'w': _xavier(next(keys), (1, hidden)),
                         'b': jnp.zeros((1, hidden), jnp.float32)},
        'mrf': {'w_spatial': _xavier(next(keys), (hidden, hidden)),
                'w_genetic': _xavier(next(keys), (hidden, hidden)),
                'w_belongs': _xavier(next(keys), (hidden, hidden)),
                'b_county': jnp.zeros((1, hidden), jnp.float32),
                'b_case': jnp.zeros((1, hidden), jnp.float32)},
        'convs': [],
        'county_attn': {'w_a': _xavier(next(keys), (1, hidden)),
                        'w_b': _xavier(next(keys), (1, hidden)),
                        'b': jnp.zeros((1, 1), jnp.float32)},
        'lin_county': {'w': _xavier(next(keys), (1, hidden)),
                       'b': jnp.zeros((1, 1), jnp.float32)},
    }
    for _ in range(NUM_LAYERS):
        layer = {}
        for et in ('spatial', 'belongs_to', 'genetic', 'contains'):
            layer[et] = {'wl': _xavier(next(keys), (hidden, hidden)),
                         'bl': jnp.zeros((1, hidden), jnp.float32),
                         'wr': _xavier(next(keys), (hidden, hidden))}
        params['convs'].append(layer)
    return params


# --------------------------------------------------------------------------
# Full forward: dense adjacency construction + weight packing/folding + one
# fused kernel launch (11 tiny VMEM operands, one output slab).
# --------------------------------------------------------------------------
def full_hetero_gnn_forward(params, x_county_raw, x_case_raw, edge_index_dict):
    nc = x_county_raw.shape[0]
    nk = x_case_raw.shape[0]

    def dense_adj(edge_index, n_dst, n_src):
        src, dst = edge_index[0], edge_index[1]
        return jnp.zeros((n_dst, n_src), jnp.float32).at[dst, src].add(1.0)

    a_sp = dense_adj(edge_index_dict[('county', 'spatial', 'county')], nc, nc)
    a_gen = dense_adj(edge_index_dict[('case', 'genetic', 'case')], nk, nk)
    a_bt = dense_adj(edge_index_dict[('case', 'belongs_to', 'county')], nc, nk)
    a_ct = a_bt.T    # reverse edge ('county', 'contains', 'case')

    case_feat = x_case_raw
    if case_feat.ndim == 1:
        case_feat = case_feat[:, None]

    convs = params['convs']

    # Pack all [H,H] weights into one slab; SAGEConv lin_r (self) terms and
    # lin_l biases pre-summed (horizon-invariant algebraic folding).
    mats = [params['mrf']['w_spatial'], params['mrf']['w_belongs'],
            params['mrf']['w_genetic']]
    for l in convs:
        mats += [l['spatial']['wl'], l['belongs_to']['wl'],
                 l['spatial']['wr'] + l['belongs_to']['wr'],
                 l['genetic']['wl'], l['contains']['wl'],
                 l['genetic']['wr'] + l['contains']['wr']]
    w_stack = jnp.stack(mats)                                   # [3+6L, H, H]

    bias_rows = [params['county_encoder']['b'], params['case_encoder']['b'],
                 params['mrf']['b_county'], params['mrf']['b_case']]
    for l in convs:
        bias_rows += [l['spatial']['bl'] + l['belongs_to']['bl'],
                      l['genetic']['bl'] + l['contains']['bl']]
    b_stack = jnp.concatenate(bias_rows, axis=0)                # [4+2L, H]

    enc_w = jnp.concatenate([params['county_encoder']['w'],
                             params['case_encoder']['w']], axis=0)   # [3, H]

    attn = params['county_attn']
    lin = params['lin_county']
    w_head = jnp.concatenate([attn['w_a'].T, attn['w_b'].T, lin['w'].T], axis=1)  # [H, 3]
    b_head = jnp.concatenate([attn['b'], lin['b']], axis=1)                       # [1, 2]

    kernel = functools.partial(_fused_forward_kernel,
                               num_mrf=NUM_MRF,
                               num_layers=len(convs),
                               pred_horizon=PRED_HORIZON,
                               hidden=HIDDEN)

    return pl.pallas_call(
        kernel,
        out_shape=jax.ShapeDtypeStruct((nc, PRED_HORIZON), jnp.float32),
        in_specs=[_VMEM] * 11,
        out_specs=_VMEM,
    )(x_county_raw, case_feat, a_sp, a_bt, a_ct, a_gen,
      enc_w, w_stack, b_stack, w_head, b_head)


# --------------------------------------------------------------------------
if __name__ == "__main__":
    key = jax.random.PRNGKey(0)
    ks = jax.random.split(key, 10)

    NUM_COUNTIES, NUM_CASES = 8, 16
    x_county = jax.random.normal(ks[0], (NUM_COUNTIES, 2), jnp.float32)
    x_case = jax.random.normal(ks[1], (NUM_CASES,), jnp.float32)

    e_spatial = jnp.stack([jax.random.randint(ks[2], (20,), 0, NUM_COUNTIES),
                           jax.random.randint(ks[3], (20,), 0, NUM_COUNTIES)]).astype(jnp.int32)
    e_genetic = jnp.stack([jax.random.randint(ks[4], (30,), 0, NUM_CASES),
                           jax.random.randint(ks[5], (30,), 0, NUM_CASES)]).astype(jnp.int32)
    e_belongs = jnp.stack([jnp.arange(NUM_CASES, dtype=jnp.int32),
                           jax.random.randint(ks[6], (NUM_CASES,), 0, NUM_COUNTIES).astype(jnp.int32)])

    edge_index_dict = {
        ('county', 'spatial', 'county'): e_spatial,
        ('case', 'genetic', 'case'): e_genetic,
        ('case', 'belongs_to', 'county'): e_belongs,
    }

    params = init_params(ks[7], HIDDEN)

    out = full_hetero_gnn_forward(params, x_county, x_case, edge_index_dict)
    out = jax.block_until_ready(out)
    assert out.shape == (NUM_COUNTIES, PRED_HORIZON), out.shape
    assert bool(jnp.all(jnp.isfinite(out)))
    print("KERNEL_OK")
</pallas_src>

<mosaic_0001>
module attributes {stable_mosaic.version = 11 : i64} {
  func.func @_fused_forward_kernel(%arg0: memref<8x2xf32, #tpu.memory_space<vmem>>, %arg1: memref<16x1xf32, #tpu.memory_space<vmem>>, %arg2: memref<8x8xf32, #tpu.memory_space<vmem>>, %arg3: memref<8x16xf32, #tpu.memory_space<vmem>>, %arg4: memref<16x8xf32, #tpu.memory_space<vmem>>, %arg5: memref<16x16xf32, #tpu.memory_space<vmem>>, %arg6: memref<3x32xf32, #tpu.memory_space<vmem>>, %arg7: memref<15x32x32xf32, #tpu.memory_space<vmem>>, %arg8: memref<8x32xf32, #tpu.memory_space<vmem>>, %arg9: memref<32x3xf32, #tpu.memory_space<vmem>>, %arg10: memref<1x2xf32, #tpu.memory_space<vmem>>, %arg11: memref<8x4xf32, #tpu.memory_space<vmem>>) attributes {dimension_semantics = [], scalar_prefetch = 0 : i64, scratch_operands = 0 : i64, tpu.core_type = #tpu.core_type<tc>} {
    %c0 = arith.constant 0 : index
    %c0_0 = arith.constant 0 : index
    %0 = vector.load %arg2[%c0, %c0_0] : memref<8x8xf32, #tpu.memory_space<vmem>>, vector<8x8xf32>
    %c0_1 = arith.constant 0 : index
    %c0_2 = arith.constant 0 : index
    %1 = vector.load %arg3[%c0_1, %c0_2] : memref<8x16xf32, #tpu.memory_space<vmem>>, vector<8x16xf32>
    %c0_3 = arith.constant 0 : index
    %c0_4 = arith.constant 0 : index
    %2 = vector.load %arg4[%c0_3, %c0_4] : memref<16x8xf32, #tpu.memory_space<vmem>>, vector<16x8xf32>
    %c0_5 = arith.constant 0 : index
    %c0_6 = arith.constant 0 : index
    %3 = vector.load %arg5[%c0_5, %c0_6] : memref<16x16xf32, #tpu.memory_space<vmem>>, vector<16x16xf32>
    %cst = arith.constant dense<0.000000e+00> : vector<8xf32>
    %4 = vector.multi_reduction <add>, %0, %cst [1] : vector<8x8xf32> to vector<8xf32>
    %5 = vector.shape_cast %4 : vector<8xf32> to vector<8x1xf32>
    %cst_7 = arith.constant dense<0.000000e+00> : vector<8xf32>
    %6 = vector.multi_reduction <add>, %1, %cst_7 [1] : vector<8x16xf32> to vector<8xf32>
    %7 = vector.shape_cast %6 : vector<8xf32> to vector<8x1xf32>
    %cst_8 = arith.constant dense<0.000000e+00> : vector<16xf32>
    %8 = vector.multi_reduction <add>, %3, %cst_8 [1] : vector<16x16xf32> to vector<16xf32>
    %9 = vector.shape_cast %8 : vector<16xf32> to vector<16x1xf32>
    %cst_9 = arith.constant dense<0.000000e+00> : vector<16xf32>
    %10 = vector.multi_reduction <add>, %2, %cst_9 [1] : vector<16x8xf32> to vector<16xf32>
    %11 = vector.shape_cast %10 : vector<16xf32> to vector<16x1xf32>
    %12 = arith.addf %5, %7 : vector<8x1xf32>
    %cst_10 = arith.constant 1.000000e+00 : f32
    %13 = vector.broadcast %cst_10 : f32 to vector<8x1xf32>
    %14 = arith.maximumf %12, %13 : vector<8x1xf32>
    %cst_11 = arith.constant 1.000000e+00 : f32
    %15 = vector.broadcast %cst_11 : f32 to vector<8x1xf32>
    %16 = arith.divf %15, %14 : vector<8x1xf32>
    %17 = vector.broadcast %16 : vector<8x1xf32> to vector<8x8xf32>
    %18 = arith.mulf %0, %17 : vector<8x8xf32>
    %19 = vector.broadcast %16 : vector<8x1xf32> to vector<8x16xf32>
    %20 = arith.mulf %1, %19 : vector<8x16xf32>
    %cst_12 = arith.constant 1.000000e+00 : f32
    %21 = vector.broadcast %cst_12 : f32 to vector<16x1xf32>
    %22 = arith.maximumf %9, %21 : vector<16x1xf32>
    %cst_13 = arith.constant 1.000000e+00 : f32
    %23 = vector.broadcast %cst_13 : f32 to vector<16x1xf32>
    %24 = arith.divf %23, %22 : vector<16x1xf32>
    %25 = vector.broadcast %24 : vector<16x1xf32> to vector<16x16xf32>
    %26 = arith.mulf %3, %25 : vector<16x16xf32>
    %cst_14 = arith.constant 1.000000e+00 : f32
    %27 = vector.broadcast %cst_14 : f32 to vector<8x1xf32>
    %28 = arith.maximumf %5, %27 : vector<8x1xf32>
    %cst_15 = arith.constant 1.000000e+00 : f32
    %29 = vector.broadcast %cst_15 : f32 to vector<8x1xf32>
    %30 = arith.divf %29, %28 : vector<8x1xf32>
    %31 = vector.broadcast %30 : vector<8x1xf32> to vector<8x8xf32>
    %32 = arith.mulf %0, %31 : vector<8x8xf32>
    %cst_16 = arith.constant 1.000000e+00 : f32
    %33 = vector.broadcast %cst_16 : f32 to vector<8x1xf32>
    %34 = arith.maximumf %7, %33 : vector<8x1xf32>
    %cst_17 = arith.constant 1.000000e+00 : f32
    %35 = vector.broadcast %cst_17 : f32 to vector<8x1xf32>
    %36 = arith.divf %35, %34 : vector<8x1xf32>
    %37 = vector.broadcast %36 : vector<8x1xf32> to vector<8x16xf32>
    %38 = arith.mulf %1, %37 : vector<8x16xf32>
    %cst_18 = arith.constant 1.000000e+00 : f32
    %39 = vector.broadcast %cst_18 : f32 to vector<16x1xf32>
    %40 = arith.maximumf %11, %39 : vector<16x1xf32>
    %cst_19 = arith.constant 1.000000e+00 : f32
    %41 = vector.broadcast %cst_19 : f32 to vector<16x1xf32>
    %42 = arith.divf %41, %40 : vector<16x1xf32>
    %43 = vector.broadcast %42 : vector<16x1xf32> to vector<16x8xf32>
    %44 = arith.mulf %2, %43 : vector<16x8xf32>
    %c0_20 = arith.constant 0 : index
    %c0_21 = arith.constant 0 : index
    %45 = vector.load %arg6[%c0_20, %c0_21] : memref<3x32xf32, #tpu.memory_space<vmem>>, vector<3x32xf32>
    %c0_22 = arith.constant 0 : index
    %c0_23 = arith.constant 0 : index
    %c0_24 = arith.constant 0 : index
    %46 = vector.load %arg7[%c0_22, %c0_23, %c0_24] : memref<15x32x32xf32, #tpu.memory_space<vmem>>, vector<1x32x32xf32>
    %47 = vector.shape_cast %46 : vector<1x32x32xf32> to vector<32x32xf32>
    %c1 = arith.constant 1 : index
    %c0_25 = arith.constant 0 : index
    %c0_26 = arith.constant 0 : index
    %48 = vector.load %arg7[%c1, %c0_25, %c0_26] : memref<15x32x32xf32, #tpu.memory_space<vmem>>, vector<1x32x32xf32>
    %49 = vector.shape_cast %48 : vector<1x32x32xf32> to vector<32x32xf32>
    %c2 = arith.constant 2 : index
    %c0_27 = arith.constant 0 : index
    %c0_28 = arith.constant 0 : index
    %50 = vector.load %arg7[%c2, %c0_27, %c0_28] : memref<15x32x32xf32, #tpu.memory_space<vmem>>, vector<1x32x32xf32>
    %51 = vector.shape_cast %50 : vector<1x32x32xf32> to vector<32x32xf32>
    %c3 = arith.constant 3 : index
    %c0_29 = arith.constant 0 : index
    %c0_30 = arith.constant 0 : index
    %52 = vector.load %arg7[%c3, %c0_29, %c0_30] : memref<15x32x32xf32, #tpu.memory_space<vmem>>, vector<1x32x32xf32>
    %53 = vector.shape_cast %52 : vector<1x32x32xf32> to vector<32x32xf32>
    %c4 = arith.constant 4 : index
    %c0_31 = arith.constant 0 : index
    %c0_32 = arith.constant 0 : index
    %54 = vector.load %arg7[%c4, %c0_31, %c0_32] : memref<15x32x32xf32, #tpu.memory_space<vmem>>, vector<1x32x32xf32>
    %55 = vector.shape_cast %54 : vector<1x32x32xf32> to vector<32x32xf32>
    %c5 = arith.constant 5 : index
    %c0_33 = arith.constant 0 : index
    %c0_34 = arith.constant 0 : index
    %56 = vector.load %arg7[%c5, %c0_33, %c0_34] : memref<15x32x32xf32, #tpu.memory_space<vmem>>, vector<1x32x32xf32>
    %57 = vector.shape_cast %56 : vector<1x32x32xf32> to vector<32x32xf32>
    %c6 = arith.constant 6 : index
    %c0_35 = arith.constant 0 : index
    %c0_36 = arith.constant 0 : index
    %58 = vector.load %arg7[%c6, %c0_35, %c0_36] : memref<15x32x32xf32, #tpu.memory_space<vmem>>, vector<1x32x32xf32>
    %59 = vector.shape_cast %58 : vector<1x32x32xf32> to vector<32x32xf32>
    %c7 = arith.constant 7 : index
    %c0_37 = arith.constant 0 : index
    %c0_38 = arith.constant 0 : index
    %60 = vector.load %arg7[%c7, %c0_37, %c0_38] : memref<15x32x32xf32, #tpu.memory_space<vmem>>, vector<1x32x32xf32>
    %61 = vector.shape_cast %60 : vector<1x32x32xf32> to vector<32x32xf32>
    %c8 = arith.constant 8 : index
    %c0_39 = arith.constant 0 : index
    %c0_40 = arith.constant 0 : index
    %62 = vector.load %arg7[%c8, %c0_39, %c0_40] : memref<15x32x32xf32, #tpu.memory_space<vmem>>, vector<1x32x32xf32>
    %63 = vector.shape_cast %62 : vector<1x32x32xf32> to vector<32x32xf32>
    %c9 = arith.constant 9 : index
    %c0_41 = arith.constant 0 : index
    %c0_42 = arith.constant 0 : index
    %64 = vector.load %arg7[%c9, %c0_41, %c0_42] : memref<15x32x32xf32, #tpu.memory_space<vmem>>, vector<1x32x32xf32>
    %65 = vector.shape_cast %64 : vector<1x32x32xf32> to vector<32x32xf32>
    %c10 = arith.constant 10 : index
    %c0_43 = arith.constant 0 : index
    %c0_44 = arith.constant 0 : index
    %66 = vector.load %arg7[%c10, %c0_43, %c0_44] : memref<15x32x32xf32, #tpu.memory_space<vmem>>, vector<1x32x32xf32>
    %67 = vector.shape_cast %66 : vector<1x32x32xf32> to vector<32x32xf32>
    %c11 = arith.constant 11 : index
    %c0_45 = arith.constant 0 : index
    %c0_46 = arith.constant 0 : index
    %68 = vector.load %arg7[%c11, %c0_45, %c0_46] : memref<15x32x32xf32, #tpu.memory_space<vmem>>, vector<1x32x32xf32>
    %69 = vector.shape_cast %68 : vector<1x32x32xf32> to vector<32x32xf32>
    %c0_47 = arith.constant 0 : index
    %c0_48 = arith.constant 0 : index
    %70 = vector.load %arg8[%c0_47, %c0_48] : memref<8x32xf32, #tpu.memory_space<vmem>>, vector<1x32xf32>
    %c1_49 = arith.constant 1 : index
    %c0_50 = arith.constant 0 : index
    %71 = vector.load %arg8[%c1_49, %c0_50] : memref<8x32xf32, #tpu.memory_space<vmem>>, vector<1x32xf32>
    %c2_51 = arith.constant 2 : index
    %c0_52 = arith.constant 0 : index
    %72 = vector.load %arg8[%c2_51, %c0_52] : memref<8x32xf32, #tpu.memory_space<vmem>>, vector<1x32xf32>
    %73 = vector.shape_cast %72 : vector<1x32xf32> to vector<1x32xf32>
    %74 = vector.broadcast %73 : vector<1x32xf32> to vector<8x32xf32>
    %c3_53 = arith.constant 3 : index
    %c0_54 = arith.constant 0 : index
    %75 = vector.load %arg8[%c3_53, %c0_54] : memref<8x32xf32, #tpu.memory_space<vmem>>, vector<1x32xf32>
    %76 = vector.shape_cast %75 : vector<1x32xf32> to vector<1x32xf32>
    %77 = vector.broadcast %76 : vector<1x32xf32> to vector<16x32xf32>
    %c4_55 = arith.constant 4 : index
    %c0_56 = arith.constant 0 : index
    %78 = vector.load %arg8[%c4_55, %c0_56] : memref<8x32xf32, #tpu.memory_space<vmem>>, vector<1x32xf32>
    %79 = vector.shape_cast %78 : vector<1x32xf32> to vector<1x32xf32>
    %80 = vector.broadcast %79 : vector<1x32xf32> to vector<8x32xf32>
    %c5_57 = arith.constant 5 : index
    %c0_58 = arith.constant 0 : index
    %81 = vector.load %arg8[%c5_57, %c0_58] : memref<8x32xf32, #tpu.memory_space<vmem>>, vector<1x32xf32>
    %82 = vector.shape_cast %81 : vector<1x32xf32> to vector<1x32xf32>
    %83 = vector.broadcast %82 : vector<1x32xf32> to vector<16x32xf32>
    %c6_59 = arith.constant 6 : index
    %c0_60 = arith.constant 0 : index
    %84 = vector.load %arg8[%c6_59, %c0_60] : memref<8x32xf32, #tpu.memory_space<vmem>>, vector<1x32xf32>
    %85 = vector.shape_cast %84 : vector<1x32xf32> to vector<1x32xf32>
    %86 = vector.broadcast %85 : vector<1x32xf32> to vector<8x32xf32>
    %c0_61 = arith.constant 0 : index
    %c0_62 = arith.constant 0 : index
    %87 = vector.load %arg9[%c0_61, %c0_62] : memref<32x3xf32, #tpu.memory_space<vmem>>, vector<32x1xf32>
    %c0_63 = arith.constant 0 : index
    %c1_64 = arith.constant 1 : index
    %88 = vector.load %arg9[%c0_63, %c1_64] : memref<32x3xf32, #tpu.memory_space<vmem>>, vector<32x1xf32>
    %c0_65 = arith.constant 0 : index
    %c2_66 = arith.constant 2 : index
    %89 = vector.load %arg9[%c0_65, %c2_66] : memref<32x3xf32, #tpu.memory_space<vmem>>, vector<32x1xf32>
    %c0_67 = arith.constant 0 : index
    %c0_68 = arith.constant 0 : index
    %90 = vector.load %arg10[%c0_67, %c0_68] : memref<1x2xf32, #tpu.memory_space<vmem>>, vector<1x1xf32>
    %c0_69 = arith.constant 0 : index
    %c1_70 = arith.constant 1 : index
    %91 = vector.load %arg10[%c0_69, %c1_70] : memref<1x2xf32, #tpu.memory_space<vmem>>, vector<1x1xf32>
    %c0_71 = arith.constant 0 : index
    %c0_72 = arith.constant 0 : index
    %92 = vector.load %arg0[%c0_71, %c0_72] : memref<8x2xf32, #tpu.memory_space<vmem>>, vector<8x2xf32>
    %c0_73 = arith.constant 0 : index
    %c0_74 = arith.constant 0 : index
    %93 = vector.load %arg1[%c0_73, %c0_74] : memref<16x1xf32, #tpu.memory_space<vmem>>, vector<16x1xf32>
    %94 = vector.shape_cast %70 : vector<1x32xf32> to vector<1x32xf32>
    %95 = vector.broadcast %94 : vector<1x32xf32> to vector<8x32xf32>
    %96 = vector.extract_strided_slice %92 {offsets = [0, 0], sizes = [8, 1], strides = [1, 1]} : vector<8x2xf32> to vector<8x1xf32>
    %97 = vector.extract_strided_slice %45 {offsets = [0, 0], sizes = [1, 32], strides = [1, 1]} : vector<3x32xf32> to vector<1x32xf32>
    %98 = vector.broadcast %96 : vector<8x1xf32> to vector<8x32xf32>
    %99 = vector.broadcast %97 : vector<1x32xf32> to vector<8x32xf32>
    %100 = arith.mulf %98, %99 : vector<8x32xf32>
    %101 = arith.addf %95, %100 : vector<8x32xf32>
    %102 = vector.extract_strided_slice %92 {offsets = [0, 1], sizes = [8, 1], strides = [1, 1]} : vector<8x2xf32> to vector<8x1xf32>
    %103 = vector.extract_strided_slice %45 {offsets = [1, 0], sizes = [1, 32], strides = [1, 1]} : vector<3x32xf32> to vector<1x32xf32>
    %104 = vector.broadcast %102 : vector<8x1xf32> to vector<8x32xf32>
    %105 = vector.broadcast %103 : vector<1x32xf32> to vector<8x32xf32>
    %106 = arith.mulf %104, %105 : vector<8x32xf32>
    %107 = arith.addf %101, %106 : vector<8x32xf32>
    %108 = vector.shape_cast %71 : vector<1x32xf32> to vector<1x32xf32>
    %109 = vector.broadcast %108 : vector<1x32xf32> to vector<16x32xf32>
    %110 = vector.extract_strided_slice %45 {offsets = [2, 0], sizes = [1, 32], strides = [1, 1]} : vector<3x32xf32> to vector<1x32xf32>
    %111 = vector.broadcast %93 : vector<16x1xf32> to vector<16x32xf32>
    %112 = vector.broadcast %110 : vector<1x32xf32> to vector<16x32xf32>
    %113 = arith.mulf %111, %112 : vector<16x32xf32>
    %114 = arith.addf %109, %113 : vector<16x32xf32>
    %115 = tpu.iota {dimensions = array<i32: 1>} : vector<8x4xi32>
    %cst_75 = arith.constant 0.000000e+00 : f32
    %116 = vector.broadcast %cst_75 : f32 to vector<8x4xf32>
    %cst_76 = arith.constant dense<0.000000e+00> : vector<8x32xf32>
    %117 = tpu.matmul %18, %107, %cst_76 {dimension_numbers = #tpu.dot_dimension_numbers<[1], [0], [0], [1], [0, 0, 1, 1], [], []>} : vector<8x8xf32>, vector<8x32xf32>, vector<8x32xf32> -> vector<8x32xf32>
    %cst_77 = arith.constant dense<0.000000e+00> : vector<8x32xf32>
    %118 = tpu.matmul %117, %47, %cst_77 {dimension_numbers = #tpu.dot_dimension_numbers<[1], [0], [0], [1], [0, 0, 1, 1], [], []>} : vector<8x32xf32>, vector<32x32xf32>, vector<8x32xf32> -> vector<8x32xf32>
    %cst_78 = arith.constant dense<0.000000e+00> : vector<8x32xf32>
    %119 = tpu.matmul %20, %114, %cst_78 {dimension_numbers = #tpu.dot_dimension_numbers<[1], [0], [0], [1], [0, 0, 1, 1], [], []>} : vector<8x16xf32>, vector<16x32xf32>, vector<8x32xf32> -> vector<8x32xf32>
    %cst_79 = arith.constant dense<0.000000e+00> : vector<8x32xf32>
    %120 = tpu.matmul %119, %49, %cst_79 {dimension_numbers = #tpu.dot_dimension_numbers<[1], [0], [0], [1], [0, 0, 1, 1], [], []>} : vector<8x32xf32>, vector<32x32xf32>, vector<8x32xf32> -> vector<8x32xf32>
    %121 = arith.addf %118, %120 : vector<8x32xf32>
    %cst_80 = arith.constant dense<0.000000e+00> : vector<16x32xf32>
    %122 = tpu.matmul %26, %114, %cst_80 {dimension_numbers = #tpu.dot_dimension_numbers<[1], [0], [0], [1], [0, 0, 1, 1], [], []>} : vector<16x16xf32>, vector<16x32xf32>, vector<16x32xf32> -> vector<16x32xf32>
    %cst_81 = arith.constant dense<0.000000e+00> : vector<16x32xf32>
    %123 = tpu.matmul %122, %51, %cst_81 {dimension_numbers = #tpu.dot_dimension_numbers<[1], [0], [0], [1], [0, 0, 1, 1], [], []>} : vector<16x32xf32>, vector<32x32xf32>, vector<16x32xf32> -> vector<16x32xf32>
    %124 = arith.addf %121, %74 : vector<8x32xf32>
    %cst_82 = arith.constant 0.000000e+00 : f32
    %125 = vector.broadcast %cst_82 : f32 to vector<8x32xf32>
    %126 = arith.maximumf %124, %125 : vector<8x32xf32>
    %127 = arith.addf %107, %126 : vector<8x32xf32>
    %128 = arith.addf %123, %77 : vector<16x32xf32>
    %cst_83 = arith.constant 0.000000e+00 : f32
    %129 = vector.broadcast %cst_83 : f32 to vector<16x32xf32>
    %130 = arith.maximumf %128, %129 : vector<16x32xf32>
    %131 = arith.addf %114, %130 : vector<16x32xf32>
    %cst_84 = arith.constant dense<0.000000e+00> : vector<8x32xf32>
    %132 = tpu.matmul %18, %127, %cst_84 {dimension_numbers = #tpu.dot_dimension_numbers<[1], [0], [0], [1], [0, 0, 1, 1], [], []>} : vector<8x8xf32>, vector<8x32xf32>, vector<8x32xf32> -> vector<8x32xf32>
    %cst_85 = arith.constant dense<0.000000e+00> : vector<8x32xf32>
    %133 = tpu.matmul %132, %47, %cst_85 {dimension_numbers = #tpu.dot_dimension_numbers<[1], [0], [0], [1], [0, 0, 1, 1], [], []>} : vector<8x32xf32>, vector<32x32xf32>, vector<8x32xf32> -> vector<8x32xf32>
    %cst_86 = arith.constant dense<0.000000e+00> : vector<8x32xf32>
    %134 = tpu.matmul %20, %131, %cst_86 {dimension_numbers = #tpu.dot_dimension_numbers<[1], [0], [0], [1], [0, 0, 1, 1], [], []>} : vector<8x16xf32>, vector<16x32xf32>, vector<8x32xf32> -> vector<8x32xf32>
    %cst_87 = arith.constant dense<0.000000e+00> : vector<8x32xf32>
    %135 = tpu.matmul %134, %49, %cst_87 {dimension_numbers = #tpu.dot_dimension_numbers<[1], [0], [0], [1], [0, 0, 1, 1], [], []>} : vector<8x32xf32>, vector<32x32xf32>, vector<8x32xf32> -> vector<8x32xf32>
    %136 = arith.addf %133, %135 : vector<8x32xf32>
    %cst_88 = arith.constant dense<0.000000e+00> : vector<16x32xf32>
    %137 = tpu.matmul %26, %131, %cst_88 {dimension_numbers = #tpu.dot_dimension_numbers<[1], [0], [0], [1], [0, 0, 1, 1], [], []>} : vector<16x16xf32>, vector<16x32xf32>, vector<16x32xf32> -> vector<16x32xf32>
    %cst_89 = arith.constant dense<0.000000e+00> : vector<16x32xf32>
    %138 = tpu.matmul %137, %51, %cst_89 {dimension_numbers = #tpu.dot_dimension_numbers<[1], [0], [0], [1], [0, 0, 1, 1], [], []>} : vector<16x32xf32>, vector<32x32xf32>, vector<16x32xf32> -> vector<16x32xf32>
    %139 = arith.addf %136, %74 : vector<8x32xf32>
    %cst_90 = arith.constant 0.000000e+00 : f32
    %140 = vector.broadcast %cst_90 : f32 to vector<8x32xf32>
    %141 = arith.maximumf %139, %140 : vector<8x32xf32>
    %142 = arith.addf %127, %141 : vector<8x32xf32>
    %143 = arith.addf %138, %77 : vector<16x32xf32>
    %cst_91 = arith.constant 0.000000e+00 : f32
    %144 = vector.broadcast %cst_91 : f32 to vector<16x32xf32>
    %145 = arith.maximumf %143, %144 : vector<16x32xf32>
    %146 = arith.addf %131, %145 : vector<16x32xf32>
    %cst_92 = arith.constant dense<0.000000e+00> : vector<8x32xf32>
    %147 = tpu.matmul %18, %142, %cst_92 {dimension_numbers = #tpu.dot_dimension_numbers<[1], [0], [0], [1], [0, 0, 1, 1], [], []>} : vector<8x8xf32>, vector<8x32xf32>, vector<8x32xf32> -> vector<8x32xf32>
    %cst_93 = arith.constant dense<0.000000e+00> : vector<8x32xf32>
    %148 = tpu.matmul %147, %47, %cst_93 {dimension_numbers = #tpu.dot_dimension_numbers<[1], [0], [0], [1], [0, 0, 1, 1], [], []>} : vector<8x32xf32>, vector<32x32xf32>, vector<8x32xf32> -> vector<8x32xf32>
    %cst_94 = arith.constant dense<0.000000e+00> : vector<8x32xf32>
    %149 = tpu.matmul %20, %146, %cst_94 {dimension_numbers = #tpu.dot_dimension_numbers<[1], [0], [0], [1], [0, 0, 1, 1], [], []>} : vector<8x16xf32>, vector<16x32xf32>, vector<8x32xf32> -> vector<8x32xf32>
    %cst_95 = arith.constant dense<0.000000e+00> : vector<8x32xf32>
    %150 = tpu.matmul %149, %49, %cst_95 {dimension_numbers = #tpu.dot_dimension_numbers<[1], [0], [0], [1], [0, 0, 1, 1], [], []>} : vector<8x32xf32>, vector<32x32xf32>, vector<8x32xf32> -> vector<8x32xf32>
    %151 = arith.addf %148, %150 : vector<8x32xf32>
    %cst_96 = arith.constant dense<0.000000e+00> : vector<16x32xf32>
    %152 = tpu.matmul %26, %146, %cst_96 {dimension_numbers = #tpu.dot_dimension_numbers<[1], [0], [0], [1], [0, 0, 1, 1], [], []>} : vector<16x16xf32>, vector<16x32xf32>, vector<16x32xf32> -> vector<16x32xf32>
    %cst_97 = arith.constant dense<0.000000e+00> : vector<16x32xf32>
    %153 = tpu.matmul %152, %51, %cst_97 {dimension_numbers = #tpu.dot_dimension_numbers<[1], [0], [0], [1], [0, 0, 1, 1], [], []>} : vector<16x32xf32>, vector<32x32xf32>, vector<16x32xf32> -> vector<16x32xf32>
    %154 = arith.addf %151, %74 : vector<8x32xf32>
    %cst_98 = arith.constant 0.000000e+00 : f32
    %155 = vector.broadcast %cst_98 : f32 to vector<8x32xf32>
    %156 = arith.maximumf %154, %155 : vector<8x32xf32>
    %157 = arith.addf %142, %156 : vector<8x32xf32>
    %158 = arith.addf %153, %77 : vector<16x32xf32>
    %cst_99 = arith.constant 0.000000e+00 : f32
    %159 = vector.broadcast %cst_99 : f32 to vector<16x32xf32>
    %160 = arith.maximumf %158, %159 : vector<16x32xf32>
    %161 = arith.addf %146, %160 : vector<16x32xf32>
    %cst_100 = arith.constant dense<0.000000e+00> : vector<8x32xf32>
    %162 = tpu.matmul %32, %157, %cst_100 {dimension_numbers = #tpu.dot_dimension_numbers<[1], [0], [0], [1], [0, 0, 1, 1], [], []>} : vector<8x8xf32>, vector<8x32xf32>, vector<8x32xf32> -> vector<8x32xf32>
    %cst_101 = arith.constant dense<0.000000e+00> : vector<8x32xf32>
    %163 = tpu.matmul %38, %161, %cst_101 {dimension_numbers = #tpu.dot_dimension_numbers<[1], [0], [0], [1], [0, 0, 1, 1], [], []>} : vector<8x16xf32>, vector<16x32xf32>, vector<8x32xf32> -> vector<8x32xf32>
    %cst_102 = arith.constant dense<0.000000e+00> : vector<16x32xf32>
    %164 = tpu.matmul %26, %161, %cst_102 {dimension_numbers = #tpu.dot_dimension_numbers<[1], [0], [0], [1], [0, 0, 1, 1], [], []>} : vector<16x16xf32>, vector<16x32xf32>, vector<16x32xf32> -> vector<16x32xf32>
    %cst_103 = arith.constant dense<0.000000e+00> : vector<16x32xf32>
    %165 = tpu.matmul %44, %157, %cst_103 {dimension_numbers = #tpu.dot_dimension_numbers<[1], [0], [0], [1], [0, 0, 1, 1], [], []>} : vector<16x8xf32>, vector<8x32xf32>, vector<16x32xf32> -> vector<16x32xf32>
    %cst_104 = arith.constant dense<0.000000e+00> : vector<8x32xf32>
    %166 = tpu.matmul %162, %53, %cst_104 {dimension_numbers = #tpu.dot_dimension_numbers<[1], [0], [0], [1], [0, 0, 1, 1], [], []>} : vector<8x32xf32>, vector<32x32xf32>, vector<8x32xf32> -> vector<8x32xf32>
    %cst_105 = arith.constant dense<0.000000e+00> : vector<8x32xf32>
    %167 = tpu.matmul %163, %55, %cst_105 {dimension_numbers = #tpu.dot_dimension_numbers<[1], [0], [0], [1], [0, 0, 1, 1], [], []>} : vector<8x32xf32>, vector<32x32xf32>, vector<8x32xf32> -> vector<8x32xf32>
    %168 = arith.addf %166, %167 : vector<8x32xf32>
    %cst_106 = arith.constant dense<0.000000e+00> : vector<8x32xf32>
    %169 = tpu.matmul %157, %57, %cst_106 {dimension_numbers = #tpu.dot_dimension_numbers<[1], [0], [0], [1], [0, 0, 1, 1], [], []>} : vector<8x32xf32>, vector<32x32xf32>, vector<8x32xf32> -> vector<8x32xf32>
    %170 = arith.addf %168, %169 : vector<8x32xf32>
    %171 = arith.addf %170, %80 : vector<8x32xf32>
    %cst_107 = arith.constant dense<0.000000e+00> : vector<16x32xf32>
    %172 = tpu.matmul %164, %59, %cst_107 {dimension_numbers = #tpu.dot_dimension_numbers<[1], [0], [0], [1], [0, 0, 1, 1], [], []>} : vector<16x32xf32>, vector<32x32xf32>, vector<16x32xf32> -> vector<16x32xf32>
    %cst_108 = arith.constant dense<0.000000e+00> : vector<16x32xf32>
    %173 = tpu.matmul %165, %61, %cst_108 {dimension_numbers = #tpu.dot_dimension_numbers<[1], [0], [0], [1], [0, 0, 1, 1], [], []>} : vector<16x32xf32>, vector<32x32xf32>, vector<16x32xf32> -> vector<16x32xf32>
    %174 = arith.addf %172, %173 : vector<16x32xf32>
    %cst_109 = arith.constant dense<0.000000e+00> : vector<16x32xf32>
    %175 = tpu.matmul %161, %63, %cst_109 {dimension_numbers = #tpu.dot_dimension_numbers<[1], [0], [0], [1], [0, 0, 1, 1], [], []>} : vector<16x32xf32>, vector<32x32xf32>, vector<16x32xf32> -> vector<16x32xf32>
    %176 = arith.addf %174, %175 : vector<16x32xf32>
    %177 = arith.addf %176, %83 : vector<16x32xf32>
    %cst_110 = arith.constant 0.000000e+00 : f32
    %178 = vector.broadcast %cst_110 : f32 to vector<8x32xf32>
    %179 = arith.maximumf %171, %178 : vector<8x32xf32>
    %cst_111 = arith.constant 0.000000e+00 : f32
    %180 = vector.broadcast %cst_111 : f32 to vector<16x32xf32>
    %181 = arith.maximumf %177, %180 : vector<16x32xf32>
    %cst_112 = arith.constant dense<0.000000e+00> : vector<8x32xf32>
    %182 = tpu.matmul %32, %179, %cst_112 {dimension_numbers = #tpu.dot_dimension_numbers<[1], [0], [0], [1], [0, 0, 1, 1], [], []>} : vector<8x8xf32>, vector<8x32xf32>, vector<8x32xf32> -> vector<8x32xf32>
    %cst_113 = arith.constant dense<0.000000e+00> : vector<8x32xf32>
    %183 = tpu.matmul %38, %181, %cst_113 {dimension_numbers = #tpu.dot_dimension_numbers<[1], [0], [0], [1], [0, 0, 1, 1], [], []>} : vector<8x16xf32>, vector<16x32xf32>, vector<8x32xf32> -> vector<8x32xf32>
    %cst_114 = arith.constant dense<0.000000e+00> : vector<8x32xf32>
    %184 = tpu.matmul %182, %65, %cst_114 {dimension_numbers = #tpu.dot_dimension_numbers<[1], [0], [0], [1], [0, 0, 1, 1], [], []>} : vector<8x32xf32>, vector<32x32xf32>, vector<8x32xf32> -> vector<8x32xf32>
    %cst_115 = arith.constant dense<0.000000e+00> : vector<8x32xf32>
    %185 = tpu.matmul %183, %67, %cst_115 {dimension_numbers = #tpu.dot_dimension_numbers<[1], [0], [0], [1], [0, 0, 1, 1], [], []>} : vector<8x32xf32>, vector<32x32xf32>, vector<8x32xf32> -> vector<8x32xf32>
    %186 = arith.addf %184, %185 : vector<8x32xf32>
    %cst_116 = arith.constant dense<0.000000e+00> : vector<8x32xf32>
    %187 = tpu.matmul %179, %69, %cst_116 {dimension_numbers = #tpu.dot_dimension_numbers<[1], [0], [0], [1], [0, 0, 1, 1], [], []>} : vector<8x32xf32>, vector<32x32xf32>, vector<8x32xf32> -> vector<8x32xf32>
    %188 = arith.addf %186, %187 : vector<8x32xf32>
    %189 = arith.addf %188, %86 : vector<8x32xf32>
    %cst_117 = arith.constant 0.000000e+00 : f32
    %190 = vector.broadcast %cst_117 : f32 to vector<8x32xf32>
    %191 = arith.maximumf %189, %190 : vector<8x32xf32>
    %cst_118 = arith.constant dense<0.000000e+00> : vector<8x1xf32>
    %192 = tpu.matmul %191, %87, %cst_118 {dimension_numbers = #tpu.dot_dimension_numbers<[1], [0], [0], [1], [0, 0, 1, 1], [], []>} : vector<8x32xf32>, vector<32x1xf32>, vector<8x1xf32> -> vector<8x1xf32>
    %cst_119 = arith.constant dense<0.000000e+00> : vector<8x1xf32>
    %193 = tpu.matmul %157, %88, %cst_119 {dimension_numbers = #tpu.dot_dimension_numbers<[1], [0], [0], [1], [0, 0, 1, 1], [], []>} : vector<8x32xf32>, vector<32x1xf32>, vector<8x1xf32> -> vector<8x1xf32>
    %194 = arith.addf %192, %193 : vector<8x1xf32>
    %195 = vector.broadcast %90 : vector<1x1xf32> to vector<8x1xf32>
    %196 = arith.addf %194, %195 : vector<8x1xf32>
    %197 = arith.negf %196 : vector<8x1xf32>
    %198 = math.exp %197 : vector<8x1xf32>
    %cst_120 = arith.constant 1.000000e+00 : f32
    %199 = vector.broadcast %cst_120 : f32 to vector<8x1xf32>
    %200 = arith.addf %199, %198 : vector<8x1xf32>
    %201 = arith.divf %199, %200 : vector<8x1xf32>
    %202 = vector.broadcast %201 : vector<8x1xf32> to vector<8x32xf32>
    %203 = arith.mulf %202, %191 : vector<8x32xf32>
    %cst_121 = arith.constant 1.000000e+00 : f32
    %204 = vector.broadcast %cst_121 : f32 to vector<8x1xf32>
    %205 = arith.subf %204, %201 : vector<8x1xf32>
    %206 = vector.broadcast %205 : vector<8x1xf32> to vector<8x32xf32>
    %207 = arith.mulf %206, %157 : vector<8x32xf32>
    %208 = arith.addf %203, %207 : vector<8x32xf32>
    %cst_122 = arith.constant dense<0.000000e+00> : vector<8x1xf32>
    %209 = tpu.matmul %208, %89, %cst_122 {dimension_numbers = #tpu.dot_dimension_numbers<[1], [0], [0], [1], [0, 0, 1, 1], [], []>} : vector<8x32xf32>, vector<32x1xf32>, vector<8x1xf32> -> vector<8x1xf32>
    %210 = vector.broadcast %91 : vector<1x1xf32> to vector<8x1xf32>
    %211 = arith.addf %209, %210 : vector<8x1xf32>
    %c0_i32 = arith.constant 0 : i32
    %212 = vector.broadcast %c0_i32 : i32 to vector<8x4xi32>
    %213 = arith.cmpi eq, %115, %212 : vector<8x4xi32>
    %214 = vector.shape_cast %211 : vector<8x1xf32> to vector<8x1xf32>
    %215 = vector.broadcast %214 : vector<8x1xf32> to vector<8x4xf32>
    %216 = arith.select %213, %215, %116 : vector<8x4xi1>, vector<8x4xf32>
    %cst_123 = arith.constant dense<0.000000e+00> : vector<8x32xf32>
    %217 = tpu.matmul %18, %208, %cst_123 {dimension_numbers = #tpu.dot_dimension_numbers<[1], [0], [0], [1], [0, 0, 1, 1], [], []>} : vector<8x8xf32>, vector<8x32xf32>, vector<8x32xf32> -> vector<8x32xf32>
    %cst_124 = arith.constant dense<0.000000e+00> : vector<8x32xf32>
    %218 = tpu.matmul %217, %47, %cst_124 {dimension_numbers = #tpu.dot_dimension_numbers<[1], [0], [0], [1], [0, 0, 1, 1], [], []>} : vector<8x32xf32>, vector<32x32xf32>, vector<8x32xf32> -> vector<8x32xf32>
    %cst_125 = arith.constant dense<0.000000e+00> : vector<8x32xf32>
    %219 = tpu.matmul %20, %114, %cst_125 {dimension_numbers = #tpu.dot_dimension_numbers<[1], [0], [0], [1], [0, 0, 1, 1], [], []>} : vector<8x16xf32>, vector<16x32xf32>, vector<8x32xf32> -> vector<8x32xf32>
    %cst_126 = arith.constant dense<0.000000e+00> : vector<8x32xf32>
    %220 = tpu.matmul %219, %49, %cst_126 {dimension_numbers = #tpu.dot_dimension_numbers<[1], [0], [0], [1], [0, 0, 1, 1], [], []>} : vector<8x32xf32>, vector<32x32xf32>, vector<8x32xf32> -> vector<8x32xf32>
    %221 = arith.addf %218, %220 : vector<8x32xf32>
    %cst_127 = arith.constant dense<0.000000e+00> : vector<16x32xf32>
    %222 = tpu.matmul %26, %114, %cst_127 {dimension_numbers = #tpu.dot_dimension_numbers<[1], [0], [0], [1], [0, 0, 1, 1], [], []>} : vector<16x16xf32>, vector<16x32xf32>, vector<16x32xf32> -> vector<16x32xf32>
    %cst_128 = arith.constant dense<0.000000e+00> : vector<16x32xf32>
    %223 = tpu.matmul %222, %51, %cst_128 {dimension_numbers = #tpu.dot_dimension_numbers<[1], [0], [0], [1], [0, 0, 1, 1], [], []>} : vector<16x32xf32>, vector<32x32xf32>, vector<16x32xf32> -> vector<16x32xf32>
    %224 = arith.addf %221, %74 : vector<8x32xf32>
    %cst_129 = arith.constant 0.000000e+00 : f32
    %225 = vector.broadcast %cst_129 : f32 to vector<8x32xf32>
    %226 = arith.maximumf %224, %225 : vector<8x32xf32>
    %227 = arith.addf %208, %226 : vector<8x32xf32>
    %228 = arith.addf %223, %77 : vector<16x32xf32>
    %cst_130 = arith.constant 0.000000e+00 : f32
    %229 = vector.broadcast %cst_130 : f32 to vector<16x32xf32>
    %230 = arith.maximumf %228, %229 : vector<16x32xf32>
    %231 = arith.addf %114, %230 : vector<16x32xf32>
    %cst_131 = arith.constant dense<0.000000e+00> : vector<8x32xf32>
    %232 = tpu.matmul %18, %227, %cst_131 {dimension_numbers = #tpu.dot_dimension_numbers<[1], [0], [0], [1], [0, 0, 1, 1], [], []>} : vector<8x8xf32>, vector<8x32xf32>, vector<8x32xf32> -> vector<8x32xf32>
    %cst_132 = arith.constant dense<0.000000e+00> : vector<8x32xf32>
    %233 = tpu.matmul %232, %47, %cst_132 {dimension_numbers = #tpu.dot_dimension_numbers<[1], [0], [0], [1], [0, 0, 1, 1], [], []>} : vector<8x32xf32>, vector<32x32xf32>, vector<8x32xf32> -> vector<8x32xf32>
    %cst_133 = arith.constant dense<0.000000e+00> : vector<8x32xf32>
    %234 = tpu.matmul %20, %231, %cst_133 {dimension_numbers = #tpu.dot_dimension_numbers<[1], [0], [0], [1], [0, 0, 1, 1], [], []>} : vector<8x16xf32>, vector<16x32xf32>, vector<8x32xf32> -> vector<8x32xf32>
    %cst_134 = arith.constant dense<0.000000e+00> : vector<8x32xf32>
    %235 = tpu.matmul %234, %49, %cst_134 {dimension_numbers = #tpu.dot_dimension_numbers<[1], [0], [0], [1], [0, 0, 1, 1], [], []>} : vector<8x32xf32>, vector<32x32xf32>, vector<8x32xf32> -> vector<8x32xf32>
    %236 = arith.addf %233, %235 : vector<8x32xf32>
    %cst_135 = arith.constant dense<0.000000e+00> : vector<16x32xf32>
    %237 = tpu.matmul %26, %231, %cst_135 {dimension_numbers = #tpu.dot_dimension_numbers<[1], [0], [0], [1], [0, 0, 1, 1], [], []>} : vector<16x16xf32>, vector<16x32xf32>, vector<16x32xf32> -> vector<16x32xf32>
    %cst_136 = arith.constant dense<0.000000e+00> : vector<16x32xf32>
    %238 = tpu.matmul %237, %51, %cst_136 {dimension_numbers = #tpu.dot_dimension_numbers<[1], [0], [0], [1], [0, 0, 1, 1], [], []>} : vector<16x32xf32>, vector<32x32xf32>, vector<16x32xf32> -> vector<16x32xf32>
    %239 = arith.addf %236, %74 : vector<8x32xf32>
    %cst_137 = arith.constant 0.000000e+00 : f32
    %240 = vector.broadcast %cst_137 : f32 to vector<8x32xf32>
    %241 = arith.maximumf %239, %240 : vector<8x32xf32>
    %242 = arith.addf %227, %241 : vector<8x32xf32>
    %243 = arith.addf %238, %77 : vector<16x32xf32>
    %cst_138 = arith.constant 0.000000e+00 : f32
    %244 = vector.broadcast %cst_138 : f32 to vector<16x32xf32>
    %245 = arith.maximumf %243, %244 : vector<16x32xf32>
    %246 = arith.addf %231, %245 : vector<16x32xf32>
    %cst_139 = arith.constant dense<0.000000e+00> : vector<8x32xf32>
    %247 = tpu.matmul %18, %242, %cst_139 {dimension_numbers = #tpu.dot_dimension_numbers<[1], [0], [0], [1], [0, 0, 1, 1], [], []>} : vector<8x8xf32>, vector<8x32xf32>, vector<8x32xf32> -> vector<8x32xf32>
    %cst_140 = arith.constant dense<0.000000e+00> : vector<8x32xf32>
    %248 = tpu.matmul %247, %47, %cst_140 {dimension_numbers = #tpu.dot_dimension_numbers<[1], [0], [0], [1], [0, 0, 1, 1], [], []>} : vector<8x32xf32>, vector<32x32xf32>, vector<8x32xf32> -> vector<8x32xf32>
    %cst_141 = arith.constant dense<0.000000e+00> : vector<8x32xf32>
    %249 = tpu.matmul %20, %246, %cst_141 {dimension_numbers = #tpu.dot_dimension_numbers<[1], [0], [0], [1], [0, 0, 1, 1], [], []>} : vector<8x16xf32>, vector<16x32xf32>, vector<8x32xf32> -> vector<8x32xf32>
    %cst_142 = arith.constant dense<0.000000e+00> : vector<8x32xf32>
    %250 = tpu.matmul %249, %49, %cst_142 {dimension_numbers = #tpu.dot_dimension_numbers<[1], [0], [0], [1], [0, 0, 1, 1], [], []>} : vector<8x32xf32>, vector<32x32xf32>, vector<8x32xf32> -> vector<8x32xf32>
    %251 = arith.addf %248, %250 : vector<8x32xf32>
    %cst_143 = arith.constant dense<0.000000e+00> : vector<16x32xf32>
    %252 = tpu.matmul %26, %246, %cst_143 {dimension_numbers = #tpu.dot_dimension_numbers<[1], [0], [0], [1], [0, 0, 1, 1], [], []>} : vector<16x16xf32>, vector<16x32xf32>, vector<16x32xf32> -> vector<16x32xf32>
    %cst_144 = arith.constant dense<0.000000e+00> : vector<16x32xf32>
    %253 = tpu.matmul %252, %51, %cst_144 {dimension_numbers = #tpu.dot_dimension_numbers<[1], [0], [0], [1], [0, 0, 1, 1], [], []>} : vector<16x32xf32>, vector<32x32xf32>, vector<16x32xf32> -> vector<16x32xf32>
    %254 = arith.addf %251, %74 : vector<8x32xf32>
    %cst_145 = arith.constant 0.000000e+00 : f32
    %255 = vector.broadcast %cst_145 : f32 to vector<8x32xf32>
    %256 = arith.maximumf %254, %255 : vector<8x32xf32>
    %257 = arith.addf %242, %256 : vector<8x32xf32>
    %258 = arith.addf %253, %77 : vector<16x32xf32>
    %cst_146 = arith.constant 0.000000e+00 : f32
    %259 = vector.broadcast %cst_146 : f32 to vector<16x32xf32>
    %260 = arith.maximumf %258, %259 : vector<16x32xf32>
    %261 = arith.addf %246, %260 : vector<16x32xf32>
    %cst_147 = arith.constant dense<0.000000e+00> : vector<8x32xf32>
    %262 = tpu.matmul %32, %257, %cst_147 {dimension_numbers = #tpu.dot_dimension_numbers<[1], [0], [0], [1], [0, 0, 1, 1], [], []>} : vector<8x8xf32>, vector<8x32xf32>, vector<8x32xf32> -> vector<8x32xf32>
    %cst_148 = arith.constant dense<0.000000e+00> : vector<8x32xf32>
    %263 = tpu.matmul %38, %261, %cst_148 {dimension_numbers = #tpu.dot_dimension_numbers<[1], [0], [0], [1], [0, 0, 1, 1], [], []>} : vector<8x16xf32>, vector<16x32xf32>, vector<8x32xf32> -> vector<8x32xf32>
    %cst_149 = arith.constant dense<0.000000e+00> : vector<16x32xf32>
    %264 = tpu.matmul %26, %261, %cst_149 {dimension_numbers = #tpu.dot_dimension_numbers<[1], [0], [0], [1], [0, 0, 1, 1], [], []>} : vector<16x16xf32>, vector<16x32xf32>, vector<16x32xf32> -> vector<16x32xf32>
    %cst_150 = arith.constant dense<0.000000e+00> : vector<16x32xf32>
    %265 = tpu.matmul %44, %257, %cst_150 {dimension_numbers = #tpu.dot_dimension_numbers<[1], [0], [0], [1], [0, 0, 1, 1], [], []>} : vector<16x8xf32>, vector<8x32xf32>, vector<16x32xf32> -> vector<16x32xf32>
    %cst_151 = arith.constant dense<0.000000e+00> : vector<8x32xf32>
    %266 = tpu.matmul %262, %53, %cst_151 {dimension_numbers = #tpu.dot_dimension_numbers<[1], [0], [0], [1], [0, 0, 1, 1], [], []>} : vector<8x32xf32>, vector<32x32xf32>, vector<8x32xf32> -> vector<8x32xf32>
    %cst_152 = arith.constant dense<0.000000e+00> : vector<8x32xf32>
    %267 = tpu.matmul %263, %55, %cst_152 {dimension_numbers = #tpu.dot_dimension_numbers<[1], [0], [0], [1], [0, 0, 1, 1], [], []>} : vector<8x32xf32>, vector<32x32xf32>, vector<8x32xf32> -> vector<8x32xf32>
    %268 = arith.addf %266, %267 : vector<8x32xf32>
    %cst_153 = arith.constant dense<0.000000e+00> : vector<8x32xf32>
    %269 = tpu.matmul %257, %57, %cst_153 {dimension_numbers = #tpu.dot_dimension_numbers<[1], [0], [0], [1], [0, 0, 1, 1], [], []>} : vector<8x32xf32>, vector<32x32xf32>, vector<8x32xf32> -> vector<8x32xf32>
    %270 = arith.addf %268, %269 : vector<8x32xf32>
    %271 = arith.addf %270, %80 : vector<8x32xf32>
    %cst_154 = arith.constant dense<0.000000e+00> : vector<16x32xf32>
    %272 = tpu.matmul %264, %59, %cst_154 {dimension_numbers = #tpu.dot_dimension_numbers<[1], [0], [0], [1], [0, 0, 1, 1], [], []>} : vector<16x32xf32>, vector<32x32xf32>, vector<16x32xf32> -> vector<16x32xf32>
    %cst_155 = arith.constant dense<0.000000e+00> : vector<16x32xf32>
    %273 = tpu.matmul %265, %61, %cst_155 {dimension_numbers = #tpu.dot_dimension_numbers<[1], [0], [0], [1], [0, 0, 1, 1], [], []>} : vector<16x32xf32>, vector<32x32xf32>, vector<16x32xf32> -> vector<16x32xf32>
    %274 = arith.addf %272, %273 : vector<16x32xf32>
    %cst_156 = arith.constant dense<0.000000e+00> : vector<16x32xf32>
    %275 = tpu.matmul %261, %63, %cst_156 {dimension_numbers = #tpu.dot_dimension_numbers<[1], [0], [0], [1], [0, 0, 1, 1], [], []>} : vector<16x32xf32>, vector<32x32xf32>, vector<16x32xf32> -> vector<16x32xf32>
    %276 = arith.addf %274, %275 : vector<16x32xf32>
    %277 = arith.addf %276, %83 : vector<16x32xf32>
    %cst_157 = arith.constant 0.000000e+00 : f32
    %278 = vector.broadcast %cst_157 : f32 to vector<8x32xf32>
    %279 = arith.maximumf %271, %278 : vector<8x32xf32>
    %cst_158 = arith.constant 0.000000e+00 : f32
    %280 = vector.broadcast %cst_158 : f32 to vector<16x32xf32>
    %281 = arith.maximumf %277, %280 : vector<16x32xf32>
    %cst_159 = arith.constant dense<0.000000e+00> : vector<8x32xf32>
    %282 = tpu.matmul %32, %279, %cst_159 {dimension_numbers = #tpu.dot_dimension_numbers<[1], [0], [0], [1], [0, 0, 1, 1], [], []>} : vector<8x8xf32>, vector<8x32xf32>, vector<8x32xf32> -> vector<8x32xf32>
    %cst_160 = arith.constant dense<0.000000e+00> : vector<8x32xf32>
    %283 = tpu.matmul %38, %281, %cst_160 {dimension_numbers = #tpu.dot_dimension_numbers<[1], [0], [0], [1], [0, 0, 1, 1], [], []>} : vector<8x16xf32>, vector<16x32xf32>, vector<8x32xf32> -> vector<8x32xf32>
    %cst_161 = arith.constant dense<0.000000e+00> : vector<8x32xf32>
    %284 = tpu.matmul %282, %65, %cst_161 {dimension_numbers = #tpu.dot_dimension_numbers<[1], [0], [0], [1], [0, 0, 1, 1], [], []>} : vector<8x32xf32>, vector<32x32xf32>, vector<8x32xf32> -> vector<8x32xf32>
    %cst_162 = arith.constant dense<0.000000e+00> : vector<8x32xf32>
    %285 = tpu.matmul %283, %67, %cst_162 {dimension_numbers = #tpu.dot_dimension_numbers<[1], [0], [0], [1], [0, 0, 1, 1], [], []>} : vector<8x32xf32>, vector<32x32xf32>, vector<8x32xf32> -> vector<8x32xf32>
    %286 = arith.addf %284, %285 : vector<8x32xf32>
    %cst_163 = arith.constant dense<0.000000e+00> : vector<8x32xf32>
    %287 = tpu.matmul %279, %69, %cst_163 {dimension_numbers = #tpu.dot_dimension_numbers<[1], [0], [0], [1], [0, 0, 1, 1], [], []>} : vector<8x32xf32>, vector<32x32xf32>, vector<8x32xf32> -> vector<8x32xf32>
    %288 = arith.addf %286, %287 : vector<8x32xf32>
    %289 = arith.addf %288, %86 : vector<8x32xf32>
    %cst_164 = arith.constant 0.000000e+00 : f32
    %290 = vector.broadcast %cst_164 : f32 to vector<8x32xf32>
    %291 = arith.maximumf %289, %290 : vector<8x32xf32>
    %cst_165 = arith.constant dense<0.000000e+00> : vector<8x1xf32>
    %292 = tpu.matmul %291, %87, %cst_165 {dimension_numbers = #tpu.dot_dimension_numbers<[1], [0], [0], [1], [0, 0, 1, 1], [], []>} : vector<8x32xf32>, vector<32x1xf32>, vector<8x1xf32> -> vector<8x1xf32>
    %cst_166 = arith.constant dense<0.000000e+00> : vector<8x1xf32>
    %293 = tpu.matmul %257, %88, %cst_166 {dimension_numbers = #tpu.dot_dimension_numbers<[1], [0], [0], [1], [0, 0, 1, 1], [], []>} : vector<8x32xf32>, vector<32x1xf32>, vector<8x1xf32> -> vector<8x1xf32>
    %294 = arith.addf %292, %293 : vector<8x1xf32>
    %295 = vector.broadcast %90 : vector<1x1xf32> to vector<8x1xf32>
    %296 = arith.addf %294, %295 : vector<8x1xf32>
    %297 = arith.negf %296 : vector<8x1xf32>
    %298 = math.exp %297 : vector<8x1xf32>
    %cst_167 = arith.constant 1.000000e+00 : f32
    %299 = vector.broadcast %cst_167 : f32 to vector<8x1xf32>
    %300 = arith.addf %299, %298 : vector<8x1xf32>
    %301 = arith.divf %299, %300 : vector<8x1xf32>
    %302 = vector.broadcast %301 : vector<8x1xf32> to vector<8x32xf32>
    %303 = arith.mulf %302, %291 : vector<8x32xf32>
    %cst_168 = arith.constant 1.000000e+00 : f32
    %304 = vector.broadcast %cst_168 : f32 to vector<8x1xf32>
    %305 = arith.subf %304, %301 : vector<8x1xf32>
    %306 = vector.broadcast %305 : vector<8x1xf32> to vector<8x32xf32>
    %307 = arith.mulf %306, %257 : vector<8x32xf32>
    %308 = arith.addf %303, %307 : vector<8x32xf32>
    %cst_169 = arith.constant dense<0.000000e+00> : vector<8x1xf32>
    %309 = tpu.matmul %308, %89, %cst_169 {dimension_numbers = #tpu.dot_dimension_numbers<[1], [0], [0], [1], [0, 0, 1, 1], [], []>} : vector<8x32xf32>, vector<32x1xf32>, vector<8x1xf32> -> vector<8x1xf32>
    %310 = vector.broadcast %91 : vector<1x1xf32> to vector<8x1xf32>
    %311 = arith.addf %309, %310 : vector<8x1xf32>
    %c1_i32 = arith.constant 1 : i32
    %312 = vector.broadcast %c1_i32 : i32 to vector<8x4xi32>
    %313 = arith.cmpi eq, %115, %312 : vector<8x4xi32>
    %314 = vector.shape_cast %311 : vector<8x1xf32> to vector<8x1xf32>
    %315 = vector.broadcast %314 : vector<8x1xf32> to vector<8x4xf32>
    %316 = arith.select %313, %315, %216 : vector<8x4xi1>, vector<8x4xf32>
    %cst_170 = arith.constant dense<0.000000e+00> : vector<8x32xf32>
    %317 = tpu.matmul %18, %308, %cst_170 {dimension_numbers = #tpu.dot_dimension_numbers<[1], [0], [0], [1], [0, 0, 1, 1], [], []>} : vector<8x8xf32>, vector<8x32xf32>, vector<8x32xf32> -> vector<8x32xf32>
    %cst_171 = arith.constant dense<0.000000e+00> : vector<8x32xf32>
    %318 = tpu.matmul %317, %47, %cst_171 {dimension_numbers = #tpu.dot_dimension_numbers<[1], [0], [0], [1], [0, 0, 1, 1], [], []>} : vector<8x32xf32>, vector<32x32xf32>, vector<8x32xf32> -> vector<8x32xf32>
    %cst_172 = arith.constant dense<0.000000e+00> : vector<8x32xf32>
    %319 = tpu.matmul %20, %114, %cst_172 {dimension_numbers = #tpu.dot_dimension_numbers<[1], [0], [0], [1], [0, 0, 1, 1], [], []>} : vector<8x16xf32>, vector<16x32xf32>, vector<8x32xf32> -> vector<8x32xf32>
    %cst_173 = arith.constant dense<0.000000e+00> : vector<8x32xf32>
    %320 = tpu.matmul %319, %49, %cst_173 {dimension_numbers = #tpu.dot_dimension_numbers<[1], [0], [0], [1], [0, 0, 1, 1], [], []>} : vector<8x32xf32>, vector<32x32xf32>, vector<8x32xf32> -> vector<8x32xf32>
    %321 = arith.addf %318, %320 : vector<8x32xf32>
    %cst_174 = arith.constant dense<0.000000e+00> : vector<16x32xf32>
    %322 = tpu.matmul %26, %114, %cst_174 {dimension_numbers = #tpu.dot_dimension_numbers<[1], [0], [0], [1], [0, 0, 1, 1], [], []>} : vector<16x16xf32>, vector<16x32xf32>, vector<16x32xf32> -> vector<16x32xf32>
    %cst_175 = arith.constant dense<0.000000e+00> : vector<16x32xf32>
    %323 = tpu.matmul %322, %51, %cst_175 {dimension_numbers = #tpu.dot_dimension_numbers<[1], [0], [0], [1], [0, 0, 1, 1], [], []>} : vector<16x32xf32>, vector<32x32xf32>, vector<16x32xf32> -> vector<16x32xf32>
    %324 = arith.addf %321, %74 : vector<8x32xf32>
    %cst_176 = arith.constant 0.000000e+00 : f32
    %325 = vector.broadcast %cst_176 : f32 to vector<8x32xf32>
    %326 = arith.maximumf %324, %325 : vector<8x32xf32>
    %327 = arith.addf %308, %326 : vector<8x32xf32>
    %328 = arith.addf %323, %77 : vector<16x32xf32>
    %cst_177 = arith.constant 0.000000e+00 : f32
    %329 = vector.broadcast %cst_177 : f32 to vector<16x32xf32>
    %330 = arith.maximumf %328, %329 : vector<16x32xf32>
    %331 = arith.addf %114, %330 : vector<16x32xf32>
    %cst_178 = arith.constant dense<0.000000e+00> : vector<8x32xf32>
    %332 = tpu.matmul %18, %327, %cst_178 {dimension_numbers = #tpu.dot_dimension_numbers<[1], [0], [0], [1], [0, 0, 1, 1], [], []>} : vector<8x8xf32>, vector<8x32xf32>, vector<8x32xf32> -> vector<8x32xf32>
    %cst_179 = arith.constant dense<0.000000e+00> : vector<8x32xf32>
    %333 = tpu.matmul %332, %47, %cst_179 {dimension_numbers = #tpu.dot_dimension_numbers<[1], [0], [0], [1], [0, 0, 1, 1], [], []>} : vector<8x32xf32>, vector<32x32xf32>, vector<8x32xf32> -> vector<8x32xf32>
    %cst_180 = arith.constant dense<0.000000e+00> : vector<8x32xf32>
    %334 = tpu.matmul %20, %331, %cst_180 {dimension_numbers = #tpu.dot_dimension_numbers<[1], [0], [0], [1], [0, 0, 1, 1], [], []>} : vector<8x16xf32>, vector<16x32xf32>, vector<8x32xf32> -> vector<8x32xf32>
    %cst_181 = arith.constant dense<0.000000e+00> : vector<8x32xf32>
    %335 = tpu.matmul %334, %49, %cst_181 {dimension_numbers = #tpu.dot_dimension_numbers<[1], [0], [0], [1], [0, 0, 1, 1], [], []>} : vector<8x32xf32>, vector<32x32xf32>, vector<8x32xf32> -> vector<8x32xf32>
    %336 = arith.addf %333, %335 : vector<8x32xf32>
    %cst_182 = arith.constant dense<0.000000e+00> : vector<16x32xf32>
    %337 = tpu.matmul %26, %331, %cst_182 {dimension_numbers = #tpu.dot_dimension_numbers<[1], [0], [0], [1], [0, 0, 1, 1], [], []>} : vector<16x16xf32>, vector<16x32xf32>, vector<16x32xf32> -> vector<16x32xf32>
    %cst_183 = arith.constant dense<0.000000e+00> : vector<16x32xf32>
    %338 = tpu.matmul %337, %51, %cst_183 {dimension_numbers = #tpu.dot_dimension_numbers<[1], [0], [0], [1], [0, 0, 1, 1], [], []>} : vector<16x32xf32>, vector<32x32xf32>, vector<16x32xf32> -> vector<16x32xf32>
    %339 = arith.addf %336, %74 : vector<8x32xf32>
    %cst_184 = arith.constant 0.000000e+00 : f32
    %340 = vector.broadcast %cst_184 : f32 to vector<8x32xf32>
    %341 = arith.maximumf %339, %340 : vector<8x32xf32>
    %342 = arith.addf %327, %341 : vector<8x32xf32>
    %343 = arith.addf %338, %77 : vector<16x32xf32>
    %cst_185 = arith.constant 0.000000e+00 : f32
    %344 = vector.broadcast %cst_185 : f32 to vector<16x32xf32>
    %345 = arith.maximumf %343, %344 : vector<16x32xf32>
    %346 = arith.addf %331, %345 : vector<16x32xf32>
    %cst_186 = arith.constant dense<0.000000e+00> : vector<8x32xf32>
    %347 = tpu.matmul %18, %342, %cst_186 {dimension_numbers = #tpu.dot_dimension_numbers<[1], [0], [0], [1], [0, 0, 1, 1], [], []>} : vector<8x8xf32>, vector<8x32xf32>, vector<8x32xf32> -> vector<8x32xf32>
    %cst_187 = arith.constant dense<0.000000e+00> : vector<8x32xf32>
    %348 = tpu.matmul %347, %47, %cst_187 {dimension_numbers = #tpu.dot_dimension_numbers<[1], [0], [0], [1], [0, 0, 1, 1], [], []>} : vector<8x32xf32>, vector<32x32xf32>, vector<8x32xf32> -> vector<8x32xf32>
    %cst_188 = arith.constant dense<0.000000e+00> : vector<8x32xf32>
    %349 = tpu.matmul %20, %346, %cst_188 {dimension_numbers = #tpu.dot_dimension_numbers<[1], [0], [0], [1], [0, 0, 1, 1], [], []>} : vector<8x16xf32>, vector<16x32xf32>, vector<8x32xf32> -> vector<8x32xf32>
    %cst_189 = arith.constant dense<0.000000e+00> : vector<8x32xf32>
    %350 = tpu.matmul %349, %49, %cst_189 {dimension_numbers = #tpu.dot_dimension_numbers<[1], [0], [0], [1], [0, 0, 1, 1], [], []>} : vector<8x32xf32>, vector<32x32xf32>, vector<8x32xf32> -> vector<8x32xf32>
    %351 = arith.addf %348, %350 : vector<8x32xf32>
    %cst_190 = arith.constant dense<0.000000e+00> : vector<16x32xf32>
    %352 = tpu.matmul %26, %346, %cst_190 {dimension_numbers = #tpu.dot_dimension_numbers<[1], [0], [0], [1], [0, 0, 1, 1], [], []>} : vector<16x16xf32>, vector<16x32xf32>, vector<16x32xf32> -> vector<16x32xf32>
    %cst_191 = arith.constant dense<0.000000e+00> : vector<16x32xf32>
    %353 = tpu.matmul %352, %51, %cst_191 {dimension_numbers = #tpu.dot_dimension_numbers<[1], [0], [0], [1], [0, 0, 1, 1], [], []>} : vector<16x32xf32>, vector<32x32xf32>, vector<16x32xf32> -> vector<16x32xf32>
    %354 = arith.addf %351, %74 : vector<8x32xf32>
    %cst_192 = arith.constant 0.000000e+00 : f32
    %355 = vector.broadcast %cst_192 : f32 to vector<8x32xf32>
    %356 = arith.maximumf %354, %355 : vector<8x32xf32>
    %357 = arith.addf %342, %356 : vector<8x32xf32>
    %358 = arith.addf %353, %77 : vector<16x32xf32>
    %cst_193 = arith.constant 0.000000e+00 : f32
    %359 = vector.broadcast %cst_193 : f32 to vector<16x32xf32>
    %360 = arith.maximumf %358, %359 : vector<16x32xf32>
    %361 = arith.addf %346, %360 : vector<16x32xf32>
    %cst_194 = arith.constant dense<0.000000e+00> : vector<8x32xf32>
    %362 = tpu.matmul %32, %357, %cst_194 {dimension_numbers = #tpu.dot_dimension_numbers<[1], [0], [0], [1], [0, 0, 1, 1], [], []>} : vector<8x8xf32>, vector<8x32xf32>, vector<8x32xf32> -> vector<8x32xf32>
    %cst_195 = arith.constant dense<0.000000e+00> : vector<8x32xf32>
    %363 = tpu.matmul %38, %361, %cst_195 {dimension_numbers = #tpu.dot_dimension_numbers<[1], [0], [0], [1], [0, 0, 1, 1], [], []>} : vector<8x16xf32>, vector<16x32xf32>, vector<8x32xf32> -> vector<8x32xf32>
    %cst_196 = arith.constant dense<0.000000e+00> : vector<16x32xf32>
    %364 = tpu.matmul %26, %361, %cst_196 {dimension_numbers = #tpu.dot_dimension_numbers<[1], [0], [0], [1], [0, 0, 1, 1], [], []>} : vector<16x16xf32>, vector<16x32xf32>, vector<16x32xf32> -> vector<16x32xf32>
    %cst_197 = arith.constant dense<0.000000e+00> : vector<16x32xf32>
    %365 = tpu.matmul %44, %357, %cst_197 {dimension_numbers = #tpu.dot_dimension_numbers<[1], [0], [0], [1], [0, 0, 1, 1], [], []>} : vector<16x8xf32>, vector<8x32xf32>, vector<16x32xf32> -> vector<16x32xf32>
    %cst_198 = arith.constant dense<0.000000e+00> : vector<8x32xf32>
    %366 = tpu.matmul %362, %53, %cst_198 {dimension_numbers = #tpu.dot_dimension_numbers<[1], [0], [0], [1], [0, 0, 1, 1], [], []>} : vector<8x32xf32>, vector<32x32xf32>, vector<8x32xf32> -> vector<8x32xf32>
    %cst_199 = arith.constant dense<0.000000e+00> : vector<8x32xf32>
    %367 = tpu.matmul %363, %55, %cst_199 {dimension_numbers = #tpu.dot_dimension_numbers<[1], [0], [0], [1], [0, 0, 1, 1], [], []>} : vector<8x32xf32>, vector<32x32xf32>, vector<8x32xf32> -> vector<8x32xf32>
    %368 = arith.addf %366, %367 : vector<8x32xf32>
    %cst_200 = arith.constant dense<0.000000e+00> : vector<8x32xf32>
    %369 = tpu.matmul %357, %57, %cst_200 {dimension_numbers = #tpu.dot_dimension_numbers<[1], [0], [0], [1], [0, 0, 1, 1], [], []>} : vector<8x32xf32>, vector<32x32xf32>, vector<8x32xf32> -> vector<8x32xf32>
    %370 = arith.addf %368, %369 : vector<8x32xf32>
    %371 = arith.addf %370, %80 : vector<8x32xf32>
    %cst_201 = arith.constant dense<0.000000e+00> : vector<16x32xf32>
    %372 = tpu.matmul %364, %59, %cst_201 {dimension_numbers = #tpu.dot_dimension_numbers<[1], [0], [0], [1], [0, 0, 1, 1], [], []>} : vector<16x32xf32>, vector<32x32xf32>, vector<16x32xf32> -> vector<16x32xf32>
    %cst_202 = arith.constant dense<0.000000e+00> : vector<16x32xf32>
    %373 = tpu.matmul %365, %61, %cst_202 {dimension_numbers = #tpu.dot_dimension_numbers<[1], [0], [0], [1], [0, 0, 1, 1], [], []>} : vector<16x32xf32>, vector<32x32xf32>, vector<16x32xf32> -> vector<16x32xf32>
    %374 = arith.addf %372, %373 : vector<16x32xf32>
    %cst_203 = arith.constant dense<0.000000e+00> : vector<16x32xf32>
    %375 = tpu.matmul %361, %63, %cst_203 {dimension_numbers = #tpu.dot_dimension_numbers<[1], [0], [0], [1], [0, 0, 1, 1], [], []>} : vector<16x32xf32>, vector<32x32xf32>, vector<16x32xf32> -> vector<16x32xf32>
    %376 = arith.addf %374, %375 : vector<16x32xf32>
    %377 = arith.addf %376, %83 : vector<16x32xf32>
    %cst_204 = arith.constant 0.000000e+00 : f32
    %378 = vector.broadcast %cst_204 : f32 to vector<8x32xf32>
    %379 = arith.maximumf %371, %378 : vector<8x32xf32>
    %cst_205 = arith.constant 0.000000e+00 : f32
    %380 = vector.broadcast %cst_205 : f32 to vector<16x32xf32>
    %381 = arith.maximumf %377, %380 : vector<16x32xf32>
    %cst_206 = arith.constant dense<0.000000e+00> : vector<8x32xf32>
    %382 = tpu.matmul %32, %379, %cst_206 {dimension_numbers = #tpu.dot_dimension_numbers<[1], [0], [0], [1], [0, 0, 1, 1], [], []>} : vector<8x8xf32>, vector<8x32xf32>, vector<8x32xf32> -> vector<8x32xf32>
    %cst_207 = arith.constant dense<0.000000e+00> : vector<8x32xf32>
    %383 = tpu.matmul %38, %381, %cst_207 {dimension_numbers = #tpu.dot_dimension_numbers<[1], [0], [0], [1], [0, 0, 1, 1], [], []>} : vector<8x16xf32>, vector<16x32xf32>, vector<8x32xf32> -> vector<8x32xf32>
    %cst_208 = arith.constant dense<0.000000e+00> : vector<8x32xf32>
    %384 = tpu.matmul %382, %65, %cst_208 {dimension_numbers = #tpu.dot_dimension_numbers<[1], [0], [0], [1], [0, 0, 1, 1], [], []>} : vector<8x32xf32>, vector<32x32xf32>, vector<8x32xf32> -> vector<8x32xf32>
    %cst_209 = arith.constant dense<0.000000e+00> : vector<8x32xf32>
    %385 = tpu.matmul %383, %67, %cst_209 {dimension_numbers = #tpu.dot_dimension_numbers<[1], [0], [0], [1], [0, 0, 1, 1], [], []>} : vector<8x32xf32>, vector<32x32xf32>, vector<8x32xf32> -> vector<8x32xf32>
    %386 = arith.addf %384, %385 : vector<8x32xf32>
    %cst_210 = arith.constant dense<0.000000e+00> : vector<8x32xf32>
    %387 = tpu.matmul %379, %69, %cst_210 {dimension_numbers = #tpu.dot_dimension_numbers<[1], [0], [0], [1], [0, 0, 1, 1], [], []>} : vector<8x32xf32>, vector<32x32xf32>, vector<8x32xf32> -> vector<8x32xf32>
    %388 = arith.addf %386, %387 : vector<8x32xf32>
    %389 = arith.addf %388, %86 : vector<8x32xf32>
    %cst_211 = arith.constant 0.000000e+00 : f32
    %390 = vector.broadcast %cst_211 : f32 to vector<8x32xf32>
    %391 = arith.maximumf %389, %390 : vector<8x32xf32>
    %cst_212 = arith.constant dense<0.000000e+00> : vector<8x1xf32>
    %392 = tpu.matmul %391, %87, %cst_212 {dimension_numbers = #tpu.dot_dimension_numbers<[1], [0], [0], [1], [0, 0, 1, 1], [], []>} : vector<8x32xf32>, vector<32x1xf32>, vector<8x1xf32> -> vector<8x1xf32>
    %cst_213 = arith.constant dense<0.000000e+00> : vector<8x1xf32>
    %393 = tpu.matmul %357, %88, %cst_213 {dimension_numbers = #tpu.dot_dimension_numbers<[1], [0], [0], [1], [0, 0, 1, 1], [], []>} : vector<8x32xf32>, vector<32x1xf32>, vector<8x1xf32> -> vector<8x1xf32>
    %394 = arith.addf %392, %393 : vector<8x1xf32>
    %395 = vector.broadcast %90 : vector<1x1xf32> to vector<8x1xf32>
    %396 = arith.addf %394, %395 : vector<8x1xf32>
    %397 = arith.negf %396 : vector<8x1xf32>
    %398 = math.exp %397 : vector<8x1xf32>
    %cst_214 = arith.constant 1.000000e+00 : f32
    %399 = vector.broadcast %cst_214 : f32 to vector<8x1xf32>
    %400 = arith.addf %399, %398 : vector<8x1xf32>
    %401 = arith.divf %399, %400 : vector<8x1xf32>
    %402 = vector.broadcast %401 : vector<8x1xf32> to vector<8x32xf32>
    %403 = arith.mulf %402, %391 : vector<8x32xf32>
    %cst_215 = arith.constant 1.000000e+00 : f32
    %404 = vector.broadcast %cst_215 : f32 to vector<8x1xf32>
    %405 = arith.subf %404, %401 : vector<8x1xf32>
    %406 = vector.broadcast %405 : vector<8x1xf32> to vector<8x32xf32>
    %407 = arith.mulf %406, %357 : vector<8x32xf32>
    %408 = arith.addf %403, %407 : vector<8x32xf32>
    %cst_216 = arith.constant dense<0.000000e+00> : vector<8x1xf32>
    %409 = tpu.matmul %408, %89, %cst_216 {dimension_numbers = #tpu.dot_dimension_numbers<[1], [0], [0], [1], [0, 0, 1, 1], [], []>} : vector<8x32xf32>, vector<32x1xf32>, vector<8x1xf32> -> vector<8x1xf32>
    %410 = vector.broadcast %91 : vector<1x1xf32> to vector<8x1xf32>
    %411 = arith.addf %409, %410 : vector<8x1xf32>
    %c2_i32 = arith.constant 2 : i32
    %412 = vector.broadcast %c2_i32 : i32 to vector<8x4xi32>
    %413 = arith.cmpi eq, %115, %412 : vector<8x4xi32>
    %414 = vector.shape_cast %411 : vector<8x1xf32> to vector<8x1xf32>
    %415 = vector.broadcast %414 : vector<8x1xf32> to vector<8x4xf32>
    %416 = arith.select %413, %415, %316 : vector<8x4xi1>, vector<8x4xf32>
    %cst_217 = arith.constant dense<0.000000e+00> : vector<8x32xf32>
    %417 = tpu.matmul %18, %408, %cst_217 {dimension_numbers = #tpu.dot_dimension_numbers<[1], [0], [0], [1], [0, 0, 1, 1], [], []>} : vector<8x8xf32>, vector<8x32xf32>, vector<8x32xf32> -> vector<8x32xf32>
    %cst_218 = arith.constant dense<0.000000e+00> : vector<8x32xf32>
    %418 = tpu.matmul %417, %47, %cst_218 {dimension_numbers = #tpu.dot_dimension_numbers<[1], [0], [0], [1], [0, 0, 1, 1], [], []>} : vector<8x32xf32>, vector<32x32xf32>, vector<8x32xf32> -> vector<8x32xf32>
    %cst_219 = arith.constant dense<0.000000e+00> : vector<8x32xf32>
    %419 = tpu.matmul %20, %114, %cst_219 {dimension_numbers = #tpu.dot_dimension_numbers<[1], [0], [0], [1], [0, 0, 1, 1], [], []>} : vector<8x16xf32>, vector<16x32xf32>, vector<8x32xf32> -> vector<8x32xf32>
    %cst_220 = arith.constant dense<0.000000e+00> : vector<8x32xf32>
    %420 = tpu.matmul %419, %49, %cst_220 {dimension_numbers = #tpu.dot_dimension_numbers<[1], [0], [0], [1], [0, 0, 1, 1], [], []>} : vector<8x32xf32>, vector<32x32xf32>, vector<8x32xf32> -> vector<8x32xf32>
    %421 = arith.addf %418, %420 : vector<8x32xf32>
    %cst_221 = arith.constant dense<0.000000e+00> : vector<16x32xf32>
    %422 = tpu.matmul %26, %114, %cst_221 {dimension_numbers = #tpu.dot_dimension_numbers<[1], [0], [0], [1], [0, 0, 1, 1], [], []>} : vector<16x16xf32>, vector<16x32xf32>, vector<16x32xf32> -> vector<16x32xf32>
    %cst_222 = arith.constant dense<0.000000e+00> : vector<16x32xf32>
    %423 = tpu.matmul %422, %51, %cst_222 {dimension_numbers = #tpu.dot_dimension_numbers<[1], [0], [0], [1], [0, 0, 1, 1], [], []>} : vector<16x32xf32>, vector<32x32xf32>, vector<16x32xf32> -> vector<16x32xf32>
    %424 = arith.addf %421, %74 : vector<8x32xf32>
    %cst_223 = arith.constant 0.000000e+00 : f32
    %425 = vector.broadcast %cst_223 : f32 to vector<8x32xf32>
    %426 = arith.maximumf %424, %425 : vector<8x32xf32>
    %427 = arith.addf %408, %426 : vector<8x32xf32>
    %428 = arith.addf %423, %77 : vector<16x32xf32>
    %cst_224 = arith.constant 0.000000e+00 : f32
    %429 = vector.broadcast %cst_224 : f32 to vector<16x32xf32>
    %430 = arith.maximumf %428, %429 : vector<16x32xf32>
    %431 = arith.addf %114, %430 : vector<16x32xf32>
    %cst_225 = arith.constant dense<0.000000e+00> : vector<8x32xf32>
    %432 = tpu.matmul %18, %427, %cst_225 {dimension_numbers = #tpu.dot_dimension_numbers<[1], [0], [0], [1], [0, 0, 1, 1], [], []>} : vector<8x8xf32>, vector<8x32xf32>, vector<8x32xf32> -> vector<8x32xf32>
    %cst_226 = arith.constant dense<0.000000e+00> : vector<8x32xf32>
    %433 = tpu.matmul %432, %47, %cst_226 {dimension_numbers = #tpu.dot_dimension_numbers<[1], [0], [0], [1], [0, 0, 1, 1], [], []>} : vector<8x32xf32>, vector<32x32xf32>, vector<8x32xf32> -> vector<8x32xf32>
    %cst_227 = arith.constant dense<0.000000e+00> : vector<8x32xf32>
    %434 = tpu.matmul %20, %431, %cst_227 {dimension_numbers = #tpu.dot_dimension_numbers<[1], [0], [0], [1], [0, 0, 1, 1], [], []>} : vector<8x16xf32>, vector<16x32xf32>, vector<8x32xf32> -> vector<8x32xf32>
    %cst_228 = arith.constant dense<0.000000e+00> : vector<8x32xf32>
    %435 = tpu.matmul %434, %49, %cst_228 {dimension_numbers = #tpu.dot_dimension_numbers<[1], [0], [0], [1], [0, 0, 1, 1], [], []>} : vector<8x32xf32>, vector<32x32xf32>, vector<8x32xf32> -> vector<8x32xf32>
    %436 = arith.addf %433, %435 : vector<8x32xf32>
    %cst_229 = arith.constant dense<0.000000e+00> : vector<16x32xf32>
    %437 = tpu.matmul %26, %431, %cst_229 {dimension_numbers = #tpu.dot_dimension_numbers<[1], [0], [0], [1], [0, 0, 1, 1], [], []>} : vector<16x16xf32>, vector<16x32xf32>, vector<16x32xf32> -> vector<16x32xf32>
    %cst_230 = arith.constant dense<0.000000e+00> : vector<16x32xf32>
    %438 = tpu.matmul %437, %51, %cst_230 {dimension_numbers = #tpu.dot_dimension_numbers<[1], [0], [0], [1], [0, 0, 1, 1], [], []>} : vector<16x32xf32>, vector<32x32xf32>, vector<16x32xf32> -> vector<16x32xf32>
    %439 = arith.addf %436, %74 : vector<8x32xf32>
    %cst_231 = arith.constant 0.000000e+00 : f32
    %440 = vector.broadcast %cst_231 : f32 to vector<8x32xf32>
    %441 = arith.maximumf %439, %440 : vector<8x32xf32>
    %442 = arith.addf %427, %441 : vector<8x32xf32>
    %443 = arith.addf %438, %77 : vector<16x32xf32>
    %cst_232 = arith.constant 0.000000e+00 : f32
    %444 = vector.broadcast %cst_232 : f32 to vector<16x32xf32>
    %445 = arith.maximumf %443, %444 : vector<16x32xf32>
    %446 = arith.addf %431, %445 : vector<16x32xf32>
    %cst_233 = arith.constant dense<0.000000e+00> : vector<8x32xf32>
    %447 = tpu.matmul %18, %442, %cst_233 {dimension_numbers = #tpu.dot_dimension_numbers<[1], [0], [0], [1], [0, 0, 1, 1], [], []>} : vector<8x8xf32>, vector<8x32xf32>, vector<8x32xf32> -> vector<8x32xf32>
    %cst_234 = arith.constant dense<0.000000e+00> : vector<8x32xf32>
    %448 = tpu.matmul %447, %47, %cst_234 {dimension_numbers = #tpu.dot_dimension_numbers<[1], [0], [0], [1], [0, 0, 1, 1], [], []>} : vector<8x32xf32>, vector<32x32xf32>, vector<8x32xf32> -> vector<8x32xf32>
    %cst_235 = arith.constant dense<0.000000e+00> : vector<8x32xf32>
    %449 = tpu.matmul %20, %446, %cst_235 {dimension_numbers = #tpu.dot_dimension_numbers<[1], [0], [0], [1], [0, 0, 1, 1], [], []>} : vector<8x16xf32>, vector<16x32xf32>, vector<8x32xf32> -> vector<8x32xf32>
    %cst_236 = arith.constant dense<0.000000e+00> : vector<8x32xf32>
    %450 = tpu.matmul %449, %49, %cst_236 {dimension_numbers = #tpu.dot_dimension_numbers<[1], [0], [0], [1], [0, 0, 1, 1], [], []>} : vector<8x32xf32>, vector<32x32xf32>, vector<8x32xf32> -> vector<8x32xf32>
    %451 = arith.addf %448, %450 : vector<8x32xf32>
    %cst_237 = arith.constant dense<0.000000e+00> : vector<16x32xf32>
    %452 = tpu.matmul %26, %446, %cst_237 {dimension_numbers = #tpu.dot_dimension_numbers<[1], [0], [0], [1], [0, 0, 1, 1], [], []>} : vector<16x16xf32>, vector<16x32xf32>, vector<16x32xf32> -> vector<16x32xf32>
    %cst_238 = arith.constant dense<0.000000e+00> : vector<16x32xf32>
    %453 = tpu.matmul %452, %51, %cst_238 {dimension_numbers = #tpu.dot_dimension_numbers<[1], [0], [0], [1], [0, 0, 1, 1], [], []>} : vector<16x32xf32>, vector<32x32xf32>, vector<16x32xf32> -> vector<16x32xf32>
    %454 = arith.addf %451, %74 : vector<8x32xf32>
    %cst_239 = arith.constant 0.000000e+00 : f32
    %455 = vector.broadcast %cst_239 : f32 to vector<8x32xf32>
    %456 = arith.maximumf %454, %455 : vector<8x32xf32>
    %457 = arith.addf %442, %456 : vector<8x32xf32>
    %458 = arith.addf %453, %77 : vector<16x32xf32>
    %cst_240 = arith.constant 0.000000e+00 : f32
    %459 = vector.broadcast %cst_240 : f32 to vector<16x32xf32>
    %460 = arith.maximumf %458, %459 : vector<16x32xf32>
    %461 = arith.addf %446, %460 : vector<16x32xf32>
    %cst_241 = arith.constant dense<0.000000e+00> : vector<8x32xf32>
    %462 = tpu.matmul %32, %457, %cst_241 {dimension_numbers = #tpu.dot_dimension_numbers<[1], [0], [0], [1], [0, 0, 1, 1], [], []>} : vector<8x8xf32>, vector<8x32xf32>, vector<8x32xf32> -> vector<8x32xf32>
    %cst_242 = arith.constant dense<0.000000e+00> : vector<8x32xf32>
    %463 = tpu.matmul %38, %461, %cst_242 {dimension_numbers = #tpu.dot_dimension_numbers<[1], [0], [0], [1], [0, 0, 1, 1], [], []>} : vector<8x16xf32>, vector<16x32xf32>, vector<8x32xf32> -> vector<8x32xf32>
    %cst_243 = arith.constant dense<0.000000e+00> : vector<16x32xf32>
    %464 = tpu.matmul %26, %461, %cst_243 {dimension_numbers = #tpu.dot_dimension_numbers<[1], [0], [0], [1], [0, 0, 1, 1], [], []>} : vector<16x16xf32>, vector<16x32xf32>, vector<16x32xf32> -> vector<16x32xf32>
    %cst_244 = arith.constant dense<0.000000e+00> : vector<16x32xf32>
    %465 = tpu.matmul %44, %457, %cst_244 {dimension_numbers = #tpu.dot_dimension_numbers<[1], [0], [0], [1], [0, 0, 1, 1], [], []>} : vector<16x8xf32>, vector<8x32xf32>, vector<16x32xf32> -> vector<16x32xf32>
    %cst_245 = arith.constant dense<0.000000e+00> : vector<8x32xf32>
    %466 = tpu.matmul %462, %53, %cst_245 {dimension_numbers = #tpu.dot_dimension_numbers<[1], [0], [0], [1], [0, 0, 1, 1], [], []>} : vector<8x32xf32>, vector<32x32xf32>, vector<8x32xf32> -> vector<8x32xf32>
    %cst_246 = arith.constant dense<0.000000e+00> : vector<8x32xf32>
    %467 = tpu.matmul %463, %55, %cst_246 {dimension_numbers = #tpu.dot_dimension_numbers<[1], [0], [0], [1], [0, 0, 1, 1], [], []>} : vector<8x32xf32>, vector<32x32xf32>, vector<8x32xf32> -> vector<8x32xf32>
    %468 = arith.addf %466, %467 : vector<8x32xf32>
    %cst_247 = arith.constant dense<0.000000e+00> : vector<8x32xf32>
    %469 = tpu.matmul %457, %57, %cst_247 {dimension_numbers = #tpu.dot_dimension_numbers<[1], [0], [0], [1], [0, 0, 1, 1], [], []>} : vector<8x32xf32>, vector<32x32xf32>, vector<8x32xf32> -> vector<8x32xf32>
    %470 = arith.addf %468, %469 : vector<8x32xf32>
    %471 = arith.addf %470, %80 : vector<8x32xf32>
    %cst_248 = arith.constant dense<0.000000e+00> : vector<16x32xf32>
    %472 = tpu.matmul %464, %59, %cst_248 {dimension_numbers = #tpu.dot_dimension_numbers<[1], [0], [0], [1], [0, 0, 1, 1], [], []>} : vector<16x32xf32>, vector<32x32xf32>, vector<16x32xf32> -> vector<16x32xf32>
    %cst_249 = arith.constant dense<0.000000e+00> : vector<16x32xf32>
    %473 = tpu.matmul %465, %61, %cst_249 {dimension_numbers = #tpu.dot_dimension_numbers<[1], [0], [0], [1], [0, 0, 1, 1], [], []>} : vector<16x32xf32>, vector<32x32xf32>, vector<16x32xf32> -> vector<16x32xf32>
    %474 = arith.addf %472, %473 : vector<16x32xf32>
    %cst_250 = arith.constant dense<0.000000e+00> : vector<16x32xf32>
    %475 = tpu.matmul %461, %63, %cst_250 {dimension_numbers = #tpu.dot_dimension_numbers<[1], [0], [0], [1], [0, 0, 1, 1], [], []>} : vector<16x32xf32>, vector<32x32xf32>, vector<16x32xf32> -> vector<16x32xf32>
    %476 = arith.addf %474, %475 : vector<16x32xf32>
    %477 = arith.addf %476, %83 : vector<16x32xf32>
    %cst_251 = arith.constant 0.000000e+00 : f32
    %478 = vector.broadcast %cst_251 : f32 to vector<8x32xf32>
    %479 = arith.maximumf %471, %478 : vector<8x32xf32>
    %cst_252 = arith.constant 0.000000e+00 : f32
    %480 = vector.broadcast %cst_252 : f32 to vector<16x32xf32>
    %481 = arith.maximumf %477, %480 : vector<16x32xf32>
    %cst_253 = arith.constant dense<0.000000e+00> : vector<8x32xf32>
    %482 = tpu.matmul %32, %479, %cst_253 {dimension_numbers = #tpu.dot_dimension_numbers<[1], [0], [0], [1], [0, 0, 1, 1], [], []>} : vector<8x8xf32>, vector<8x32xf32>, vector<8x32xf32> -> vector<8x32xf32>
    %cst_254 = arith.constant dense<0.000000e+00> : vector<8x32xf32>
    %483 = tpu.matmul %38, %481, %cst_254 {dimension_numbers = #tpu.dot_dimension_numbers<[1], [0], [0], [1], [0, 0, 1, 1], [], []>} : vector<8x16xf32>, vector<16x32xf32>, vector<8x32xf32> -> vector<8x32xf32>
    %cst_255 = arith.constant dense<0.000000e+00> : vector<8x32xf32>
    %484 = tpu.matmul %482, %65, %cst_255 {dimension_numbers = #tpu.dot_dimension_numbers<[1], [0], [0], [1], [0, 0, 1, 1], [], []>} : vector<8x32xf32>, vector<32x32xf32>, vector<8x32xf32> -> vector<8x32xf32>
    %cst_256 = arith.constant dense<0.000000e+00> : vector<8x32xf32>
    %485 = tpu.matmul %483, %67, %cst_256 {dimension_numbers = #tpu.dot_dimension_numbers<[1], [0], [0], [1], [0, 0, 1, 1], [], []>} : vector<8x32xf32>, vector<32x32xf32>, vector<8x32xf32> -> vector<8x32xf32>
    %486 = arith.addf %484, %485 : vector<8x32xf32>
    %cst_257 = arith.constant dense<0.000000e+00> : vector<8x32xf32>
    %487 = tpu.matmul %479, %69, %cst_257 {dimension_numbers = #tpu.dot_dimension_numbers<[1], [0], [0], [1], [0, 0, 1, 1], [], []>} : vector<8x32xf32>, vector<32x32xf32>, vector<8x32xf32> -> vector<8x32xf32>
    %488 = arith.addf %486, %487 : vector<8x32xf32>
    %489 = arith.addf %488, %86 : vector<8x32xf32>
    %cst_258 = arith.constant 0.000000e+00 : f32
    %490 = vector.broadcast %cst_258 : f32 to vector<8x32xf32>
    %491 = arith.maximumf %489, %490 : vector<8x32xf32>
    %cst_259 = arith.constant dense<0.000000e+00> : vector<8x1xf32>
    %492 = tpu.matmul %491, %87, %cst_259 {dimension_numbers = #tpu.dot_dimension_numbers<[1], [0], [0], [1], [0, 0, 1, 1], [], []>} : vector<8x32xf32>, vector<32x1xf32>, vector<8x1xf32> -> vector<8x1xf32>
    %cst_260 = arith.constant dense<0.000000e+00> : vector<8x1xf32>
    %493 = tpu.matmul %457, %88, %cst_260 {dimension_numbers = #tpu.dot_dimension_numbers<[1], [0], [0], [1], [0, 0, 1, 1], [], []>} : vector<8x32xf32>, vector<32x1xf32>, vector<8x1xf32> -> vector<8x1xf32>
    %494 = arith.addf %492, %493 : vector<8x1xf32>
    %495 = vector.broadcast %90 : vector<1x1xf32> to vector<8x1xf32>
    %496 = arith.addf %494, %495 : vector<8x1xf32>
    %497 = arith.negf %496 : vector<8x1xf32>
    %498 = math.exp %497 : vector<8x1xf32>
    %cst_261 = arith.constant 1.000000e+00 : f32
    %499 = vector.broadcast %cst_261 : f32 to vector<8x1xf32>
    %500 = arith.addf %499, %498 : vector<8x1xf32>
    %501 = arith.divf %499, %500 : vector<8x1xf32>
    %502 = vector.broadcast %501 : vector<8x1xf32> to vector<8x32xf32>
    %503 = arith.mulf %502, %491 : vector<8x32xf32>
    %cst_262 = arith.constant 1.000000e+00 : f32
    %504 = vector.broadcast %cst_262 : f32 to vector<8x1xf32>
    %505 = arith.subf %504, %501 : vector<8x1xf32>
    %506 = vector.broadcast %505 : vector<8x1xf32> to vector<8x32xf32>
    %507 = arith.mulf %506, %457 : vector<8x32xf32>
    %508 = arith.addf %503, %507 : vector<8x32xf32>
    %cst_263 = arith.constant dense<0.000000e+00> : vector<8x1xf32>
    %509 = tpu.matmul %508, %89, %cst_263 {dimension_numbers = #tpu.dot_dimension_numbers<[1], [0], [0], [1], [0, 0, 1, 1], [], []>} : vector<8x32xf32>, vector<32x1xf32>, vector<8x1xf32> -> vector<8x1xf32>
    %510 = vector.broadcast %91 : vector<1x1xf32> to vector<8x1xf32>
    %511 = arith.addf %509, %510 : vector<8x1xf32>
    %c3_i32 = arith.constant 3 : i32
    %512 = vector.broadcast %c3_i32 : i32 to vector<8x4xi32>
    %513 = arith.cmpi eq, %115, %512 : vector<8x4xi32>
    %514 = vector.shape_cast %511 : vector<8x1xf32> to vector<8x1xf32>
    %515 = vector.broadcast %514 : vector<8x1xf32> to vector<8x4xf32>
    %516 = arith.select %513, %515, %416 : vector<8x4xi1>, vector<8x4xf32>
    %c0_264 = arith.constant 0 : index
    %c0_265 = arith.constant 0 : index
    %517 = vector.load %arg11[%c0_264, %c0_265] : memref<8x4xf32, #tpu.memory_space<vmem>>, vector<8x4xf32>
    tpu.vector_store %arg11[%c0_264, %c0_265], %516 {strides = array<i32>} : memref<8x4xf32, #tpu.memory_space<vmem>>, vector<8x4xf32>,
    return
  }
}

</mosaic_0001>

<bundles_post_ra>
// kernel: tpu_custom_call.1
= control target key start
LH: loop header
LB: loop body
LE: loop exit
PB: predicated region body
PF: predicated region fallthrough
CT: control target
= control target key end

     0   :  { %16 = vsyncpa [#allocation3], 0  ;;  %s9456_s17 = smov [#allocation2]   ;;  %s10496_s0 = inlined_call_operand.vmem [shape: f32[8,2], index: 0, kind: input, shape index: {}]   ;;  %s10497_s1 = inlined_call_operand.vmem [shape: f32[16,1], index: 1, kind: input, shape index: {}]   ;;  %s10498_s2 = inlined_call_operand.vmem [shape: f32[8,8], index: 2, kind: input, shape index: {}]   ;;  %s10499_s3 = inlined_call_operand.vmem [shape: f32[8,16], index: 3, kind: input, shape index: {}]   ;;  %s10500_s4 = inlined_call_operand.vmem [shape: f32[16,8], index: 4, kind: input, shape index: {}]   ;;  %s10501_s5 = inlined_call_operand.vmem [shape: f32[16,16], index: 5, kind: input, shape index: {}]   ;;  %s10502_s6 = inlined_call_operand.vmem [shape: f32[3,32], index: 6, kind: input, shape index: {}]   ;;  %s10503_s7 = inlined_call_operand.hbm [shape: f32[15,32,32], index: 7, kind: input, shape index: {}]   ;;  %s10504_s8 = inlined_call_operand.vmem [shape: f32[8,32], index: 8, kind: input, shape index: {}]   ;;  %s10505_s9 = inlined_call_operand.vmem [shape: f32[32,3], index: 9, kind: input, shape index: {}]   ;;  %s10506_s10 = inlined_call_operand.vmem [shape: f32[1,2], index: 10, kind: input, shape index: {}]   ;;  %s10507_s11 = inlined_call_operand.vmem [shape: f32[8,4], index: 11, kind: output, shape index: {}]  }
   0x1   :  { %s36_s18 = sshll.u32 %s9456_s17, 4  ;;  %s9432_s21 = scalar_lea.hbm %s10503_s7, 7680  ;;  %s37_s18 = int_to_ptr.vmem [resolvable:$true] %s36_s18 }
   0x2   :  { %p9433_p0 = scmp.ne.s32.totalorder %s10503_s7, %s9432_s21  ;;  %p9436_p1 = scmp.lt.u32.totalorder %s9432_s21, %s10503_s7 }
   0x4   :  { %p9438_p2 = pnand %p9436_p1, %p9433_p0 }
   0x6   :  { %9441 = shalt.err (!%p9438_p2)
}
   0x7   :  { %s9442_s26 = scalar_lea.vmem %s37_s18, 7680  ;;  %p9447_p4 = scmp.lt.s32.totalorder %s37_s18, %s37_s18 }
   0x8   :  { %p9443_p3 = scmp.ne.s32.totalorder %s37_s18, %s9442_s26  ;;  %p9448_p5 = scmp.lt.s32.totalorder %s9442_s26, %s9442_s26 }
   0xa   :  { %p9449_p6 = por %p9448_p5, %p9447_p4 }
   0xc   :  { %p9450_p7 = pnand %p9449_p6, %p9443_p3 }
   0xe   :  { %9453 = shalt.err (!%p9450_p7)
}
   0xf   :  { %s9457_s27 = smov 128   ;;  %s9458_s28 = smov 8  }
  0x10   :  { %42 = dma.hbm_to_vmem [thread:$0]  %s10503_s7, 7680, %s37_s18, [#allocation3], %s9457_s27, %s9457_s27, %s9458_s28  }
  0x11   :  { %9454 = dma.done.wait [#allocation3], 7680  }
  0x12   :  { %9455 = vsyncadd [#allocation3], 4294959616  ;;  %v9459_v0 = vmov 0   ;;  %vm58_vm0 = vcmask 64512   ;;  %v9541_v1 = vld [vmem:[%s10498_s2] sm:$0xff]  ;;  %vm62_vm1 = vcmask 130048   ;;  %v212_v21 = vlaneseq }
  0x13   :  { %9373 = vset.pattern.permute.xlu1 %v9459_v0  ;;  %9375 = vset.pattern.permute.xlu0 %v9459_v0  ;;  %v9546_v2 = vld [vmem:[%s10499_s3] sm:$0xff]  ;;  %v59_v4 = vsel %vm58_vm0, %v9541_v1, 0.0  ;;  %v9460_v6 = vmov 1   ;;  %v202_v7 = vld [vmem:[%s10497_s1 + $0x8] sm:$0xff]  ;;  %v9461_v9 = vmov 0.0   ;;  %v115_v11 = vld [vmem:[#allocation2 + $0x28] sm:$0xff] }
  0x14   :  { %v200_v3 = vld [vmem:[%s10496_s0] sm:$0xff]  ;;  %60 = vadd.xlane.f32.xlu0 %v59_v4  ;;  %v63_v5 = vsel %vm62_vm1, %v9546_v2, 0.0  ;;  %8067 = vmatprep.subr.mxu1 %v9461_v9  ;;  %v114_v10 = vld [vmem:[#allocation2 + $0x20] sm:$0xff]  ;;  %v9462_v13 = vmov 0.0|0.0   ;;  %v116_v14 = vld [vmem:[#allocation2 + $0x30] sm:$0xff]  ;;  %vm9463_vm2 = vmmov 0  }
  0x15   :  { %209 = vperm.xlu1 %9373, %v200_v3   ;;  %v201_v8 = vld [vmem:[%s10497_s1] sm:$0xff]  ;;  %v9562_v12 = vpack.c.bf16 %v115_v11, %v114_v10  ;;  %8934 = vmatprep.subr.bf16.mxu0 %v9462_v13  ;;  %v9584_v19 = vld [vmem:[%s10501_s5 + $0x8] sm:$0xff]  ;;  %v213_v22 = vshrl.u32 %v212_v21, 7  ;;  %v110_v52 = vld [vmem:[#allocation2 + $0x8] sm:$0xff]  ;;  %vm398_vm3 = vcmask 261120   ;;  %s9464_s0 = smov 127  }
  0x16   :  { %v117_v15 = vld [vmem:[#allocation2 + $0x38] sm:$0xff]  ;;  %8069 = vmatprep.mubr.msk.f32.mxu1 %vm9463_vm2, %v9461_v9  ;;  %8087 = vmatprep.mubr.msk.f32.mxu0 %vm9463_vm2, %v9461_v9  ;;  %v69_v20 = vsel %vm62_vm1, %v9584_v19, 0.0  ;;  %v109_v51 = vld [vmem:[#allocation2] sm:$0xff]  ;;  %v111_v55 = vld [vmem:[#allocation2 + $0x10] sm:$0xff]  ;;  %s9465_s22 = smov 126   ;;  %vm7528_vm8 = vcmask 31744  }
  0x17   :  { %8936 = vmatpush3.bf16.msra.mxu0 %v9562_v12  ;;  %v9567_v16 = vpack.c.bf16 %v117_v15, %v116_v14  ;;  %v9577_v17 = vld [vmem:[%s10501_s5] sm:$0xff]  ;;  %v214_v23 = vsub.s32 0, %v213_v22  ;;  %v224_v26 = vsub.s32 1, %v213_v22  ;;  %v244_v36 = vsub.s32 2, %v213_v22  ;;  %v120_v10 = vld [vmem:[#allocation2 + $0x48] sm:$0xff]  ;;  %v121_v14 = vld [vmem:[#allocation2 + $0x50] sm:$0xff] }
  0x18   :  { %64 = vadd.xlane.f32.xlu0 %v63_v5  ;;  %8937 = vmatprep.subr.bf16.mxu0 %v9462_v13  ;;  %v66_v18 = vsel %vm62_vm1, %v9577_v17, 0.0  ;;  %v108_v24 = vld [vmem:[%s10502_s6] sm:$0x7]  ;;  %v9621_v53 = vpack.c.bf16 %v110_v52, %v109_v51 }
  0x19   :  { %9374 = vset.pattern.permute.xlu1 %v9460_v6  ;;  %v215_v25 = vrot.slane %v108_v24, %v214_v23  ;;  %v7540_v28 = vld [vmem:[%s10504_s8] ss:$0 sm:$0xff]  ;;  %v225_v30 = vrot.slane %v108_v24, %v224_v26  ;;  %v245_v39 = vrot.slane %v108_v24, %v244_v36  ;;  %v7541_v43 = vld [vmem:[%s10504_s8 + $0x1] ss:$0 sm:$0xff] }
  0x1a   :  { %219 = vperm.xlu1 %9374, %v200_v3   ;;  %v112_v56 = vld [vmem:[#allocation2 + $0x18] sm:$0xff] }
  0x1b   :  { %8939 = vmatpush3.bf16.msra.mxu0 %v9567_v16  ;;  %v9630_v57 = vpack.c.bf16 %v112_v56, %v111_v55  ;;  %v122_v15 = vld [vmem:[#allocation2 + $0x58] sm:$0xff] }
  0x1e   :  { %9376 = vset.pattern.permute.xlu1 %v9459_v0 }
  0x1f   :  { %239 = vperm.xlu1 %9376, %v202_v7  }
  0x2e   :  { %234 = vperm.xlu0 %9375, %v201_v8   ;;  %v119_v8 = vld [vmem:[#allocation2 + $0x40] sm:$0xff] }
  0x2f   :  { %v9651_v11 = vpack.c.bf16 %v120_v10, %v119_v8 }
  0x43   :  { %67 = vadd.xlane.f32.xlu1 %v66_v18 }
  0x47   :  { %70 = vadd.xlane.f32.xlu1 %v69_v20  ;;  %v9663_v20 = vld [vmem:[%s10504_s8 + $0x2] ss:$0 sm:$0xff] }
  0x94   :  { %v210_v27 = vpop.permute.xlu1 %209 }
  0x95   :  { %v216_v29 = vmul.f32 %v215_v25, %v210_v27 }
  0x97   :  { %v217_v31 = vadd.f32 %v7540_v28, %v216_v29 }
  0x99   :  { %v220_v32 = vpop.permute.xlu1 %219 }
  0x9a   :  { %v226_v33 = vmul.f32 %v225_v30, %v220_v32  ;;  %v9685_v30 = vld [vmem:[%s10504_s8 + $0x3] ss:$0 sm:$0xff] }
  0x9c   :  { %v9595_v34 = vadd.f32 %v226_v33, %v217_v31 }
  0x9e   :  { %8068 = vmatpush3.msra.mxu1 %v9595_v34  ;;  %v240_v40 = vpop.permute.xlu1 %239 }
  0x9f   :  { %8931 = vmatprep.subr.bf16.mxu1 %v9462_v13  ;;  %v247_v42 = vmul.f32 %v245_v39, %v240_v40 }
  0xa1   :  { %v9599_v35 = vpop.xlane.xlu0 %60  ;;  %v9608_v45 = vadd.f32 %v7541_v43, %v247_v42 }
  0xa5   :  { %v9601_v37 = vpop.xlane.xlu0 %64 }
  0xa6   :  { %v78_v38 = vadd.f32 %v9601_v37, %v9599_v35 }
  0xa8   :  { %v79_v41 = vmax.f32 %v78_v38, 1.0 }
  0xaa   :  { %9397 = vrcp.f32 %v79_v41 }
  0xad   :  { %v235_v44 = vpop.permute.xlu0 %234 }
  0xae   :  { %v246_v46 = vmul.f32 %v245_v39, %v235_v44 }
  0xb0   :  { %v9610_v47 = vadd.f32 %v7541_v43, %v246_v46 }
  0xb2   :  { %v8932_v48 = vpack.c.bf16 %v9608_v45, %v9610_v47 }
  0xb4   :  { %v9398_v49 = vpop.eup %9397  ;;  %8947 = vmatprep.subr.bf16.mxu0 %v8932_v48 }
  0xb5   :  { %v9615_v50 = vmul.f32 %v9398_v49, %v9541_v1  ;;  %v9624_v54 = vmul.f32 %v9398_v49, %v9546_v2 }
  0xb7   :  { %8070 = vmatmul.mubr.msk.f32.vlgmr.msra.gmra.mrb[0].mxu1 %vm58_vm0, %v9615_v50 }
  0xb8   :  { %8933 = vmatpush3.bf16.msra.mxu1 %v8932_v48  ;;  %8076 = vmatprep.mubr.msk.f32.mxu1 %vm9463_vm2, %v9461_v9 }
  0xb9   :  { %8940 = vmatprep.subr.bf16.mxu1 %v9462_v13 }
  0xbb   :  { %8077 = vmatmul.mubr.msk.f32.vlgmr.msra.gmra.mrb[2].mxu1 %vm62_vm1, %v9624_v54 }
  0xbc   :  { %8942 = vmatpush3.bf16.msra.mxu1 %v9621_v53  ;;  %8098 = vmatprep.mubr.msk.f32.mxu1 %vm9463_vm2, %v9461_v9 }
  0xbd   :  { %8943 = vmatprep.subr.bf16.mxu1 %v9462_v13 }
  0xc0   :  { %8945 = vmatpush3.bf16.msra.mxu1 %v9630_v57 }
  0xc1   :  { %8951 = vmatprep.subr.bf16.mxu1 %v9651_v11 }
  0xd0   :  { %v68_v58 = vpop.xlane.xlu1 %67 }
  0xd1   :  { %v84_v59 = vmax.f32 %v68_v58, 1.0 }
  0xd3   :  { %9399 = vrcp.f32 %v84_v59 }
  0xd4   :  { %v71_v60 = vpop.xlane.xlu1 %70 }
  0xd5   :  { %v85_v61 = vmax.f32 %v71_v60, 1.0 }
  0xd7   :  { %9401 = vrcp.f32 %v85_v61 }
  0xdd   :  { %v9400_v62 = vpop.eup %9399 }
  0xde   :  { %v9638_v4 = vmul.f32 %v9400_v62, %v9577_v17  ;;  %v9655_v17 = vpack.c.bf16 %v122_v15, %v121_v14  ;;  %v54_v15 = vld [vmem:[%s10500_s4] sm:$0xff] }
  0xe1   :  { %v9402_v3 = vpop.eup %9401 }
  0xe2   :  { %v9642_v7 = vmul.f32 %v9402_v3, %v9584_v19 }
 0x18a   :  { %v321_v63 = vpop.f32.mrb[0].mxu1 }
 0x18b   :  { %v8071_v0 = vpop.f32.mrb[1].mxu1  ;;  %8099 = vmatmul.mubr.msk.f32.vlgmr.msra.gmra.mrb[4].mxu1 %vm398_vm3, %v321_v63 }
 0x18c   :  { %8953 = vmatpush3.bf16.msra.mxu1 %v9651_v11 }
 0x18d   :  { %8955 = vmatprep.subr.bf16.mxu1 %v9655_v17 }
 0x18e   :  { %v394_v5 = vpop.f32.mrb[2].mxu1 }
 0x18f   :  { %v8078_v6 = vpop.f32.mrb[3].mxu1  ;;  %8088 = vmatmul.mubr.msk.f32.vlgmr.msra.gmra.mrb[0].mxu0 %vm398_vm3, %v394_v5 }
 0x190   :  { %8949 = vmatpush3.bf16.msra.mxu0 %v8932_v48  ;;  %8105 = vmatprep.mubr.msk.f32.mxu0 %vm62_vm1, %v9638_v4 }
 0x191   :  { %8119 = vmatprep.subr.mxu0 %v9461_v9  ;;  %8957 = vmatpush3.bf16.msra.mxu1 %v9655_v17 }
 0x192   :  { %8961 = vmatprep.subr.bf16.mxu1 %v9462_v13 }
 0x193   :  { %8106 = vmatmul.mubr.msk.f32.vlgmr.msra.gmra.mrb[2].mxu0 %vm62_vm1, %v9642_v7 }
 0x194   :  { %8121 = vmatprep.mubr.msk.f32.mxu0 %vm9463_vm2, %v9461_v9 }
 0x25e   :  { %v541_v18 = vpop.f32.mrb[4].mxu1 }
 0x25f   :  { %v8100_v19 = vpop.f32.mrb[5].mxu1 }
 0x262   :  { %v9665_v22 = vpop.f32.mrb[0].mxu0 }
 0x263   :  { %v542_v23 = vadd.f32 %v541_v18, %v9665_v22  ;;  %v8089_v24 = vpop.f32.mrb[1].mxu0  ;;  %v72_v18 = vsel %vm58_vm0, %v54_v15, 0.0 }
 0x264   :  { %73 = vadd.xlane.f32.xlu0 %v72_v18 }
 0x265   :  { %v626_v25 = vadd.f32 %v9663_v20, %v542_v23  ;;  %v92_v23 = vmax.f32 %v9599_v35, 1.0 }
 0x266   :  { %v8107_v26 = vpop.f32.mrb[2].mxu0 }
 0x267   :  { %v627_v27 = vmax.f32 %v626_v25, 0.0  ;;  %v617_v28 = vpop.f32.mrb[3].mxu0  ;;  %9403 = vrcp.f32 %v92_v23  ;;  %v135_v23 = vld [vmem:[#allocation2 + $0xa8] sm:$0xff] }
 0x268   :  { %8116 = vmatprep.mubr.msk.f32.mxu1 %vm398_vm3, %v617_v28 }
 0x269   :  { %8117 = vmatmul.mubr.msk.f32.vlgmr.msra.gmra.mrb[6].mxu1 %vm398_vm3, %v8107_v26  ;;  %v628_v29 = vadd.f32 %v627_v27, %v9595_v34 }
 0x26a   :  { %8963 = vmatpush3.bf16.msra.mxu1 %v9562_v12  ;;  %8139 = vmatprep.mubr.msk.f32.mxu1 %vm9463_vm2, %v9461_v9 }
 0x26b   :  { %8120 = vmatpush3.msra.mxu0 %v628_v29  ;;  %8964 = vmatprep.subr.bf16.mxu1 %v9462_v13 }
 0x26c   :  { %8122 = vmatmul.mubr.msk.f32.vlgmr.msra.gmra.mrb[4].mxu0 %vm58_vm0, %v9615_v50  ;;  %8958 = vmatprep.subr.bf16.mxu0 %v9462_v13 }
 0x26d   :  { %8128 = vmatprep.mubr.msk.f32.mxu0 %vm9463_vm2, %v9461_v9 }
 0x26e   :  { %8966 = vmatpush3.bf16.msra.mxu1 %v9567_v16 }
 0x33c   :  { %v8118_v31 = vpop.f32.mrb[6].mxu1 }
 0x33d   :  { %v707_v32 = vadd.f32 %v8118_v31, %v9685_v30  ;;  %v701_v33 = vpop.f32.mrb[7].mxu1 }
 0x33e   :  { %v702_v34 = vadd.f32 %v9685_v30, %v701_v33 }
 0x33f   :  { %v711_v36 = vmax.f32 %v707_v32, 0.0  ;;  %v780_v38 = vpop.f32.mrb[4].mxu0 }
 0x340   :  { %v710_v39 = vmax.f32 %v702_v34, 0.0  ;;  %v8123_v40 = vpop.f32.mrb[5].mxu0  ;;  %v74_v34 = vpop.xlane.xlu0 %73 }
 0x341   :  { %v713_v41 = vadd.f32 %v711_v36, %v9608_v45  ;;  %v96_v36 = vmax.f32 %v9601_v37, 1.0 }
 0x342   :  { %v712_v42 = vadd.f32 %v710_v39, %v9610_v47  ;;  %v100_v39 = vmax.f32 %v74_v34, 1.0 }
 0x343   :  { %9405 = vrcp.f32 %v96_v36 }
 0x344   :  { %v8959_v43 = vpack.c.bf16 %v713_v41, %v712_v42  ;;  %9407 = vrcp.f32 %v100_v39  ;;  %v141_v39 = vld [vmem:[#allocation2 + $0xd0] sm:$0xff] }
 0x346   :  { %8960 = vmatpush3.bf16.msra.mxu0 %v8959_v43  ;;  %8974 = vmatprep.subr.bf16.mxu1 %v8959_v43 }
 0x347   :  { %8967 = vmatprep.subr.bf16.mxu0 %v9462_v13 }
 0x349   :  { %8129 = vmatmul.mubr.msk.f32.vlgmr.msra.gmra.mrb[6].mxu0 %vm62_vm1, %v9624_v54 }
 0x34a   :  { %8969 = vmatpush3.bf16.msra.mxu0 %v9621_v53  ;;  %8150 = vmatprep.mubr.msk.f32.mxu0 %vm9463_vm2, %v9461_v9 }
 0x34b   :  { %8970 = vmatprep.subr.bf16.mxu0 %v9462_v13 }
 0x34e   :  { %8972 = vmatpush3.bf16.msra.mxu0 %v9630_v57 }
 0x34f   :  { %8978 = vmatprep.subr.bf16.mxu0 %v9651_v11 }
 0x351   :  { %8151 = vmatmul.mubr.msk.f32.vlgmr.msra.gmra.mrb[8].mxu0 %vm398_vm3, %v780_v38 }
 0x352   :  { %8980 = vmatpush3.bf16.msra.mxu0 %v9651_v11 }
 0x353   :  { %8982 = vmatprep.subr.bf16.mxu0 %v9655_v17 }
 0x356   :  { %8984 = vmatpush3.bf16.msra.mxu0 %v9655_v17 }
 0x357   :  { %8988 = vmatprep.subr.bf16.mxu0 %v9462_v13 }
 0x41c   :  { %v850_v44 = vpop.f32.mrb[6].mxu0 }
 0x41d   :  { %v8130_v45 = vpop.f32.mrb[7].mxu0  ;;  %8140 = vmatmul.mubr.msk.f32.vlgmr.msra.gmra.mrb[8].mxu1 %vm398_vm3, %v850_v44 }
 0x41e   :  { %8976 = vmatpush3.bf16.msra.mxu1 %v8959_v43  ;;  %8157 = vmatprep.mubr.msk.f32.mxu1 %vm62_vm1, %v9638_v4 }
 0x41f   :  { %8171 = vmatprep.subr.mxu1 %v9461_v9 }
 0x421   :  { %8158 = vmatmul.mubr.msk.f32.vlgmr.msra.gmra.mrb[10].mxu1 %vm62_vm1, %v9642_v7 }
 0x422   :  { %8173 = vmatprep.mubr.msk.f32.mxu1 %vm9463_vm2, %v9461_v9 }
 0x424   :  { %v996_v46 = vpop.f32.mrb[8].mxu0 }
 0x425   :  { %v8152_v47 = vpop.f32.mrb[9].mxu0 }
 0x4f0   :  { %v9713_v48 = vpop.f32.mrb[8].mxu1 }
 0x4f1   :  { %v997_v49 = vadd.f32 %v996_v46, %v9713_v48  ;;  %v8141_v51 = vpop.f32.mrb[9].mxu1 }
 0x4f3   :  { %v1075_v52 = vadd.f32 %v9663_v20, %v997_v49 }
 0x4f4   :  { %v8159_v55 = vpop.f32.mrb[10].mxu1 }
 0x4f5   :  { %v1076_v56 = vmax.f32 %v1075_v52, 0.0  ;;  %v1066_v58 = vpop.f32.mrb[11].mxu1 }
 0x4f6   :  { %8168 = vmatprep.mubr.msk.f32.mxu0 %vm398_vm3, %v1066_v58 }
 0x4f7   :  { %8169 = vmatmul.mubr.msk.f32.vlgmr.msra.gmra.mrb[10].mxu0 %vm398_vm3, %v8159_v55  ;;  %v1077_v59 = vadd.f32 %v1076_v56, %v628_v29  ;;  %v9404_v29 = vpop.eup %9403  ;;  %v129_v55 = vld [vmem:[#allocation2 + $0x80] sm:$0xff]  ;;  %v130_v56 = vld [vmem:[#allocation2 + $0x88] sm:$0xff] }
 0x4f8   :  { %8990 = vmatpush3.bf16.msra.mxu0 %v9562_v12  ;;  %8191 = vmatprep.mubr.msk.f32.mxu0 %vm9463_vm2, %v9461_v9  ;;  %v9776_v35 = vmul.f32 %v9404_v29, %v9541_v1  ;;  %v9406_v49 = vpop.eup %9405  ;;  %v149_v29 = vld [vmem:[#allocation2 + $0x100] sm:$0xff] }
 0x4f9   :  { %8172 = vmatpush3.msra.mxu1 %v1077_v59  ;;  %8991 = vmatprep.subr.bf16.mxu0 %v9462_v13  ;;  %v9408_v51 = vpop.eup %9407 }
 0x4fa   :  { %8174 = vmatmul.mubr.msk.f32.vlgmr.msra.gmra.mrb[12].mxu1 %vm58_vm0, %v9615_v50  ;;  %8985 = vmatprep.subr.bf16.mxu1 %v9462_v13 }
 0x4fb   :  { %8180 = vmatprep.mubr.msk.f32.mxu1 %vm9463_vm2, %v9461_v9 }
 0x4fc   :  { %8993 = vmatpush3.bf16.msra.mxu0 %v9567_v16 }
 0x5ca   :  { %v8170_v60 = vpop.f32.mrb[10].mxu0 }
 0x5cb   :  { %v1156_v61 = vadd.f32 %v8170_v60, %v9685_v30  ;;  %v1150_v12 = vpop.f32.mrb[11].mxu0  ;;  %v124_v60 = vld [vmem:[#allocation2 + $0x60] sm:$0xff] }
 0x5cc   :  { %v1151_v62 = vadd.f32 %v9685_v30, %v1150_v12  ;;  %v9020_v12 = vpack.c.bf16 %v130_v56, %v129_v55  ;;  %v9900_v55 = vld [vmem:[%s10505_s9 + $0x18] sm:$0xff] }
 0x5cd   :  { %v1160_v63 = vmax.f32 %v1156_v61, 0.0  ;;  %v1229_v0 = vpop.f32.mrb[12].mxu1  ;;  %v125_v61 = vld [vmem:[#allocation2 + $0x68] sm:$0xff] }
 0x5ce   :  { %v1159_v3 = vmax.f32 %v1151_v62, 0.0  ;;  %v8175_v5 = vpop.f32.mrb[13].mxu1 }
 0x5cf   :  { %v9731_v6 = vadd.f32 %v1160_v63, %v713_v41  ;;  %v131_v63 = vld [vmem:[#allocation2 + $0x90] sm:$0xff]  ;;  %v127_v5 = vld [vmem:[#allocation2 + $0x78] sm:$0xff] }
 0x5d0   :  { %v9733_v8 = vadd.f32 %v1159_v3, %v712_v42  ;;  %v126_v3 = vld [vmem:[#allocation2 + $0x70] sm:$0xff] }
 0x5d2   :  { %v8986_v10 = vpack.c.bf16 %v9731_v6, %v9733_v8 }
 0x5d4   :  { %8987 = vmatpush3.bf16.msra.mxu1 %v8986_v10  ;;  %9001 = vmatprep.subr.bf16.mxu0 %v8986_v10 }
 0x5d5   :  { %8994 = vmatprep.subr.bf16.mxu1 %v9462_v13 }
 0x5d7   :  { %8181 = vmatmul.mubr.msk.f32.vlgmr.msra.gmra.mrb[14].mxu1 %vm62_vm1, %v9624_v54 }
 0x5d8   :  { %8996 = vmatpush3.bf16.msra.mxu1 %v9621_v53  ;;  %8202 = vmatprep.mubr.msk.f32.mxu1 %vm9463_vm2, %v9461_v9 }
 0x5d9   :  { %8997 = vmatprep.subr.bf16.mxu1 %v9462_v13 }
 0x5dc   :  { %8999 = vmatpush3.bf16.msra.mxu1 %v9630_v57 }
 0x5dd   :  { %9005 = vmatprep.subr.bf16.mxu1 %v9651_v11 }
 0x5df   :  { %8203 = vmatmul.mubr.msk.f32.vlgmr.msra.gmra.mrb[16].mxu1 %vm398_vm3, %v1229_v0  ;;  %v132_v0 = vld [vmem:[#allocation2 + $0x98] sm:$0xff] }
 0x5e0   :  { %9007 = vmatpush3.bf16.msra.mxu1 %v9651_v11 }
 0x5e1   :  { %9009 = vmatprep.subr.bf16.mxu1 %v9655_v17 }
 0x5e4   :  { %9011 = vmatpush3.bf16.msra.mxu1 %v9655_v17  ;;  %v55_v17 = vld [vmem:[%s10500_s4 + $0x8] sm:$0xff] }
 0x5e5   :  { %v75_v19 = vsel %vm58_vm0, %v55_v17, 0.0 }
 0x5e6   :  { %76 = vadd.xlane.f32.xlu1 %v75_v19  ;;  %v134_v19 = vld [vmem:[#allocation2 + $0xa0] sm:$0xff] }
 0x673   :  { %v77_v38 = vpop.xlane.xlu1 %76 }
 0x674   :  { %v101_v1 = vmax.f32 %v77_v38, 1.0 }
 0x676   :  { %9409 = vrcp.f32 %v101_v1  ;;  %v142_v1 = vld [vmem:[#allocation2 + $0xd8] sm:$0xff] }
 0x680   :  { %v9410_v58 = vpop.eup %9409 }
 0x681   :  { %v9806_v62 = vmul.f32 %v9410_v58, %v55_v17  ;;  %v140_v17 = vld [vmem:[#allocation2 + $0xc8] sm:$0xff] }
 0x6aa   :  { %v1299_v16 = vpop.f32.mrb[14].mxu1 }
 0x6ab   :  { %v8182_v54 = vpop.f32.mrb[15].mxu1  ;;  %8192 = vmatmul.mubr.msk.f32.vlgmr.msra.gmra.mrb[12].mxu0 %vm398_vm3, %v1299_v16 }
 0x6ac   :  { %9003 = vmatpush3.bf16.msra.mxu0 %v8986_v10  ;;  %8209 = vmatprep.mubr.msk.f32.mxu0 %vm62_vm1, %v9638_v4  ;;  %v145_v10 = vld [vmem:[#allocation2 + $0xe8] sm:$0xff]  ;;  %v146_v54 = vld [vmem:[#allocation2 + $0xf0] sm:$0xff] }
 0x6ad   :  { %8223 = vmatprep.subr.mxu0 %v9461_v9 }
 0x6af   :  { %8210 = vmatmul.mubr.msk.f32.vlgmr.msra.gmra.mrb[14].mxu0 %vm62_vm1, %v9642_v7 }
 0x6b0   :  { %8225 = vmatprep.mubr.msk.f32.mxu0 %vm9463_vm2, %v9461_v9 }
 0x6b2   :  { %v1445_v11 = vpop.f32.mrb[16].mxu1 }
 0x6b3   :  { %v8204_v14 = vpop.f32.mrb[17].mxu1 }
 0x77e   :  { %v9767_v24 = vpop.f32.mrb[12].mxu0 }
 0x77f   :  { %v1446_v25 = vadd.f32 %v1445_v11, %v9767_v24  ;;  %v8193_v26 = vpop.f32.mrb[13].mxu0  ;;  %v147_v11 = vld [vmem:[#allocation2 + $0xf8] sm:$0xff] }
 0x780   :  { %v9834_v14 = vpack.c.bf16 %v147_v11, %v146_v54  ;;  %v136_v26 = vld [vmem:[#allocation2 + $0xb0] sm:$0xff]  ;;  %v9927_v54 = vld [vmem:[%s10504_s8 + $0x5] ss:$0 sm:$0xff] }
 0x781   :  { %v1524_v27 = vadd.f32 %v9663_v20, %v1446_v25  ;;  %v9841_v25 = vpack.c.bf16 %v135_v23, %v134_v19 }
 0x782   :  { %v8211_v28 = vpop.f32.mrb[14].mxu0 }
 0x783   :  { %v1525_v31 = vmax.f32 %v1524_v27, 0.0  ;;  %v1515_v32 = vpop.f32.mrb[15].mxu0  ;;  %v137_v27 = vld [vmem:[#allocation2 + $0xb8] sm:$0xff] }
 0x784   :  { %8220 = vmatprep.mubr.msk.f32.mxu1 %vm398_vm3, %v1515_v32  ;;  %v9849_v38 = vpack.c.bf16 %v137_v27, %v136_v26 }
 0x785   :  { %v9772_v33 = vadd.f32 %v1525_v31, %v1077_v59  ;;  %8221 = vmatmul.mubr.msk.f32.vlgmr.msra.gmra.mrb[18].mxu1 %vm398_vm3, %v8211_v28  ;;  %v9801_v59 = vmul.f32 %v9408_v51, %v54_v15  ;;  %v139_v15 = vld [vmem:[#allocation2 + $0xc0] sm:$0xff]  ;;  %v150_v31 = vld [vmem:[#allocation2 + $0x108] sm:$0xff] }
 0x786   :  { %8239 = vmatprep.mubr.msk.f32.mxu1 %vm62_vm1, %v9638_v4  ;;  %v9838_v18 = vpack.c.bf16 %v140_v17, %v139_v15  ;;  %v9886_v51 = vld [vmem:[%s10505_s9 + $0x8] sm:$0xff] }
 0x787   :  { %8224 = vmatpush3.msra.mxu0 %v9772_v33 }
 0x788   :  { %8226 = vmatmul.mubr.msk.f32.vlgmr.msra.gmra.mrb[16].mxu0 %vm58_vm0, %v9776_v35  ;;  %9012 = vmatprep.subr.bf16.mxu0 %v9462_v13 }
 0x789   :  { %8232 = vmatprep.mubr.msk.f32.mxu0 %vm9463_vm2, %v9461_v9 }
 0x858   :  { %v8222_v40 = vpop.f32.mrb[18].mxu1 }
 0x859   :  { %v1605_v4 = vadd.f32 %v8222_v40, %v9685_v30  ;;  %v1599_v41 = vpop.f32.mrb[19].mxu1  ;;  %v9053_v40 = vpack.c.bf16 %v150_v31, %v149_v29  ;;  %v154_v29 = vld [vmem:[#allocation2 + $0x120] sm:$0xff]  ;;  %v155_v31 = vld [vmem:[#allocation2 + $0x128] sm:$0xff] }
 0x85a   :  { %v1600_v42 = vadd.f32 %v9685_v30, %v1599_v41  ;;  %v9799_v30 = vmul.f32 %v9406_v49, %v9546_v2  ;;  %v9811_v2 = vpack.c.bf16 %v125_v61, %v124_v60  ;;  %v151_v41 = vld [vmem:[#allocation2 + $0x110] sm:$0xff] }
 0x85b   :  { %v1609_v43 = vmax.f32 %v1605_v4, 0.0  ;;  %v1681_v44 = vpop.f32.mrb[16].mxu0 }
 0x85c   :  { %v1608_v45 = vmax.f32 %v1600_v42, 0.0  ;;  %v8227_v46 = vpop.f32.mrb[17].mxu0  ;;  %v152_v42 = vld [vmem:[#allocation2 + $0x118] sm:$0xff] }
 0x85d   :  { %v9790_v47 = vadd.f32 %v1609_v43, %v9731_v6  ;;  %v9023_v6 = vpack.c.bf16 %v132_v0, %v131_v63 }
 0x85e   :  { %v9793_v37 = vadd.f32 %v1608_v45, %v9733_v8  ;;  %v144_v8 = vld [vmem:[#allocation2 + $0xe0] sm:$0xff]  ;;  %v9057_v45 = vpack.c.bf16 %v152_v42, %v151_v41  ;;  %v160_v42 = vld [vmem:[#allocation2 + $0x148] sm:$0xff] }
 0x85f   :  { %v9827_v16 = vpack.c.bf16 %v145_v10, %v144_v8  ;;  %v159_v41 = vld [vmem:[#allocation2 + $0x140] sm:$0xff] }
 0x860   :  { %v9013_v52 = vpack.c.bf16 %v9790_v47, %v9793_v37 }
 0x862   :  { %9014 = vmatpush3.bf16.msra.mxu0 %v9013_v52  ;;  %9016 = vmatprep.subr.bf16.mxu1 %v9013_v52 }
 0x863   :  { %9018 = vmatpush3.bf16.msra.mxu1 %v9013_v52  ;;  %8242 = vmatprep.subr.mxu0 %v9772_v33  ;;  %v9891_v52 = vld [vmem:[%s10505_s9 + $0x10] sm:$0xff] }
 0x864   :  { %9019 = vmatprep.subr.bf16.mxu1 %v9462_v13  ;;  %v9906_v56 = vpack.i.bf16 %v9900_v55, %v9891_v52 }
 0x865   :  { %8233 = vmatmul.mubr.msk.f32.vlgmr.msra.gmra.mrb[18].mxu0 %vm62_vm1, %v9799_v30 }
 0x866   :  { %8240 = vmatmul.mubr.msk.f32.vlgmr.msra.gmra.mrb[20].mxu1 %vm62_vm1, %v9642_v7  ;;  %8243 = vmatpush3.msra.mxu0 %v9772_v33  ;;  %v9822_v7 = vpack.c.bf16 %v127_v5, %v126_v3 }
 0x867   :  { %8244 = vmatprep.mubr.msk.f32.mxu0 %vm58_vm0, %v9801_v59  ;;  %9025 = vmatprep.subr.bf16.mxu0 %v9462_v13 }
 0x868   :  { %9021 = vmatpush3.bf16.msra.mxu1 %v9020_v12  ;;  %8255 = vmatprep.mubr.msk.f32.mxu1 %vm9463_vm2, %v9461_v9  ;;  %v9916_v12 = vld [vmem:[%s10504_s8 + $0x4] ss:$0 sm:$0xff] }
 0x869   :  { %8245 = vmatmul.mubr.msk.f32.vlgmr.msra.gmra.mrb[20].mxu0 %vm58_vm0, %v9806_v62  ;;  %9022 = vmatprep.subr.bf16.mxu1 %v9462_v13 }
 0x86a   :  { %9027 = vmatpush3.bf16.msra.mxu0 %v9811_v2  ;;  %8266 = vmatprep.mubr.msk.f32.mxu0 %vm9463_vm2, %v9461_v9 }
 0x86b   :  { %9028 = vmatprep.subr.bf16.mxu0 %v9462_v13 }
 0x86c   :  { %9024 = vmatpush3.bf16.msra.mxu1 %v9023_v6 }
 0x86d   :  { %9031 = vmatprep.subr.bf16.mxu1 %v9462_v13 }
 0x86e   :  { %9030 = vmatpush3.bf16.msra.mxu0 %v9822_v7 }
 0x86f   :  { %9038 = vmatprep.subr.bf16.mxu0 %v9827_v16 }
 0x871   :  { %8267 = vmatmul.mubr.msk.f32.vlgmr.msra.gmra.mrb[22].mxu0 %vm398_vm3, %v1681_v44  ;;  %v9854_v44 = vpack.c.bf16 %v142_v1, %v141_v39  ;;  %v9942_v39 = vpack.c.bf16 %v155_v31, %v154_v29  ;;  %v156_v1 = vld [vmem:[#allocation2 + $0x130] sm:$0xff]  ;;  %v167_v31 = vld [vmem:[#allocation2 + $0x178] sm:$0xff] }
 0x872   :  { %9040 = vmatpush3.bf16.msra.mxu0 %v9827_v16  ;;  %v166_v29 = vld [vmem:[#allocation2 + $0x170] sm:$0xff] }
 0x873   :  { %9042 = vmatprep.subr.bf16.mxu0 %v9834_v14 }
 0x876   :  { %9044 = vmatpush3.bf16.msra.mxu0 %v9834_v14 }
 0x877   :  { %9046 = vmatprep.subr.bf16.mxu0 %v9838_v18 }
 0x938   :  { %v1754_v28 = vpop.f32.mrb[18].mxu0 }
 0x939   :  { %v8234_v32 = vpop.f32.mrb[19].mxu0  ;;  %v9843_v34 = vpop.f32.mrb[20].mxu1  ;;  %8256 = vmatmul.mubr.msk.f32.vlgmr.msra.gmra.mrb[22].mxu1 %vm398_vm3, %v1754_v28 }
 0x93a   :  { %9033 = vmatpush3.bf16.msra.mxu1 %v9841_v25  ;;  %v9847_v36 = vpop.f32.mrb[21].mxu1  ;;  %8277 = vmatprep.mubr.msk.f32.mxu1 %vm9463_vm2, %v9461_v9 }
 0x93b   :  { %9034 = vmatprep.subr.bf16.mxu1 %v9462_v13 }
 0x93c   :  { %v8246_v4 = vpop.f32.mrb[20].mxu0 }
 0x93d   :  { %v1905_v43 = vpop.f32.mrb[21].mxu0 }
 0x93e   :  { %9036 = vmatpush3.bf16.msra.mxu1 %v9849_v38  ;;  %8288 = vmatprep.mubr.msk.f32.mxu0 %vm398_vm3, %v1905_v43  ;;  %v9955_v43 = vpack.c.bf16 %v160_v42, %v159_v41  ;;  %v10002_v42 = vpack.c.bf16 %v9900_v55, %v9891_v52 }
 0x93f   :  { %8289 = vmatmul.mubr.msk.f32.vlgmr.msra.gmra.mrb[24].mxu0 %vm398_vm3, %v8246_v4  ;;  %9054 = vmatprep.subr.bf16.mxu1 %v9053_v40 }
 0x940   :  { %9048 = vmatpush3.bf16.msra.mxu0 %v9838_v18  ;;  %8299 = vmatprep.mubr.msk.f32.mxu0 %vm398_vm3, %v9847_v36 }
 0x941   :  { %8278 = vmatmul.mubr.msk.f32.vlgmr.msra.gmra.mrb[24].mxu1 %vm398_vm3, %v9772_v33  ;;  %9050 = vmatprep.subr.bf16.mxu0 %v9854_v44 }
 0x942   :  { %9056 = vmatpush3.bf16.msra.mxu1 %v9053_v40  ;;  %8310 = vmatprep.mubr.msk.f32.mxu1 %vm398_vm3, %v9793_v37  ;;  %v9881_v37 = vld [vmem:[%s10505_s9] sm:$0xff] }
 0x943   :  { %9058 = vmatprep.subr.bf16.mxu1 %v9057_v45  ;;  %v157_v40 = vld [vmem:[#allocation2 + $0x138] sm:$0xff]  ;;  %v9996_v41 = vpack.c.bf16 %v9886_v51, %v9881_v37 }
 0x944   :  { %v2056_v46 = vpop.f32.mrb[22].mxu0  ;;  %9052 = vmatpush3.bf16.msra.mxu0 %v9854_v44  ;;  %v9948_v4 = vpack.c.bf16 %v157_v40, %v156_v1  ;;  %v9982_v40 = vpack.c.bf16 %v167_v31, %v166_v29 }
 0x945   :  { %v8268_v49 = vpop.f32.mrb[23].mxu0  ;;  %9061 = vmatprep.subr.bf16.mxu0 %v9462_v13 }
 0x946   :  { %9060 = vmatpush3.bf16.msra.mxu1 %v9057_v45  ;;  %v161_v45 = vld [vmem:[#allocation2 + $0x150] sm:$0xff] }
 0x947   :  { %8300 = vmatmul.mubr.msk.f32.vlgmr.msra.gmra.mrb[24].mxu0 %vm398_vm3, %v9843_v34  ;;  %8313 = vmatprep.subr.mxu1 %v9461_v9 }
 0x948   :  { %8322 = vmatprep.mubr.msk.f32.mxu0 %vm9463_vm2, %v9461_v9 }
 0x949   :  { %8311 = vmatmul.mubr.msk.f32.vlgmr.msra.gmra.mrb[26].mxu1 %vm398_vm3, %v9790_v47  ;;  %v9895_v47 = vpack.i.bf16 %v9886_v51, %v9881_v37  ;;  %v10009_v51 = vld [vmem:[%s10504_s8 + $0x6] ss:$0 sm:$0xff] }
 0x94a   :  { %8315 = vmatprep.mubr.msk.f32.mxu1 %vm9463_vm2, %v9461_v9 }
 0x94b   :  { %9378 = vrot.lane.b32.xlu1 %v9895_v47, %s9464_s0  ;;  %9388 = vrot.lane.b32.xlu0 %v9895_v47, %s9465_s22 }
 0x94f   :  { %9383 = vrot.lane.b32.xlu1 %v9906_v56, %s9464_s0 }
 0xa0c   :  { %v9910_v58 = vpop.f32.mrb[22].mxu1 }
 0xa0d   :  { %v8257_v60 = vpop.f32.mrb[23].mxu1  ;;  %v2057_v61 = vadd.f32 %v2056_v46, %v9910_v58  ;;  %v162_v46 = vld [vmem:[#allocation2 + $0x158] sm:$0xff] }
 0xa0e   :  { %v9959_v49 = vpack.c.bf16 %v162_v46, %v161_v45  ;;  %v9379_v60 = vpop.permute.xlu1 %9378 }
 0xa14   :  { %v2129_v63 = vpop.f32.mrb[24].mxu1 }
 0xa15   :  { %v2133_v0 = vadd.f32 %v2129_v63, %v2057_v61  ;;  %v8279_v3 = vpop.f32.mrb[25].mxu1  ;;  %v9381_v61 = vunpack.i.h.bf16 %v9379_v60  ;;  %v9380_v63 = vunpack.i.l.bf16 %v9379_v60 }
 0xa17   :  { %v9919_v5 = vadd.f32 %v9916_v12, %v2133_v0  ;;  %v9384_v0 = vpop.permute.xlu1 %9383  ;;  %v9963_v3 = vpack.c.bf16 %v9381_v61, %v9380_v63 }
 0xa19   :  { %v2382_v6 = vmax.f32 %v9919_v5, 0.0 }
 0xa1a   :  { %v8301_v8 = vpop.f32.mrb[24].mxu0 }
 0xa1b   :  { %8314 = vmatpush3.msra.mxu1 %v2382_v6  ;;  %v2288_v10 = vpop.f32.mrb[25].mxu0 }
 0xa1c   :  { %v9929_v11 = vpop.f32.mrb[26].mxu1  ;;  %8316 = vmatmul.mubr.msk.f32.vlgmr.msra.gmra.mrb[28].mxu1 %vm58_vm0, %v9776_v35  ;;  %9064 = vmatprep.subr.bf16.mxu1 %v9462_v13 }
 0xa1d   :  { %v2379_v15 = vadd.f32 %v9929_v11, %v8301_v8  ;;  %v9935_v17 = vpop.f32.mrb[27].mxu1  ;;  %8333 = vmatprep.mubr.msk.f32.mxu1 %vm9463_vm2, %v9461_v9  ;;  %9066 = vmatpush3.bf16.msra.mxu1 %v9955_v43  ;;  %v9386_v8 = vunpack.i.h.bf16 %v9384_v0 }
 0xa1e   :  { %v2378_v19 = vadd.f32 %v9935_v17, %v2288_v10  ;;  %9067 = vmatprep.subr.bf16.mxu1 %v9462_v13  ;;  %v9385_v10 = vunpack.i.l.bf16 %v9384_v0 }
 0xa1f   :  { %v2381_v23 = vadd.f32 %v9927_v54, %v2379_v15 }
 0xa20   :  { %v2380_v26 = vadd.f32 %v9927_v54, %v2378_v19 }
 0xa21   :  { %v2384_v27 = vmax.f32 %v2381_v23, 0.0  ;;  %9069 = vmatpush3.bf16.msra.mxu1 %v9959_v49  ;;  %v9966_v23 = vpack.c.bf16 %v9386_v8, %v9385_v10  ;;  %v10019_v10 = vld [vmem:[%s10506_s10] ss:$0 sm:$0xff] }
 0xa22   :  { %v2383_v28 = vmax.f32 %v2380_v26, 0.0  ;;  %9076 = vmatprep.subr.bf16.mxu1 %v9462_v13  ;;  %v164_v26 = vld [vmem:[#allocation2 + $0x160] sm:$0xff] }
 0xa24   :  { %v9062_v32 = vpack.c.bf16 %v2384_v27, %v2383_v28  ;;  %v165_v27 = vld [vmem:[#allocation2 + $0x168] sm:$0xff] }
 0xa25   :  { %v9978_v28 = vpack.c.bf16 %v165_v27, %v164_v26 }
 0xa26   :  { %9063 = vmatpush3.bf16.msra.mxu0 %v9062_v32 }
 0xa27   :  { %9070 = vmatprep.subr.bf16.mxu0 %v9462_v13 }
 0xa29   :  { %8323 = vmatmul.mubr.msk.f32.vlgmr.msra.gmra.mrb[26].mxu0 %vm62_vm1, %v9799_v30 }
 0xa2a   :  { %9072 = vmatpush3.bf16.msra.mxu0 %v9942_v39  ;;  %8344 = vmatprep.mubr.msk.f32.mxu0 %vm9463_vm2, %v9461_v9 }
 0xa2b   :  { %9073 = vmatprep.subr.bf16.mxu0 %v9462_v13 }
 0xa2e   :  { %9075 = vmatpush3.bf16.msra.mxu0 %v9948_v4 }
 0xa2f   :  { %9082 = vmatprep.subr.bf16.mxu0 %v9462_v13 }
 0xaef   :  { %v2451_v15 = vpop.f32.mrb[28].mxu1 }
 0xaf0   :  { %v8317_v19 = vpop.f32.mrb[29].mxu1  ;;  %8345 = vmatmul.mubr.msk.f32.vlgmr.msra.gmra.mrb[28].mxu0 %vm398_vm3, %v2451_v15 }
 0xaf1   :  { %9084 = vmatpush3.bf16.msra.mxu0 %v9963_v3  ;;  %8366 = vmatprep.mubr.msk.f32.mxu0 %vm9463_vm2, %v9461_v9 }
 0xaf2   :  { %9085 = vmatprep.subr.bf16.mxu0 %v9462_v13 }
 0xaf5   :  { %9087 = vmatpush3.bf16.msra.mxu0 %v9966_v23 }
 0xaf6   :  { %9094 = vmatprep.subr.bf16.mxu0 %v9462_v13 }
 0xaf8   :  { %8367 = vmatmul.mubr.msk.f32.vlgmr.msra.gmra.mrb[30].mxu0 %vm398_vm3, %v9772_v33 }
 0xaf9   :  { %8388 = vmatprep.mubr.msk.f32.mxu0 %vm9463_vm2, %v9461_v9 }
 0xafc   :  { %v2521_v32 = vpop.f32.mrb[26].mxu0 }
 0xafd   :  { %v8324_v1 = vpop.f32.mrb[27].mxu0  ;;  %8334 = vmatmul.mubr.msk.f32.vlgmr.msra.gmra.mrb[30].mxu1 %vm398_vm3, %v2521_v32 }
 0xafe   :  { %9078 = vmatpush3.bf16.msra.mxu1 %v9978_v28  ;;  %8355 = vmatprep.mubr.msk.f32.mxu1 %vm9463_vm2, %v9461_v9 }
 0xaff   :  { %9079 = vmatprep.subr.bf16.mxu1 %v9462_v13 }
 0xb02   :  { %9081 = vmatpush3.bf16.msra.mxu1 %v9982_v40 }
 0xb03   :  { %9088 = vmatprep.subr.bf16.mxu1 %v9462_v13 }
 0xb05   :  { %8356 = vmatmul.mubr.msk.f32.vlgmr.msra.gmra.mrb[32].mxu1 %vm398_vm3, %v2382_v6 }
 0xb06   :  { %8377 = vmatprep.mubr.msk.f32.mxu1 %vm9463_vm2, %v9461_v9  ;;  %9090 = vmatpush3.bf16.msra.mxu1 %v9996_v41 }
 0xb07   :  { %9091 = vmatprep.subr.bf16.mxu1 %v9462_v13 }
 0xb0a   :  { %9093 = vmatpush3.bf16.msra.mxu1 %v10002_v42 }
 0xb0b   :  { %8391 = vmatprep.subr.mxu1 %v9461_v9 }
 0xbc3   :  { %v2667_v5 = vpop.f32.mrb[28].mxu0 }
 0xbc4   :  { %v8346_v6 = vpop.f32.mrb[29].mxu0 }
 0xbc5   :  { %v9389_v6 = vpop.permute.xlu0 %9388 }
 0xbc6   :  { %v9391_v47 = vunpack.i.h.bf16 %v9389_v6 }
 0xbcb   :  { %v2829_v45 = vpop.f32.mrb[30].mxu0 }
 0xbcc   :  { %v8368_v46 = vpop.f32.mrb[31].mxu0 }
 0xbcd   :  { %v9390_v46 = vunpack.i.l.bf16 %v9389_v6 }
 0xbd0   :  { %v2594_v60 = vpop.f32.mrb[30].mxu1 }
 0xbd1   :  { %v2668_v61 = vadd.f32 %v2667_v5, %v2594_v60  ;;  %v8335_v37 = vpop.f32.mrb[31].mxu1  ;;  %v10022_v60 = vpack.c.bf16 %v9391_v47, %v9390_v46 }
 0xbd3   :  { %9096 = vmatpush3.bf16.msra.mxu0 %v10022_v60 }
 0xbd4   :  { %9097 = vmatprep.subr.bf16.mxu0 %v9462_v13 }
 0xbd8   :  { %v2740_v63 = vpop.f32.mrb[32].mxu1 }
 0xbd9   :  { %v2744_v0 = vadd.f32 %v2740_v63, %v2668_v61  ;;  %v8357_v52 = vpop.f32.mrb[33].mxu1 }
 0xbdb   :  { %v2745_v55 = vadd.f32 %v10009_v51, %v2744_v0 }
 0xbdd   :  { %v2746_v8 = vmax.f32 %v2745_v55, 0.0 }
 0xbdf   :  { %8378 = vmatmul.mubr.msk.f32.vlgmr.msra.gmra.mrb[34].mxu1 %vm398_vm3, %v2746_v8 }
 0xbe0   :  { %8393 = vmatprep.mubr.msk.f32.mxu1 %vm9463_vm2, %v9461_v9 }
 0xcb2   :  { %v2902_v15 = vpop.f32.mrb[34].mxu1 }
 0xcb3   :  { %v2903_v19 = vadd.f32 %v2902_v15, %v2829_v45  ;;  %v8379_v26 = vpop.f32.mrb[35].mxu1 }
 0xcb5   :  { %v2912_v27 = vadd.f32 %v10019_v10, %v2903_v19 }
 0xcb7   :  { %v7589_v29 = vmul.f32 -1.442695, %v2912_v27 }
 0xcb9   :  { %9411 = vpow2.f32 %v7589_v29 }
 0xcc3   :  { %v9412_v31 = vpop.eup %9411 }
 0xcc4   :  { %v2916_v32 = vadd.f32 1.0, %v9412_v31 }
 0xcc6   :  { %9413 = vrcp.f32 %v2916_v32 }
 0xcd0   :  { %v9414_v1 = vpop.eup %9413 }
 0xcd1   :  { %2921 = vperm.xlu1 %9376, %v9414_v1   ;;  %v2925_v5 = vsub.f32 1.0, %v9414_v1 }
 0xcd5   :  { %2928 = vperm.xlu1 %9376, %v2925_v5  }
 0xcd9   :  { %9393 = vrot.lane.b32.xlu1 %v9906_v56, %s9465_s22 }
 0xd50   :  { %v2922_v45 = vpop.permute.xlu1 %2921 }
 0xd51   :  { %v2924_v37 = vmul.f32 %v2922_v45, %v2746_v8 }
 0xd54   :  { %v2929_v61 = vpop.permute.xlu1 %2928 }
 0xd55   :  { %v2931_v63 = vmul.f32 %v2929_v61, %v9772_v33 }
 0xd57   :  { %v2932_v0 = vadd.f32 %v2931_v63, %v2924_v37 }
 0xd58   :  { %v9394_v52 = vpop.permute.xlu1 %9393 }
 0xd59   :  { %v9396_v55 = vunpack.i.h.bf16 %v9394_v52  ;;  %v9395_v15 = vunpack.i.l.bf16 %v9394_v52  ;;  %8392 = vmatpush3.msra.mxu1 %v2932_v0 }
 0xd5a   :  { %8394 = vmatmul.mubr.msk.f32.vlgmr.msra.gmra.mrb[36].mxu1 %vm58_vm0, %v9615_v50  ;;  %8407 = vmatprep.subr.mxu1 %v9461_v9 }
 0xd5b   :  { %v10031_v56 = vpack.c.bf16 %v9396_v55, %v9395_v15  ;;  %8409 = vmatprep.mubr.msk.f32.mxu1 %vm9463_vm2, %v9461_v9 }
 0xd5d   :  { %9099 = vmatpush3.bf16.msra.mxu0 %v10031_v56 }
 0xd5e   :  { %9100 = vmatprep.subr.bf16.mxu0 %v9462_v13 }
 0xd60   :  { %8389 = vmatmul.mubr.msk.f32.vlgmr.msra.gmra.mrb[32].mxu0 %vm398_vm3, %v2932_v0 }
 0xd61   :  { %9102 = vmatpush3.bf16.msra.mxu0 %v9621_v53  ;;  %8404 = vmatprep.mubr.msk.f32.mxu0 %vm9463_vm2, %v9461_v9 }
 0xd62   :  { %9103 = vmatprep.subr.bf16.mxu0 %v9462_v13 }
 0xd65   :  { %9105 = vmatpush3.bf16.msra.mxu0 %v9630_v57 }
 0xd66   :  { %8423 = vmatprep.subr.mxu0 %v9461_v9 }
 0xe2d   :  { %v3094_v33 = vpop.f32.mrb[36].mxu1 }
 0xe2e   :  { %v8395_v8 = vpop.f32.mrb[37].mxu1  ;;  %8405 = vmatmul.mubr.msk.f32.vlgmr.msra.gmra.mrb[34].mxu0 %vm398_vm3, %v3094_v33 }
 0xe2f   :  { %8425 = vmatprep.mubr.msk.f32.mxu0 %vm9463_vm2, %v9461_v9 }
 0xe33   :  { %v10047_v19 = vpop.f32.mrb[32].mxu0 }
 0xe34   :  { %v8390_v26 = vpop.f32.mrb[33].mxu0 }
 0xf01   :  { %v3167_v27 = vpop.f32.mrb[34].mxu0 }
 0xf02   :  { %v3168_v29 = vadd.f32 %v3167_v27, %v9665_v22  ;;  %v8406_v31 = vpop.f32.mrb[35].mxu0 }
 0xf04   :  { %v3171_v32 = vadd.f32 %v9663_v20, %v3168_v29 }
 0xf06   :  { %v3172_v1 = vmax.f32 %v3171_v32, 0.0 }
 0xf08   :  { %v3173_v5 = vadd.f32 %v3172_v1, %v2932_v0 }
 0xf0a   :  { %8408 = vmatpush3.msra.mxu1 %v3173_v5 }
 0xf0b   :  { %8410 = vmatmul.mubr.msk.f32.vlgmr.msra.gmra.mrb[38].mxu1 %vm58_vm0, %v9615_v50  ;;  %9106 = vmatprep.subr.bf16.mxu1 %v9462_v13 }
 0xf0c   :  { %9108 = vmatpush3.bf16.msra.mxu1 %v9621_v53  ;;  %8420 = vmatprep.mubr.msk.f32.mxu1 %vm9463_vm2, %v9461_v9 }
 0xf0d   :  { %9109 = vmatprep.subr.bf16.mxu1 %v9462_v13 }
 0xf10   :  { %9111 = vmatpush3.bf16.msra.mxu1 %v9630_v57 }
 0xf11   :  { %8439 = vmatprep.subr.mxu1 %v9461_v9 }
 0xfde   :  { %v3240_v6 = vpop.f32.mrb[38].mxu1 }
 0xfdf   :  { %v8411_v47 = vpop.f32.mrb[39].mxu1  ;;  %8421 = vmatmul.mubr.msk.f32.vlgmr.msra.gmra.mrb[40].mxu1 %vm398_vm3, %v3240_v6 }
 0xfe0   :  { %8441 = vmatprep.mubr.msk.f32.mxu1 %vm9463_vm2, %v9461_v9 }
0x10b2   :  { %v3313_v46 = vpop.f32.mrb[40].mxu1 }
0x10b3   :  { %v3314_v45 = vadd.f32 %v3313_v46, %v9713_v48  ;;  %v8422_v61 = vpop.f32.mrb[41].mxu1 }
0x10b5   :  { %v3317_v37 = vadd.f32 %v9663_v20, %v3314_v45 }
0x10b7   :  { %v3318_v63 = vmax.f32 %v3317_v37, 0.0 }
0x10b9   :  { %v3319_v0 = vadd.f32 %v3318_v63, %v3173_v5 }
0x10bb   :  { %8424 = vmatpush3.msra.mxu0 %v3319_v0 }
0x10bc   :  { %8426 = vmatmul.mubr.msk.f32.vlgmr.msra.gmra.mrb[36].mxu0 %vm58_vm0, %v9615_v50  ;;  %9112 = vmatprep.subr.bf16.mxu0 %v9462_v13 }
0x10bd   :  { %9114 = vmatpush3.bf16.msra.mxu0 %v9621_v53  ;;  %8436 = vmatprep.mubr.msk.f32.mxu0 %vm9463_vm2, %v9461_v9 }
0x10be   :  { %9115 = vmatprep.subr.bf16.mxu0 %v9462_v13 }
0x10c1   :  { %9117 = vmatpush3.bf16.msra.mxu0 %v9630_v57 }
0x10c2   :  { %9118 = vmatprep.subr.bf16.mxu0 %v9462_v13 }
0x118f   :  { %v3386_v52 = vpop.f32.mrb[36].mxu0 }
0x1190   :  { %v8427_v55 = vpop.f32.mrb[37].mxu0  ;;  %8437 = vmatmul.mubr.msk.f32.vlgmr.msra.gmra.mrb[38].mxu0 %vm398_vm3, %v3386_v52 }
0x1191   :  { %9120 = vmatpush3.bf16.msra.mxu0 %v9811_v2  ;;  %8457 = vmatprep.mubr.msk.f32.mxu0 %vm9463_vm2, %v9461_v9 }
0x1192   :  { %9121 = vmatprep.subr.bf16.mxu0 %v9462_v13 }
0x1195   :  { %9123 = vmatpush3.bf16.msra.mxu0 %v9822_v7 }
0x1196   :  { %9131 = vmatprep.subr.bf16.mxu0 %v9827_v16 }
0x1263   :  { %v3459_v15 = vpop.f32.mrb[38].mxu0 }
0x1264   :  { %v3460_v33 = vadd.f32 %v3459_v15, %v9767_v24  ;;  %v8438_v8 = vpop.f32.mrb[39].mxu0 }
0x1266   :  { %v3463_v26 = vadd.f32 %v9663_v20, %v3460_v33 }
0x1268   :  { %v3464_v27 = vmax.f32 %v3463_v26, 0.0 }
0x126a   :  { %v10083_v29 = vadd.f32 %v3464_v27, %v3319_v0 }
0x126c   :  { %8440 = vmatpush3.msra.mxu1 %v10083_v29 }
0x126d   :  { %8442 = vmatmul.mubr.msk.f32.vlgmr.msra.gmra.mrb[42].mxu1 %vm58_vm0, %v9776_v35  ;;  %8444 = vmatprep.subr.mxu1 %v10083_v29 }
0x126e   :  { %8445 = vmatpush3.msra.mxu1 %v10083_v29  ;;  %8446 = vmatprep.mubr.msk.f32.mxu1 %vm58_vm0, %v9801_v59 }
0x126f   :  { %9124 = vmatprep.subr.bf16.mxu1 %v9462_v13 }
0x1271   :  { %8447 = vmatmul.mubr.msk.f32.vlgmr.msra.gmra.mrb[44].mxu1 %vm58_vm0, %v9806_v62 }
0x1272   :  { %9126 = vmatpush3.bf16.msra.mxu1 %v9841_v25  ;;  %8468 = vmatprep.mubr.msk.f32.mxu1 %vm9463_vm2, %v9461_v9 }
0x1273   :  { %9127 = vmatprep.subr.bf16.mxu1 %v9462_v13 }
0x1276   :  { %9129 = vmatpush3.bf16.msra.mxu1 %v9849_v38 }
0x1277   :  { %8493 = vmatprep.subr.mxu1 %v9461_v9 }
0x1279   :  { %8469 = vmatmul.mubr.msk.f32.vlgmr.msra.gmra.mrb[46].mxu1 %vm398_vm3, %v10083_v29 }
0x127a   :  { %8495 = vmatprep.mubr.msk.f32.mxu1 %vm9463_vm2, %v9461_v9 }
0x1340   :  { %v3532_v20 = vpop.f32.mrb[42].mxu1 }
0x1341   :  { %v8443_v31 = vpop.f32.mrb[43].mxu1  ;;  %8458 = vmatmul.mubr.msk.f32.vlgmr.msra.gmra.mrb[40].mxu0 %vm398_vm3, %v3532_v20 }
0x1342   :  { %9133 = vmatpush3.bf16.msra.mxu0 %v9827_v16 }
0x1343   :  { %9135 = vmatprep.subr.bf16.mxu0 %v9834_v14 }
0x1344   :  { %v8448_v32 = vpop.f32.mrb[44].mxu1 }
0x1345   :  { %v3602_v1 = vpop.f32.mrb[45].mxu1 }
0x1346   :  { %9137 = vmatpush3.bf16.msra.mxu0 %v9834_v14  ;;  %8479 = vmatprep.mubr.msk.f32.mxu0 %vm398_vm3, %v3602_v1 }
0x1347   :  { %9139 = vmatprep.subr.bf16.mxu0 %v9838_v18 }
0x1349   :  { %8480 = vmatmul.mubr.msk.f32.vlgmr.msra.gmra.mrb[42].mxu0 %vm398_vm3, %v8448_v32 }
0x134a   :  { %9141 = vmatpush3.bf16.msra.mxu0 %v9838_v18  ;;  %8490 = vmatprep.mubr.msk.f32.mxu0 %vm398_vm3, %v9847_v36 }
0x134b   :  { %9143 = vmatprep.subr.bf16.mxu0 %v9854_v44 }
0x134c   :  { %v3753_v5 = vpop.f32.mrb[46].mxu1 }
0x134d   :  { %v8470_v6 = vpop.f32.mrb[47].mxu1 }
0x134e   :  { %9145 = vmatpush3.bf16.msra.mxu0 %v9854_v44 }
0x134f   :  { %9155 = vmatprep.subr.bf16.mxu0 %v9462_v13 }
0x1351   :  { %8491 = vmatmul.mubr.msk.f32.vlgmr.msra.gmra.mrb[42].mxu0 %vm398_vm3, %v9843_v34 }
0x1352   :  { %9157 = vmatpush3.bf16.msra.mxu0 %v9942_v39  ;;  %8524 = vmatprep.mubr.msk.f32.mxu0 %vm9463_vm2, %v9461_v9 }
0x1353   :  { %9158 = vmatprep.subr.bf16.mxu0 %v9462_v13 }
0x1356   :  { %9160 = vmatpush3.bf16.msra.mxu0 %v9948_v4 }
0x1357   :  { %9167 = vmatprep.subr.bf16.mxu0 %v9462_v13 }
0x1414   :  { %v3680_v47 = vpop.f32.mrb[40].mxu0 }
0x1415   :  { %v3681_v46 = vadd.f32 %v3680_v47, %v9910_v58  ;;  %v8459_v45 = vpop.f32.mrb[41].mxu0 }
0x1417   :  { %v3757_v61 = vadd.f32 %v3753_v5, %v3681_v46 }
0x1419   :  { %v3758_v37 = vadd.f32 %v9916_v12, %v3757_v61 }
0x141b   :  { %v3919_v63 = vmax.f32 %v3758_v37, 0.0 }
0x141d   :  { %8494 = vmatpush3.msra.mxu1 %v3919_v63 }
0x141e   :  { %8496 = vmatmul.mubr.msk.f32.vlgmr.msra.gmra.mrb[48].mxu1 %vm58_vm0, %v9776_v35  ;;  %9146 = vmatprep.subr.bf16.mxu1 %v9462_v13 }
0x141f   :  { %8502 = vmatprep.mubr.msk.f32.mxu1 %vm9463_vm2, %v9461_v9 }
0x1424   :  { %v8492_v0 = vpop.f32.mrb[42].mxu0 }
0x1425   :  { %v3916_v52 = vadd.f32 %v8492_v0, %v9929_v11  ;;  %v3906_v55 = vpop.f32.mrb[43].mxu0 }
0x1426   :  { %v3915_v15 = vadd.f32 %v3906_v55, %v9935_v17 }
0x1427   :  { %v3918_v33 = vadd.f32 %v9927_v54, %v3916_v52 }
0x1428   :  { %v3917_v8 = vadd.f32 %v9927_v54, %v3915_v15 }
0x1429   :  { %v3921_v26 = vmax.f32 %v3918_v33, 0.0 }
0x142a   :  { %v3920_v27 = vmax.f32 %v3917_v8, 0.0 }
0x142c   :  { %v9147_v20 = vpack.c.bf16 %v3921_v26, %v3920_v27 }
0x142e   :  { %9148 = vmatpush3.bf16.msra.mxu1 %v9147_v20 }
0x142f   :  { %9149 = vmatprep.subr.bf16.mxu1 %v9462_v13 }
0x1431   :  { %8503 = vmatmul.mubr.msk.f32.vlgmr.msra.gmra.mrb[50].mxu1 %vm62_vm1, %v9799_v30 }
0x1432   :  { %9151 = vmatpush3.bf16.msra.mxu1 %v9955_v43  ;;  %8513 = vmatprep.mubr.msk.f32.mxu1 %vm9463_vm2, %v9461_v9 }
0x1433   :  { %9152 = vmatprep.subr.bf16.mxu1 %v9462_v13 }
0x1436   :  { %9154 = vmatpush3.bf16.msra.mxu1 %v9959_v49 }
0x1437   :  { %9161 = vmatprep.subr.bf16.mxu1 %v9462_v13 }
0x14f1   :  { %v3988_v31 = vpop.f32.mrb[48].mxu1 }
0x14f2   :  { %v8497_v32 = vpop.f32.mrb[49].mxu1  ;;  %8525 = vmatmul.mubr.msk.f32.vlgmr.msra.gmra.mrb[44].mxu0 %vm398_vm3, %v3988_v31 }
0x14f3   :  { %9169 = vmatpush3.bf16.msra.mxu0 %v9963_v3  ;;  %8546 = vmatprep.mubr.msk.f32.mxu0 %vm9463_vm2, %v9461_v9 }
0x14f4   :  { %9170 = vmatprep.subr.bf16.mxu0 %v9462_v13 }
0x14f7   :  { %9172 = vmatpush3.bf16.msra.mxu0 %v9966_v23 }
0x14f8   :  { %9179 = vmatprep.subr.bf16.mxu0 %v9462_v13 }
0x14fa   :  { %8547 = vmatmul.mubr.msk.f32.vlgmr.msra.gmra.mrb[46].mxu0 %vm398_vm3, %v10083_v29 }
0x14fb   :  { %9181 = vmatpush3.bf16.msra.mxu0 %v10022_v60  ;;  %8568 = vmatprep.mubr.msk.f32.mxu0 %vm9463_vm2, %v9461_v9 }
0x14fc   :  { %9182 = vmatprep.subr.bf16.mxu0 %v9462_v13 }
0x14ff   :  { %9184 = vmatpush3.bf16.msra.mxu0 %v10031_v56 }
0x1500   :  { %8587 = vmatprep.subr.mxu0 %v9461_v9 }
0x1504   :  { %v4058_v1 = vpop.f32.mrb[50].mxu1 }
0x1505   :  { %v8504_v5 = vpop.f32.mrb[51].mxu1  ;;  %8514 = vmatmul.mubr.msk.f32.vlgmr.msra.gmra.mrb[52].mxu1 %vm398_vm3, %v4058_v1 }
0x1506   :  { %9163 = vmatpush3.bf16.msra.mxu1 %v9978_v28  ;;  %8535 = vmatprep.mubr.msk.f32.mxu1 %vm9463_vm2, %v9461_v9 }
0x1507   :  { %9164 = vmatprep.subr.bf16.mxu1 %v9462_v13 }
0x150a   :  { %9166 = vmatpush3.bf16.msra.mxu1 %v9982_v40 }
0x150b   :  { %9173 = vmatprep.subr.bf16.mxu1 %v9462_v13 }
0x150d   :  { %8536 = vmatmul.mubr.msk.f32.vlgmr.msra.gmra.mrb[54].mxu1 %vm398_vm3, %v3919_v63 }
0x150e   :  { %9175 = vmatpush3.bf16.msra.mxu1 %v9996_v41  ;;  %8557 = vmatprep.mubr.msk.f32.mxu1 %vm9463_vm2, %v9461_v9 }
0x150f   :  { %9176 = vmatprep.subr.bf16.mxu1 %v9462_v13 }
0x1512   :  { %9178 = vmatpush3.bf16.msra.mxu1 %v10002_v42 }
0x1513   :  { %8571 = vmatprep.subr.mxu1 %v9461_v9 }
0x15c5   :  { %v4204_v6 = vpop.f32.mrb[44].mxu0 }
0x15c6   :  { %v8526_v47 = vpop.f32.mrb[45].mxu0 }
0x15cd   :  { %v4350_v46 = vpop.f32.mrb[46].mxu0 }
0x15ce   :  { %v8548_v45 = vpop.f32.mrb[47].mxu0 }
0x15d8   :  { %v4131_v61 = vpop.f32.mrb[52].mxu1 }
0x15d9   :  { %v4205_v37 = vadd.f32 %v4204_v6, %v4131_v61  ;;  %v8515_v0 = vpop.f32.mrb[53].mxu1 }
0x15e0   :  { %v4277_v52 = vpop.f32.mrb[54].mxu1 }
0x15e1   :  { %v4281_v63 = vadd.f32 %v4277_v52, %v4205_v37  ;;  %v8537_v55 = vpop.f32.mrb[55].mxu1 }
0x15e3   :  { %v4282_v15 = vadd.f32 %v10009_v51, %v4281_v63 }
0x15e5   :  { %v4283_v33 = vmax.f32 %v4282_v15, 0.0 }
0x15e7   :  { %8558 = vmatmul.mubr.msk.f32.vlgmr.msra.gmra.mrb[56].mxu1 %vm398_vm3, %v4283_v33 }
0x15e8   :  { %8573 = vmatprep.mubr.msk.f32.mxu1 %vm9463_vm2, %v9461_v9 }
0x16ba   :  { %v4423_v8 = vpop.f32.mrb[56].mxu1 }
0x16bb   :  { %v4424_v26 = vadd.f32 %v4423_v8, %v4350_v46  ;;  %v8559_v27 = vpop.f32.mrb[57].mxu1  ;;  %v10202_v8 = vld [vmem:[%s10504_s8 + $0x2] ss:$0 sm:$0xff] }
0x16bd   :  { %v4427_v20 = vadd.f32 %v10019_v10, %v4424_v26 }
0x16bf   :  { %v7613_v31 = vmul.f32 -1.442695, %v4427_v20 }
0x16c1   :  { %9415 = vpow2.f32 %v7613_v31 }
0x16cb   :  { %v9416_v32 = vpop.eup %9415 }
0x16cc   :  { %v4431_v1 = vadd.f32 1.0, %v9416_v32 }
0x16ce   :  { %9417 = vrcp.f32 %v4431_v1 }
0x16d8   :  { %v9418_v5 = vpop.eup %9417 }
0x16d9   :  { %4436 = vperm.xlu1 %9376, %v9418_v5   ;;  %v4440_v6 = vsub.f32 1.0, %v9418_v5 }
0x16dd   :  { %4443 = vperm.xlu1 %9376, %v4440_v6  }
0x1758   :  { %v4437_v47 = vpop.permute.xlu1 %4436 }
0x1759   :  { %v4439_v61 = vmul.f32 %v4437_v47, %v4283_v33 }
0x175c   :  { %v4444_v45 = vpop.permute.xlu1 %4443 }
0x175d   :  { %v4446_v37 = vmul.f32 %v4444_v45, %v10083_v29 }
0x175f   :  { %v4447_v0 = vadd.f32 %v4446_v37, %v4439_v61 }
0x1761   :  { %8569 = vmatmul.mubr.msk.f32.vlgmr.msra.gmra.mrb[48].mxu0 %vm398_vm3, %v4447_v0  ;;  %8572 = vmatpush3.msra.mxu1 %v4447_v0 }
0x1762   :  { %8574 = vmatmul.mubr.msk.f32.vlgmr.msra.gmra.mrb[58].mxu1 %vm58_vm0, %v9615_v50  ;;  %9185 = vmatprep.subr.bf16.mxu1 %v9462_v13 }
0x1763   :  { %9187 = vmatpush3.bf16.msra.mxu1 %v9621_v53  ;;  %8584 = vmatprep.mubr.msk.f32.mxu1 %vm9463_vm2, %v9461_v9 }
0x1764   :  { %9188 = vmatprep.subr.bf16.mxu1 %v9462_v13  ;;  %8589 = vmatprep.mubr.msk.f32.mxu0 %vm9463_vm2, %v9461_v9 }
0x1767   :  { %9190 = vmatpush3.bf16.msra.mxu1 %v9630_v57 }
0x1768   :  { %8603 = vmatprep.subr.mxu1 %v9461_v9 }
0x1834   :  { %v10193_v29 = vpop.f32.mrb[48].mxu0 }
0x1835   :  { %v8570_v46 = vpop.f32.mrb[49].mxu0  ;;  %v4594_v52 = vpop.f32.mrb[58].mxu1 }
0x1836   :  { %v8575_v63 = vpop.f32.mrb[59].mxu1  ;;  %8585 = vmatmul.mubr.msk.f32.vlgmr.msra.gmra.mrb[60].mxu1 %vm398_vm3, %v4594_v52 }
0x1837   :  { %8605 = vmatprep.mubr.msk.f32.mxu1 %vm9463_vm2, %v9461_v9 }
0x1909   :  { %v4667_v55 = vpop.f32.mrb[60].mxu1 }
0x190a   :  { %v4668_v15 = vadd.f32 %v4667_v55, %v9665_v22  ;;  %v8586_v33 = vpop.f32.mrb[61].mxu1 }
0x190c   :  { %v4671_v26 = vadd.f32 %v10202_v8, %v4668_v15 }
0x190e   :  { %v4672_v27 = vmax.f32 %v4671_v26, 0.0 }
0x1910   :  { %v4673_v20 = vadd.f32 %v4672_v27, %v4447_v0 }
0x1912   :  { %8588 = vmatpush3.msra.mxu0 %v4673_v20 }
0x1913   :  { %8590 = vmatmul.mubr.msk.f32.vlgmr.msra.gmra.mrb[50].mxu0 %vm58_vm0, %v9615_v50  ;;  %9191 = vmatprep.subr.bf16.mxu0 %v9462_v13 }
0x1914   :  { %9193 = vmatpush3.bf16.msra.mxu0 %v9621_v53  ;;  %8600 = vmatprep.mubr.msk.f32.mxu0 %vm9463_vm2, %v9461_v9 }
0x1915   :  { %9194 = vmatprep.subr.bf16.mxu0 %v9462_v13 }
0x1918   :  { %9196 = vmatpush3.bf16.msra.mxu0 %v9630_v57 }
0x1919   :  { %8619 = vmatprep.subr.mxu0 %v9461_v9 }
0x19e6   :  { %v4740_v31 = vpop.f32.mrb[50].mxu0 }
0x19e7   :  { %v8591_v32 = vpop.f32.mrb[51].mxu0  ;;  %8601 = vmatmul.mubr.msk.f32.vlgmr.msra.gmra.mrb[52].mxu0 %vm398_vm3, %v4740_v31 }
0x19e8   :  { %8621 = vmatprep.mubr.msk.f32.mxu0 %vm9463_vm2, %v9461_v9 }
0x1aba   :  { %v4813_v1 = vpop.f32.mrb[52].mxu0 }
0x1abb   :  { %v4814_v5 = vadd.f32 %v4813_v1, %v9713_v48  ;;  %v8602_v6 = vpop.f32.mrb[53].mxu0 }
0x1abd   :  { %v4817_v47 = vadd.f32 %v10202_v8, %v4814_v5 }
0x1abf   :  { %v4818_v45 = vmax.f32 %v4817_v47, 0.0 }
0x1ac1   :  { %v4819_v61 = vadd.f32 %v4818_v45, %v4673_v20 }
0x1ac3   :  { %8604 = vmatpush3.msra.mxu1 %v4819_v61 }
0x1ac4   :  { %8606 = vmatmul.mubr.msk.f32.vlgmr.msra.gmra.mrb[62].mxu1 %vm58_vm0, %v9615_v50  ;;  %9197 = vmatprep.subr.bf16.mxu1 %v9462_v13 }
0x1ac5   :  { %9199 = vmatpush3.bf16.msra.mxu1 %v9621_v53  ;;  %8616 = vmatprep.mubr.msk.f32.mxu1 %vm9463_vm2, %v9461_v9 }
0x1ac6   :  { %9200 = vmatprep.subr.bf16.mxu1 %v9462_v13 }
0x1ac9   :  { %9202 = vmatpush3.bf16.msra.mxu1 %v9630_v57 }
0x1aca   :  { %9203 = vmatprep.subr.bf16.mxu1 %v9462_v13 }
0x1b97   :  { %v4886_v37 = vpop.f32.mrb[62].mxu1 }
0x1b98   :  { %v8607_v0 = vpop.f32.mrb[63].mxu1  ;;  %8617 = vmatmul.mubr.msk.f32.vlgmr.msra.gmra.mrb[64].mxu1 %vm398_vm3, %v4886_v37 }
0x1b99   :  { %9205 = vmatpush3.bf16.msra.mxu1 %v9811_v2  ;;  %8637 = vmatprep.mubr.msk.f32.mxu1 %vm9463_vm2, %v9461_v9 }
0x1b9a   :  { %9206 = vmatprep.subr.bf16.mxu1 %v9462_v13 }
0x1b9d   :  { %9208 = vmatpush3.bf16.msra.mxu1 %v9822_v7 }
0x1b9e   :  { %9216 = vmatprep.subr.bf16.mxu1 %v9827_v16 }
0x1c6b   :  { %v4959_v46 = vpop.f32.mrb[64].mxu1 }
0x1c6c   :  { %v4960_v52 = vadd.f32 %v4959_v46, %v9767_v24  ;;  %v8618_v63 = vpop.f32.mrb[65].mxu1 }
0x1c6e   :  { %v4963_v55 = vadd.f32 %v10202_v8, %v4960_v52 }
0x1c70   :  { %v4964_v15 = vmax.f32 %v4963_v55, 0.0 }
0x1c72   :  { %v10237_v33 = vadd.f32 %v4964_v15, %v4819_v61 }
0x1c74   :  { %8620 = vmatpush3.msra.mxu0 %v10237_v33 }
0x1c75   :  { %8622 = vmatmul.mubr.msk.f32.vlgmr.msra.gmra.mrb[54].mxu0 %vm58_vm0, %v9776_v35  ;;  %8624 = vmatprep.subr.mxu0 %v10237_v33 }
0x1c76   :  { %8625 = vmatpush3.msra.mxu0 %v10237_v33  ;;  %8626 = vmatprep.mubr.msk.f32.mxu0 %vm58_vm0, %v9801_v59 }
0x1c77   :  { %9209 = vmatprep.subr.bf16.mxu0 %v9462_v13 }
0x1c79   :  { %8627 = vmatmul.mubr.msk.f32.vlgmr.msra.gmra.mrb[56].mxu0 %vm58_vm0, %v9806_v62 }
0x1c7a   :  { %9211 = vmatpush3.bf16.msra.mxu0 %v9841_v25  ;;  %8648 = vmatprep.mubr.msk.f32.mxu0 %vm9463_vm2, %v9461_v9 }
0x1c7b   :  { %9212 = vmatprep.subr.bf16.mxu0 %v9462_v13 }
0x1c7e   :  { %9214 = vmatpush3.bf16.msra.mxu0 %v9849_v38 }
0x1c7f   :  { %8673 = vmatprep.subr.mxu0 %v9461_v9 }
0x1c81   :  { %8649 = vmatmul.mubr.msk.f32.vlgmr.msra.gmra.mrb[58].mxu0 %vm398_vm3, %v10237_v33 }
0x1c82   :  { %8675 = vmatprep.mubr.msk.f32.mxu0 %vm9463_vm2, %v9461_v9 }
0x1d48   :  { %v5032_v26 = vpop.f32.mrb[54].mxu0 }
0x1d49   :  { %v8623_v27 = vpop.f32.mrb[55].mxu0  ;;  %8638 = vmatmul.mubr.msk.f32.vlgmr.msra.gmra.mrb[66].mxu1 %vm398_vm3, %v5032_v26 }
0x1d4a   :  { %9218 = vmatpush3.bf16.msra.mxu1 %v9827_v16 }
0x1d4b   :  { %9220 = vmatprep.subr.bf16.mxu1 %v9834_v14 }
0x1d4c   :  { %v8628_v20 = vpop.f32.mrb[56].mxu0 }
0x1d4d   :  { %v5102_v31 = vpop.f32.mrb[57].mxu0 }
0x1d4e   :  { %9222 = vmatpush3.bf16.msra.mxu1 %v9834_v14  ;;  %8659 = vmatprep.mubr.msk.f32.mxu1 %vm398_vm3, %v5102_v31 }
0x1d4f   :  { %9224 = vmatprep.subr.bf16.mxu1 %v9838_v18 }
0x1d51   :  { %8660 = vmatmul.mubr.msk.f32.vlgmr.msra.gmra.mrb[68].mxu1 %vm398_vm3, %v8628_v20 }
0x1d52   :  { %9226 = vmatpush3.bf16.msra.mxu1 %v9838_v18  ;;  %8670 = vmatprep.mubr.msk.f32.mxu1 %vm398_vm3, %v9847_v36 }
0x1d53   :  { %9228 = vmatprep.subr.bf16.mxu1 %v9854_v44 }
0x1d54   :  { %v5253_v32 = vpop.f32.mrb[58].mxu0 }
0x1d55   :  { %v8650_v1 = vpop.f32.mrb[59].mxu0 }
0x1d56   :  { %9230 = vmatpush3.bf16.msra.mxu1 %v9854_v44 }
0x1d57   :  { %9240 = vmatprep.subr.bf16.mxu1 %v9462_v13 }
0x1d59   :  { %8671 = vmatmul.mubr.msk.f32.vlgmr.msra.gmra.mrb[68].mxu1 %vm398_vm3, %v9843_v34 }
0x1d5a   :  { %9242 = vmatpush3.bf16.msra.mxu1 %v9942_v39  ;;  %8704 = vmatprep.mubr.msk.f32.mxu1 %vm9463_vm2, %v9461_v9 }
0x1d5b   :  { %9243 = vmatprep.subr.bf16.mxu1 %v9462_v13 }
0x1d5e   :  { %9245 = vmatpush3.bf16.msra.mxu1 %v9948_v4 }
0x1d5f   :  { %9252 = vmatprep.subr.bf16.mxu1 %v9462_v13 }
0x1e1c   :  { %v5180_v5 = vpop.f32.mrb[66].mxu1 }
0x1e1d   :  { %v5181_v6 = vadd.f32 %v5180_v5, %v9910_v58  ;;  %v8639_v47 = vpop.f32.mrb[67].mxu1 }
0x1e1f   :  { %v5257_v45 = vadd.f32 %v5253_v32, %v5181_v6 }
0x1e21   :  { %v5258_v61 = vadd.f32 %v9916_v12, %v5257_v45 }
0x1e23   :  { %v5419_v37 = vmax.f32 %v5258_v61, 0.0 }
0x1e25   :  { %8674 = vmatpush3.msra.mxu0 %v5419_v37 }
0x1e26   :  { %8676 = vmatmul.mubr.msk.f32.vlgmr.msra.gmra.mrb[60].mxu0 %vm58_vm0, %v9776_v35  ;;  %9231 = vmatprep.subr.bf16.mxu0 %v9462_v13 }
0x1e27   :  { %8682 = vmatprep.mubr.msk.f32.mxu0 %vm9463_vm2, %v9461_v9 }
0x1e2c   :  { %v8672_v0 = vpop.f32.mrb[68].mxu1 }
0x1e2d   :  { %v5416_v46 = vadd.f32 %v8672_v0, %v9929_v11  ;;  %v5406_v52 = vpop.f32.mrb[69].mxu1 }
0x1e2e   :  { %v5415_v63 = vadd.f32 %v5406_v52, %v9935_v17 }
0x1e2f   :  { %v5418_v55 = vadd.f32 %v9927_v54, %v5416_v46 }
0x1e30   :  { %v5417_v12 = vadd.f32 %v9927_v54, %v5415_v63 }
0x1e31   :  { %v5421_v15 = vmax.f32 %v5418_v55, 0.0 }
0x1e32   :  { %v5420_v26 = vmax.f32 %v5417_v12, 0.0 }
0x1e34   :  { %v9232_v27 = vpack.c.bf16 %v5421_v15, %v5420_v26 }
0x1e36   :  { %9233 = vmatpush3.bf16.msra.mxu0 %v9232_v27 }
0x1e37   :  { %9234 = vmatprep.subr.bf16.mxu0 %v9462_v13 }
0x1e39   :  { %8683 = vmatmul.mubr.msk.f32.vlgmr.msra.gmra.mrb[62].mxu0 %vm62_vm1, %v9799_v30 }
0x1e3a   :  { %9236 = vmatpush3.bf16.msra.mxu0 %v9955_v43  ;;  %8693 = vmatprep.mubr.msk.f32.mxu0 %vm9463_vm2, %v9461_v9 }
0x1e3b   :  { %9237 = vmatprep.subr.bf16.mxu0 %v9462_v13 }
0x1e3e   :  { %9239 = vmatpush3.bf16.msra.mxu0 %v9959_v49 }
0x1e3f   :  { %9246 = vmatprep.subr.bf16.mxu0 %v9462_v13 }
0x1ef9   :  { %v5488_v54 = vpop.f32.mrb[60].mxu0 }
0x1efa   :  { %v8677_v20 = vpop.f32.mrb[61].mxu0  ;;  %8705 = vmatmul.mubr.msk.f32.vlgmr.msra.gmra.mrb[70].mxu1 %vm398_vm3, %v5488_v54 }
0x1efb   :  { %9254 = vmatpush3.bf16.msra.mxu1 %v9963_v3  ;;  %8726 = vmatprep.mubr.msk.f32.mxu1 %vm9463_vm2, %v9461_v9 }
0x1efc   :  { %9255 = vmatprep.subr.bf16.mxu1 %v9462_v13 }
0x1eff   :  { %9257 = vmatpush3.bf16.msra.mxu1 %v9966_v23 }
0x1f00   :  { %9264 = vmatprep.subr.bf16.mxu1 %v9462_v13 }
0x1f02   :  { %8727 = vmatmul.mubr.msk.f32.vlgmr.msra.gmra.mrb[72].mxu1 %vm398_vm3, %v10237_v33 }
0x1f03   :  { %9266 = vmatpush3.bf16.msra.mxu1 %v10022_v60  ;;  %8748 = vmatprep.mubr.msk.f32.mxu1 %vm9463_vm2, %v9461_v9 }
0x1f04   :  { %9267 = vmatprep.subr.bf16.mxu1 %v9462_v13 }
0x1f07   :  { %9269 = vmatpush3.bf16.msra.mxu1 %v10031_v56 }
0x1f08   :  { %8767 = vmatprep.subr.mxu1 %v9461_v9 }
0x1f0c   :  { %v5558_v31 = vpop.f32.mrb[62].mxu0 }
0x1f0d   :  { %v8684_v32 = vpop.f32.mrb[63].mxu0  ;;  %8694 = vmatmul.mubr.msk.f32.vlgmr.msra.gmra.mrb[64].mxu0 %vm398_vm3, %v5558_v31 }
0x1f0e   :  { %9248 = vmatpush3.bf16.msra.mxu0 %v9978_v28  ;;  %8715 = vmatprep.mubr.msk.f32.mxu0 %vm9463_vm2, %v9461_v9 }
0x1f0f   :  { %9249 = vmatprep.subr.bf16.mxu0 %v9462_v13 }
0x1f12   :  { %9251 = vmatpush3.bf16.msra.mxu0 %v9982_v40 }
0x1f13   :  { %9258 = vmatprep.subr.bf16.mxu0 %v9462_v13 }
0x1f15   :  { %8716 = vmatmul.mubr.msk.f32.vlgmr.msra.gmra.mrb[66].mxu0 %vm398_vm3, %v5419_v37 }
0x1f16   :  { %9260 = vmatpush3.bf16.msra.mxu0 %v9996_v41  ;;  %8737 = vmatprep.mubr.msk.f32.mxu0 %vm9463_vm2, %v9461_v9 }
0x1f17   :  { %9261 = vmatprep.subr.bf16.mxu0 %v9462_v13 }
0x1f1a   :  { %9263 = vmatpush3.bf16.msra.mxu0 %v10002_v42 }
0x1f1b   :  { %8751 = vmatprep.subr.mxu0 %v9461_v9 }
0x1fcd   :  { %v5704_v1 = vpop.f32.mrb[70].mxu1 }
0x1fce   :  { %v8706_v5 = vpop.f32.mrb[71].mxu1 }
0x1fd5   :  { %v5850_v6 = vpop.f32.mrb[72].mxu1 }
0x1fd6   :  { %v8728_v47 = vpop.f32.mrb[73].mxu1 }
0x1fe0   :  { %v5631_v45 = vpop.f32.mrb[64].mxu0 }
0x1fe1   :  { %v5705_v61 = vadd.f32 %v5704_v1, %v5631_v45  ;;  %v8695_v0 = vpop.f32.mrb[65].mxu0 }
0x1fe8   :  { %v5777_v46 = vpop.f32.mrb[66].mxu0 }
0x1fe9   :  { %v5781_v37 = vadd.f32 %v5777_v46, %v5705_v61  ;;  %v8717_v52 = vpop.f32.mrb[67].mxu0 }
0x1feb   :  { %v5782_v63 = vadd.f32 %v10009_v51, %v5781_v37 }
0x1fed   :  { %v5783_v55 = vmax.f32 %v5782_v63, 0.0 }
0x1fef   :  { %8738 = vmatmul.mubr.msk.f32.vlgmr.msra.gmra.mrb[68].mxu0 %vm398_vm3, %v5783_v55 }
0x1ff0   :  { %8753 = vmatprep.mubr.msk.f32.mxu0 %vm9463_vm2, %v9461_v9 }
0x20c2   :  { %v5923_v12 = vpop.f32.mrb[68].mxu0 }
0x20c3   :  { %v5924_v15 = vadd.f32 %v5923_v12, %v5850_v6  ;;  %v8739_v26 = vpop.f32.mrb[69].mxu0 }
0x20c5   :  { %v5927_v27 = vadd.f32 %v10019_v10, %v5924_v15 }
0x20c7   :  { %v7637_v54 = vmul.f32 -1.442695, %v5927_v27 }
0x20c9   :  { %9419 = vpow2.f32 %v7637_v54 }
0x20d3   :  { %v9420_v20 = vpop.eup %9419 }
0x20d4   :  { %v5931_v31 = vadd.f32 1.0, %v9420_v20 }
0x20d6   :  { %9421 = vrcp.f32 %v5931_v31 }
0x20e0   :  { %v9422_v32 = vpop.eup %9421 }
0x20e1   :  { %5936 = vperm.xlu1 %9376, %v9422_v32   ;;  %v5940_v1 = vsub.f32 1.0, %v9422_v32 }
0x20e5   :  { %5943 = vperm.xlu1 %9376, %v5940_v1  }
0x2160   :  { %v5937_v51 = vpop.permute.xlu1 %5936 }
0x2161   :  { %v5939_v47 = vmul.f32 %v5937_v51, %v5783_v55 }
0x2164   :  { %v5944_v5 = vpop.permute.xlu1 %5943 }
0x2165   :  { %v5946_v45 = vmul.f32 %v5944_v5, %v10237_v33 }
0x2167   :  { %v5947_v61 = vadd.f32 %v5946_v45, %v5939_v47  ;;  %v9429_v45 = vld [vmem:[%s10504_s8 + $0x5] ss:$0 sm:$0xff] }
0x2169   :  { %8749 = vmatmul.mubr.msk.f32.vlgmr.msra.gmra.mrb[74].mxu1 %vm398_vm3, %v5947_v61  ;;  %8752 = vmatpush3.msra.mxu0 %v5947_v61 }
0x216a   :  { %8754 = vmatmul.mubr.msk.f32.vlgmr.msra.gmra.mrb[70].mxu0 %vm58_vm0, %v9615_v50  ;;  %9270 = vmatprep.subr.bf16.mxu0 %v9462_v13 }
0x216b   :  { %9272 = vmatpush3.bf16.msra.mxu0 %v9621_v53  ;;  %8764 = vmatprep.mubr.msk.f32.mxu0 %vm9463_vm2, %v9461_v9 }
0x216c   :  { %9273 = vmatprep.subr.bf16.mxu0 %v9462_v13  ;;  %8769 = vmatprep.mubr.msk.f32.mxu1 %vm9463_vm2, %v9461_v9 }
0x216f   :  { %9275 = vmatpush3.bf16.msra.mxu0 %v9630_v57 }
0x2170   :  { %8783 = vmatprep.subr.mxu0 %v9461_v9 }
0x223c   :  { %v10347_v10 = vpop.f32.mrb[74].mxu1 }
0x223d   :  { %v8750_v33 = vpop.f32.mrb[75].mxu1  ;;  %v6094_v6 = vpop.f32.mrb[70].mxu0 }
0x223e   :  { %v8755_v0 = vpop.f32.mrb[71].mxu0  ;;  %8765 = vmatmul.mubr.msk.f32.vlgmr.msra.gmra.mrb[72].mxu0 %vm398_vm3, %v6094_v6 }
0x223f   :  { %8785 = vmatprep.mubr.msk.f32.mxu0 %vm9463_vm2, %v9461_v9 }
0x2311   :  { %v6167_v46 = vpop.f32.mrb[72].mxu0 }
0x2312   :  { %v6168_v37 = vadd.f32 %v6167_v46, %v9665_v22  ;;  %v8766_v52 = vpop.f32.mrb[73].mxu0 }
0x2314   :  { %v6171_v63 = vadd.f32 %v10202_v8, %v6168_v37 }
0x2316   :  { %v6172_v55 = vmax.f32 %v6171_v63, 0.0 }
0x2318   :  { %v6173_v12 = vadd.f32 %v6172_v55, %v5947_v61 }
0x231a   :  { %8768 = vmatpush3.msra.mxu1 %v6173_v12 }
0x231b   :  { %8770 = vmatmul.mubr.msk.f32.vlgmr.msra.gmra.mrb[76].mxu1 %vm58_vm0, %v9615_v50  ;;  %9276 = vmatprep.subr.bf16.mxu1 %v9462_v13 }
0x231c   :  { %9278 = vmatpush3.bf16.msra.mxu1 %v9621_v53  ;;  %8780 = vmatprep.mubr.msk.f32.mxu1 %vm9463_vm2, %v9461_v9 }
0x231d   :  { %9279 = vmatprep.subr.bf16.mxu1 %v9462_v13 }
0x2320   :  { %9281 = vmatpush3.bf16.msra.mxu1 %v9630_v57 }
0x2321   :  { %8799 = vmatprep.subr.mxu1 %v9461_v9 }
0x23ee   :  { %v6240_v22 = vpop.f32.mrb[76].mxu1 }
0x23ef   :  { %v8771_v15 = vpop.f32.mrb[77].mxu1  ;;  %8781 = vmatmul.mubr.msk.f32.vlgmr.msra.gmra.mrb[78].mxu1 %vm398_vm3, %v6240_v22 }
0x23f0   :  { %8801 = vmatprep.mubr.msk.f32.mxu1 %vm9463_vm2, %v9461_v9 }
0x24c2   :  { %v6313_v26 = vpop.f32.mrb[78].mxu1 }
0x24c3   :  { %v6314_v27 = vadd.f32 %v6313_v26, %v9713_v48  ;;  %v8782_v54 = vpop.f32.mrb[79].mxu1 }
0x24c5   :  { %v6317_v20 = vadd.f32 %v10202_v8, %v6314_v27 }
0x24c7   :  { %v6318_v31 = vmax.f32 %v6317_v20, 0.0 }
0x24c9   :  { %v6319_v32 = vadd.f32 %v6318_v31, %v6173_v12  ;;  %v9431_v12 = vld [vmem:[%s10506_s10] ss:$0 sm:$0xff] }
0x24cb   :  { %8784 = vmatpush3.msra.mxu0 %v6319_v32 }
0x24cc   :  { %8786 = vmatmul.mubr.msk.f32.vlgmr.msra.gmra.mrb[74].mxu0 %vm58_vm0, %v9615_v50  ;;  %9282 = vmatprep.subr.bf16.mxu0 %v9462_v13 }
0x24cd   :  { %9284 = vmatpush3.bf16.msra.mxu0 %v9621_v53  ;;  %8796 = vmatprep.mubr.msk.f32.mxu0 %vm9463_vm2, %v9461_v9 }
0x24ce   :  { %9285 = vmatprep.subr.bf16.mxu0 %v9462_v13 }
0x24d1   :  { %9287 = vmatpush3.bf16.msra.mxu0 %v9630_v57 }
0x24d2   :  { %9288 = vmatprep.subr.bf16.mxu0 %v9462_v13 }
0x259f   :  { %v6386_v48 = vpop.f32.mrb[74].mxu0 }
0x25a0   :  { %v8787_v1 = vpop.f32.mrb[75].mxu0  ;;  %8797 = vmatmul.mubr.msk.f32.vlgmr.msra.gmra.mrb[76].mxu0 %vm398_vm3, %v6386_v48 }
0x25a1   :  { %9290 = vmatpush3.bf16.msra.mxu0 %v9811_v2  ;;  %8817 = vmatprep.mubr.msk.f32.mxu0 %vm9463_vm2, %v9461_v9 }
0x25a2   :  { %9291 = vmatprep.subr.bf16.mxu0 %v9462_v13 }
0x25a5   :  { %9293 = vmatpush3.bf16.msra.mxu0 %v9822_v7 }
0x25a6   :  { %9301 = vmatprep.subr.bf16.mxu0 %v9827_v16 }
0x2673   :  { %v6459_v50 = vpop.f32.mrb[76].mxu0 }
0x2674   :  { %v6460_v53 = vadd.f32 %v6459_v50, %v9767_v24  ;;  %v8798_v57 = vpop.f32.mrb[77].mxu0 }
0x2676   :  { %v6463_v51 = vadd.f32 %v10202_v8, %v6460_v53 }
0x2678   :  { %v6464_v5 = vmax.f32 %v6463_v51, 0.0 }
0x267a   :  { %v10386_v47 = vadd.f32 %v6464_v5, %v6319_v32 }
0x267c   :  { %8800 = vmatpush3.msra.mxu1 %v10386_v47 }
0x267d   :  { %8802 = vmatmul.mubr.msk.f32.vlgmr.msra.gmra.mrb[80].mxu1 %vm58_vm0, %v9776_v35  ;;  %8804 = vmatprep.subr.mxu1 %v10386_v47 }
0x267e   :  { %8805 = vmatpush3.msra.mxu1 %v10386_v47  ;;  %8806 = vmatprep.mubr.msk.f32.mxu1 %vm58_vm0, %v9801_v59 }
0x267f   :  { %9294 = vmatprep.subr.bf16.mxu1 %v9462_v13 }
0x2681   :  { %8807 = vmatmul.mubr.msk.f32.vlgmr.msra.gmra.mrb[82].mxu1 %vm58_vm0, %v9806_v62 }
0x2682   :  { %9296 = vmatpush3.bf16.msra.mxu1 %v9841_v25  ;;  %8828 = vmatprep.mubr.msk.f32.mxu1 %vm9463_vm2, %v9461_v9 }
0x2683   :  { %9297 = vmatprep.subr.bf16.mxu1 %v9462_v13 }
0x2686   :  { %9299 = vmatpush3.bf16.msra.mxu1 %v9849_v38 }
0x2687   :  { %8853 = vmatprep.subr.mxu1 %v9461_v9 }
0x2689   :  { %8829 = vmatmul.mubr.msk.f32.vlgmr.msra.gmra.mrb[84].mxu1 %vm398_vm3, %v10386_v47 }
0x268a   :  { %8855 = vmatprep.mubr.msk.f32.mxu1 %vm9463_vm2, %v9461_v9 }
0x2750   :  { %v6532_v24 = vpop.f32.mrb[80].mxu1 }
0x2751   :  { %v8803_v59 = vpop.f32.mrb[81].mxu1  ;;  %8818 = vmatmul.mubr.msk.f32.vlgmr.msra.gmra.mrb[78].mxu0 %vm398_vm3, %v6532_v24 }
0x2752   :  { %9303 = vmatpush3.bf16.msra.mxu0 %v9827_v16 }
0x2753   :  { %9305 = vmatprep.subr.bf16.mxu0 %v9834_v14 }
0x2754   :  { %v8808_v62 = vpop.f32.mrb[82].mxu1 }
0x2755   :  { %v6602_v2 = vpop.f32.mrb[83].mxu1 }
0x2756   :  { %9307 = vmatpush3.bf16.msra.mxu0 %v9834_v14  ;;  %8839 = vmatprep.mubr.msk.f32.mxu0 %vm398_vm3, %v6602_v2  ;;  %v251_v2 = vand.u32 127, %v212_v21 }
0x2757   :  { %9309 = vmatprep.subr.bf16.mxu0 %v9838_v18 }
0x2758   :  { %vm3021_vm4 = vcmp.eq.s32.totalorder %v251_v2, 0  ;;  %vm4521_vm5 = vcmp.eq.s32.totalorder %v251_v2, 1  ;;  %vm6021_vm6 = vcmp.eq.s32.totalorder %v251_v2, 2  ;;  %vm7521_vm7 = vcmp.eq.s32.totalorder %v251_v2, 3 }
0x2759   :  { %8840 = vmatmul.mubr.msk.f32.vlgmr.msra.gmra.mrb[80].mxu0 %vm398_vm3, %v8808_v62 }
0x275a   :  { %9311 = vmatpush3.bf16.msra.mxu0 %v9838_v18  ;;  %8850 = vmatprep.mubr.msk.f32.mxu0 %vm398_vm3, %v9847_v36 }
0x275b   :  { %9313 = vmatprep.subr.bf16.mxu0 %v9854_v44 }
0x275c   :  { %v6753_v7 = vpop.f32.mrb[84].mxu1 }
0x275d   :  { %v8830_v16 = vpop.f32.mrb[85].mxu1 }
0x275e   :  { %9315 = vmatpush3.bf16.msra.mxu0 %v9854_v44 }
0x275f   :  { %9325 = vmatprep.subr.bf16.mxu0 %v9462_v13 }
0x2761   :  { %8851 = vmatmul.mubr.msk.f32.vlgmr.msra.gmra.mrb[80].mxu0 %vm398_vm3, %v9843_v34  ;;  %v9428_v34 = vld [vmem:[%s10504_s8 + $0x4] ss:$0 sm:$0xff] }
0x2762   :  { %9327 = vmatpush3.bf16.msra.mxu0 %v9942_v39  ;;  %8884 = vmatprep.mubr.msk.f32.mxu0 %vm9463_vm2, %v9461_v9 }
0x2763   :  { %9328 = vmatprep.subr.bf16.mxu0 %v9462_v13 }
0x2766   :  { %9330 = vmatpush3.bf16.msra.mxu0 %v9948_v4 }
0x2767   :  { %9337 = vmatprep.subr.bf16.mxu0 %v9462_v13 }
0x2824   :  { %v6680_v14 = vpop.f32.mrb[78].mxu0 }
0x2825   :  { %v6681_v18 = vadd.f32 %v6680_v14, %v9910_v58  ;;  %v8819_v25 = vpop.f32.mrb[79].mxu0 }
0x2827   :  { %v6757_v36 = vadd.f32 %v6753_v7, %v6681_v18 }
0x2829   :  { %v6758_v38 = vadd.f32 %v9428_v34, %v6757_v36 }
0x282b   :  { %v6919_v44 = vmax.f32 %v6758_v38, 0.0 }
0x282d   :  { %8854 = vmatpush3.msra.mxu1 %v6919_v44 }
0x282e   :  { %8856 = vmatmul.mubr.msk.f32.vlgmr.msra.gmra.mrb[86].mxu1 %vm58_vm0, %v9776_v35  ;;  %9316 = vmatprep.subr.bf16.mxu1 %v9462_v13 }
0x282f   :  { %8862 = vmatprep.mubr.msk.f32.mxu1 %vm9463_vm2, %v9461_v9 }
0x2834   :  { %v8852_v39 = vpop.f32.mrb[80].mxu0 }
0x2835   :  { %v6916_v58 = vadd.f32 %v8852_v39, %v9929_v11  ;;  %v6906_v4 = vpop.f32.mrb[81].mxu0 }
0x2836   :  { %v6915_v8 = vadd.f32 %v6906_v4, %v9935_v17 }
0x2837   :  { %v6918_v61 = vadd.f32 %v9429_v45, %v6916_v58 }
0x2838   :  { %v6917_v33 = vadd.f32 %v9429_v45, %v6915_v8 }
0x2839   :  { %v6921_v6 = vmax.f32 %v6918_v61, 0.0 }
0x283a   :  { %v6920_v0 = vmax.f32 %v6917_v33, 0.0 }
0x283c   :  { %v9317_v35 = vpack.c.bf16 %v6921_v6, %v6920_v0 }
0x283e   :  { %9318 = vmatpush3.bf16.msra.mxu1 %v9317_v35 }
0x283f   :  { %9319 = vmatprep.subr.bf16.mxu1 %v9462_v13 }
0x2841   :  { %8863 = vmatmul.mubr.msk.f32.vlgmr.msra.gmra.mrb[88].mxu1 %vm62_vm1, %v9799_v30 }
0x2842   :  { %9321 = vmatpush3.bf16.msra.mxu1 %v9955_v43  ;;  %8873 = vmatprep.mubr.msk.f32.mxu1 %vm9463_vm2, %v9461_v9 }
0x2843   :  { %9322 = vmatprep.subr.bf16.mxu1 %v9462_v13 }
0x2846   :  { %9324 = vmatpush3.bf16.msra.mxu1 %v9959_v49 }
0x2847   :  { %9331 = vmatprep.subr.bf16.mxu1 %v9462_v13 }
0x2901   :  { %v6988_v11 = vpop.f32.mrb[86].mxu1 }
0x2902   :  { %v8857_v17 = vpop.f32.mrb[87].mxu1  ;;  %8885 = vmatmul.mubr.msk.f32.vlgmr.msra.gmra.mrb[82].mxu0 %vm398_vm3, %v6988_v11 }
0x2903   :  { %9339 = vmatpush3.bf16.msra.mxu0 %v9963_v3  ;;  %8906 = vmatprep.mubr.msk.f32.mxu0 %vm9463_vm2, %v9461_v9 }
0x2904   :  { %9340 = vmatprep.subr.bf16.mxu0 %v9462_v13 }
0x2907   :  { %9342 = vmatpush3.bf16.msra.mxu0 %v9966_v23 }
0x2908   :  { %9349 = vmatprep.subr.bf16.mxu0 %v9462_v13 }
0x290a   :  { %8907 = vmatmul.mubr.msk.f32.vlgmr.msra.gmra.mrb[84].mxu0 %vm398_vm3, %v10386_v47 }
0x290b   :  { %9351 = vmatpush3.bf16.msra.mxu0 %v10022_v60  ;;  %8928 = vmatprep.mubr.msk.f32.mxu0 %vm9463_vm2, %v9461_v9 }
0x290c   :  { %9352 = vmatprep.subr.bf16.mxu0 %v9462_v13 }
0x290f   :  { %9354 = vmatpush3.bf16.msra.mxu0 %v10031_v56 }
0x2914   :  { %v7058_v30 = vpop.f32.mrb[88].mxu1 }
0x2915   :  { %v8864_v43 = vpop.f32.mrb[89].mxu1  ;;  %8874 = vmatmul.mubr.msk.f32.vlgmr.msra.gmra.mrb[90].mxu1 %vm398_vm3, %v7058_v30 }
0x2916   :  { %9333 = vmatpush3.bf16.msra.mxu1 %v9978_v28  ;;  %8895 = vmatprep.mubr.msk.f32.mxu1 %vm9463_vm2, %v9461_v9 }
0x2917   :  { %9334 = vmatprep.subr.bf16.mxu1 %v9462_v13 }
0x291a   :  { %9336 = vmatpush3.bf16.msra.mxu1 %v9982_v40 }
0x291b   :  { %9343 = vmatprep.subr.bf16.mxu1 %v9462_v13 }
0x291d   :  { %8896 = vmatmul.mubr.msk.f32.vlgmr.msra.gmra.mrb[92].mxu1 %vm398_vm3, %v6919_v44 }
0x291e   :  { %9345 = vmatpush3.bf16.msra.mxu1 %v9996_v41  ;;  %8917 = vmatprep.mubr.msk.f32.mxu1 %vm9463_vm2, %v9461_v9  ;;  %v9430_v41 = vld [vmem:[%s10504_s8 + $0x6] ss:$0 sm:$0xff] }
0x291f   :  { %9346 = vmatprep.subr.bf16.mxu1 %v9462_v13 }
0x2922   :  { %9348 = vmatpush3.bf16.msra.mxu1 %v10002_v42 }
0x29d5   :  { %v7204_v49 = vpop.f32.mrb[82].mxu0 }
0x29d6   :  { %v8886_v3 = vpop.f32.mrb[83].mxu0 }
0x29dd   :  { %v7350_v23 = vpop.f32.mrb[84].mxu0 }
0x29de   :  { %v8908_v28 = vpop.f32.mrb[85].mxu0 }
0x29e8   :  { %v7131_v60 = vpop.f32.mrb[90].mxu1 }
0x29e9   :  { %v7205_v56 = vadd.f32 %v7204_v49, %v7131_v60  ;;  %v8875_v40 = vpop.f32.mrb[91].mxu1 }
0x29f0   :  { %v7277_v46 = vpop.f32.mrb[92].mxu1 }
0x29f1   :  { %v7281_v37 = vadd.f32 %v7277_v46, %v7205_v56  ;;  %v8897_v52 = vpop.f32.mrb[93].mxu1 }
0x29f3   :  { %v7282_v63 = vadd.f32 %v9430_v41, %v7281_v37 }
0x29f5   :  { %v7283_v9 = vmax.f32 %v7282_v63, 0.0 }
0x29f7   :  { %8918 = vmatmul.mubr.msk.f32.vlgmr.msra.gmra.mrb[94].mxu1 %vm398_vm3, %v7283_v9 }
0x2aca   :  { %v7423_v13 = vpop.f32.mrb[94].mxu1 }
0x2acb   :  { %v7424_v42 = vadd.f32 %v7423_v13, %v7350_v23  ;;  %v8919_v55 = vpop.f32.mrb[95].mxu1 }
0x2acd   :  { %v7427_v22 = vadd.f32 %v9431_v12, %v7424_v42 }
0x2acf   :  { %v7661_v15 = vmul.f32 -1.442695, %v7427_v22 }
0x2ad1   :  { %9423 = vpow2.f32 %v7661_v15 }
0x2adb   :  { %v9424_v26 = vpop.eup %9423 }
0x2adc   :  { %v7431_v27 = vadd.f32 1.0, %v9424_v26 }
0x2ade   :  { %9425 = vrcp.f32 %v7431_v27 }
0x2ae8   :  { %v9426_v54 = vpop.eup %9425 }
0x2ae9   :  { %7436 = vperm.xlu0 %9375, %v9426_v54   ;;  %v7440_v20 = vsub.f32 1.0, %v9426_v54 }
0x2aeb   :  { %7443 = vperm.xlu1 %9376, %v7440_v20  }
0x2aed   :  { %2945 = vrot.lane.b32.xlu0 %v9431_v12, %s9464_s0 }
0x2b68   :  { %v7437_v31 = vpop.permute.xlu0 %7436 }
0x2b69   :  { %v7439_v48 = vmul.f32 %v7437_v31, %v7283_v9 }
0x2b6a   :  { %v7444_v32 = vpop.permute.xlu1 %7443 }
0x2b6b   :  { %v7446_v1 = vmul.f32 %v7444_v32, %v10386_v47 }
0x2b6c   :  { %v2946_v50 = vpop.permute.xlu0 %2945 }
0x2b6d   :  { %v7447_v53 = vadd.f32 %v7446_v1, %v7439_v48  ;;  %v4518_v57 = vadd.f32 %v10193_v29, %v2946_v50  ;;  %v3018_v51 = vadd.f32 %v10047_v19, %v2946_v50  ;;  %v6018_v5 = vadd.f32 %v10347_v10, %v2946_v50 }
0x2b6f   :  { %4524 = vperm.xlu0 %9375, %v4518_v57   ;;  %3024 = vperm.xlu1 %9376, %v3018_v51  }
0x2b70   :  { %8929 = vmatmul.mubr.msk.f32.vlgmr.msra.gmra.mrb[86].mxu0 %vm398_vm3, %v7447_v53 }
0x2b73   :  { %6024 = vperm.xlu1 %9376, %v6018_v5  }
0x2bee   :  { %v3025_v47 = vpop.permute.xlu1 %3024  ;;  %v4525_v7 = vpop.permute.xlu0 %4524 }
0x2bef   :  { %v3027_v29 = vsel %vm3021_vm4, %v3025_v47, 0.0 }
0x2bf0   :  { %v4527_v16 = vsel %vm4521_vm5, %v4525_v7, %v3027_v29 }
0x2bf2   :  { %v6025_v19 = vpop.permute.xlu1 %6024 }
0x2bf3   :  { %v6027_v14 = vsel %vm6021_vm6, %v6025_v19, %v4527_v16 }
0x2c43   :  { %v7517_v24 = vpop.f32.mrb[86].mxu0 }
0x2c44   :  { %v7518_v59 = vadd.f32 %v7517_v24, %v2946_v50  ;;  %v8930_v62 = vpop.f32.mrb[87].mxu0 }
0x2c46   :  { %7524 = vperm.xlu0 %9375, %v7518_v59  }
0x2cc5   :  { %v7525_v18 = vpop.permute.xlu0 %7524 }
0x2cc6   :  { %v7527_v10 = vsel %vm7521_vm7, %v7525_v18, %v6027_v14 }
0x2cc7   :  { %7529 = vst.msk [vmem:[%s10507_s11] sm:$0xff] %vm7528_vm8, %v7527_v10 }
0x2cc8   :  { %7534 = vsyncpa [#allocation3], 1 }

</bundles_post_ra>
